<compile_context>
chip_gen: v7x
topology: tpu7x:2x2x1
jax: 0.10.0
libtpu: 0.0.40
codegen_flags: <defaults>
</compile_context>

<pallas_src>
import functools
import math

import jax
import jax.numpy as jnp
import numpy as np
from jax.experimental import pallas as pl
from jax.experimental.pallas import tpu as pltpu


# ----------------------------------------------------------------------------
# VMEM / tiling helpers
# ----------------------------------------------------------------------------

def _vmem_capacity_bytes():
    try:
        info = pltpu.get_tpu_info()
        cap = int(getattr(info, "vmem_capacity_bytes", 0))
        if cap > 0:
            return cap
    except Exception:
        pass
    return 64 * 1024 * 1024  # conservative (v7x-sized) default


def _vmem_limit_bytes(capacity):
    # ~40 MiB on 64 MiB parts (v7x), 64 MiB on 128 MiB parts (v5e/v6e).
    return (40 << 20) if capacity <= (64 << 20) else (64 << 20)


def _cost_estimate(flops, bytes_accessed):
    try:
        return pl.CostEstimate(flops=int(flops), transcendentals=0,
                               bytes_accessed=int(bytes_accessed))
    except Exception:
        return None


def _pick_tile(total, align, limit):
    """Largest tile <= min(total, limit): either `total` itself (full-extent
    block, always layout-legal) or a multiple of `align`, preferring an exact
    divisor of `total` so there is no masked tail tile."""
    limit = max(1, int(limit))
    if limit >= total or total <= align:
        return total
    t = max(align, (limit // align) * align)
    d = t
    while d > align and total % d != 0:
        d -= align
    return d if total % d == 0 else t


# ----------------------------------------------------------------------------
# Fused path: 1x1 conv + PixelShuffle in one kernel
# ----------------------------------------------------------------------------

def _fused_conv_shuffle_kernel(w_ref, x_ref, o_ref, *, c_out, r, rows, width):
    # w_ref: (C*r, C_in)  output channels in PyTorch order (c_out, i, j)
    # x_ref: (1, C_in, rows*width)   `rows` whole input rows, lane-flat
    # o_ref: (1, c_out, rows*r, width*r)
    y = jnp.dot(w_ref[...], x_ref[0], preferred_element_type=jnp.float32)
    # PixelShuffle riffle: y[(c, i, j), (row, w)] -> out[c, row*r + i, w*r + j]
    y = y.reshape(c_out, r, r, rows, width)        # (c, i, j, row, w)
    y = y.transpose(0, 3, 1, 4, 2)                 # (c, row, i, w, j)
    o_ref[0] = y.reshape(c_out, rows * r, width * r).astype(o_ref.dtype)


def _upsample_fused(x, weight, r):
    N, C, H, W = x.shape
    C2 = weight.shape[0]                           # C * r
    assert C2 == C * r and C2 % (r * r) == 0
    c_out = C2 // (r * r)

    cap = _vmem_capacity_bytes()
    budget = int(0.30 * cap)

    # Alignment so both the input tile (C, rows*W) and the fused output tile
    # (c_out, rows*r, W*r) keep legal (8, 128) layouts when they are not
    # full-extent blocks.
    lane_align = 128 // math.gcd(W, 128)
    align = (8 * lane_align) // math.gcd(8, lane_align)   # lcm(8, lane_align)

    # Per input row: double-buffered x + double-buffered fused output block
    # + f32 in-kernel temporaries for the riffle; weight double-buffer is fixed.
    bytes_per_row = (2 * C + 5 * C2) * W * 4
    weight_bytes = 2 * C2 * C * 4
    rows_limit = max(1, (budget - weight_bytes) // max(bytes_per_row, 1))
    rows = _pick_tile(H, align, rows_limit)
    if N == 1 and rows >= H and H >= 2 * align:
        rows = _pick_tile(H, align, H // 2)        # >= 2 grid points for 2 TCs

    grid = (N, pl.cdiv(H, rows))
    x_flat = x.reshape(N, C, H * W)                # free NCHW view, no transpose
    w2 = weight.reshape(C2, C)                     # rows already ordered (c, i, j)

    out_shape = jax.ShapeDtypeStruct((N, c_out, H * r, W * r), x.dtype)
    itemsize = jnp.dtype(x.dtype).itemsize
    cost = _cost_estimate(
        flops=2 * N * C2 * C * H * W,
        bytes_accessed=x.nbytes + w2.nbytes + N * c_out * H * r * W * r * itemsize,
    )

    kernel = functools.partial(_fused_conv_shuffle_kernel,
                               c_out=c_out, r=r, rows=rows, width=W)

    return pl.pallas_call(
        kernel,
        out_shape=out_shape,
        grid_spec=pltpu.PrefetchScalarGridSpec(
            num_scalar_prefetch=0,
            grid=grid,
            in_specs=[
                # Weight: constant index_map -> fetched once, stays resident.
                pl.BlockSpec((C2, C), lambda n, s: (0, 0)),
                # Activations: contiguous NCHW slab of `rows` whole input rows.
                pl.BlockSpec((1, C, rows * W), lambda n, s: (n, 0, s)),
            ],
            out_specs=pl.BlockSpec((1, c_out, rows * r, W * r),
                                   lambda n, s: (n, 0, s, 0)),
        ),
        compiler_params=pltpu.CompilerParams(
            dimension_semantics=("parallel", "parallel"),
            vmem_limit_bytes=_vmem_limit_bytes(cap),
        ),
        cost_estimate=cost,
    )(w2, x_flat)


# ----------------------------------------------------------------------------
# Fallback path: 1x1 conv kernel + XLA pixel shuffle (lowering-safe)
# ----------------------------------------------------------------------------

def _conv1x1_kernel(w_ref, x_ref, o_ref):
    # w_ref: (C_out, C_in), x_ref: (1, C_in, tile_hw), o_ref: (1, C_out, tile_hw)
    o_ref[0] = jnp.dot(w_ref[...], x_ref[0],
                       preferred_element_type=jnp.float32).astype(o_ref.dtype)


def _conv1x1_pallas(x_flat, w2):
    N, C, hw = x_flat.shape
    C2 = w2.shape[0]

    cap = _vmem_capacity_bytes()
    budget = int(0.30 * cap)
    bytes_per_col = (2 * C + 2 * C2) * 4           # double-buffered in + out cols
    weight_bytes = 2 * C2 * C * 4
    cols_limit = max(1, (budget - weight_bytes) // max(bytes_per_col, 1))
    align = 128                                    # keep output stores lane-dense
    tile_hw = _pick_tile(hw, align, cols_limit)
    if N == 1 and tile_hw >= hw and hw >= 2 * align:
        tile_hw = _pick_tile(hw, align, hw // 2)   # >= 2 grid points for 2 TCs

    grid = (N, pl.cdiv(hw, tile_hw))
    itemsize = jnp.dtype(x_flat.dtype).itemsize
    cost = _cost_estimate(
        flops=2 * N * C2 * C * hw,
        bytes_accessed=x_flat.nbytes + w2.nbytes + N * C2 * hw * itemsize,
    )

    return pl.pallas_call(
        _conv1x1_kernel,
        out_shape=jax.ShapeDtypeStruct((N, C2, hw), x_flat.dtype),
        grid_spec=pltpu.PrefetchScalarGridSpec(
            num_scalar_prefetch=0,
            grid=grid,
            in_specs=[
                pl.BlockSpec((C2, C), lambda n, s: (0, 0)),
                pl.BlockSpec((1, C, tile_hw), lambda n, s: (n, 0, s)),
            ],
            out_specs=pl.BlockSpec((1, C2, tile_hw), lambda n, s: (n, 0, s)),
        ),
        compiler_params=pltpu.CompilerParams(
            dimension_semantics=("parallel", "parallel"),
            vmem_limit_bytes=_vmem_limit_bytes(cap),
        ),
        cost_estimate=cost,
    )(w2, x_flat)


def _upsample_unfused(x, weight, r):
    N, C, H, W = x.shape
    C2 = weight.shape[0]
    c_out = C2 // (r * r)
    y = _conv1x1_pallas(x.reshape(N, C, H * W), weight.reshape(C2, C))
    y = y.reshape(N, c_out, r, r, H, W).transpose(0, 1, 4, 2, 5, 3)
    return y.reshape(N, c_out, H * r, W * r)


# ----------------------------------------------------------------------------
# Public forward
# ----------------------------------------------------------------------------

def upsample_forward(x, weight, upscale_factor=2):
    """UpSample forward: 1x1 conv (no bias) + PixelShuffle(upscale_factor).

    x:      (N, C, H, W)      NCHW, matches the PyTorch module input.
    weight: (C*r, C, 1, 1)    PyTorch Conv2d weight layout (O, I, kH, kW).
    returns (N, (C*r)//r^2, H*r, W*r)
    """
    r = upscale_factor
    try:
        out = _upsample_fused(x, weight, r)
        return jax.block_until_ready(out)
    except Exception:
        # The fused store-path riffle relies on minor-dim reshape/transpose
        # relayouts inside the kernel; if Mosaic rejects them on this TPU
        # generation, fall back to the Pallas conv kernel + XLA pixel shuffle.
        out = _upsample_unfused(x, weight, r)
        return jax.block_until_ready(out)


def _reference(x, weight, r=2):
    """Pure-JAX reference (conv via einsum + pixel shuffle)."""
    N, C, H, W = x.shape
    C2 = weight.shape[0]
    w = weight.reshape(C2, C)
    y = jnp.einsum("nchw,oc->nohw", x, w)
    c_out = C2 // (r * r)
    y = y.reshape(N, c_out, r, r, H, W).transpose(0, 1, 4, 2, 5, 3)
    return y.reshape(N, c_out, H * r, W * r)


if __name__ == "__main__":
    key = jax.random.PRNGKey(0)
    kx, kw = jax.random.split(key)

    N, C, H, W = 2, 4, 16, 16
    r = 2

    x = jax.random.normal(kx, (N, C, H, W), dtype=jnp.float32)
    # Deterministic synthetic Conv2d weight, PyTorch layout (C*r, C, 1, 1).
    weight = jax.random.normal(kw, (C * r, C, 1, 1), dtype=jnp.float32) * 0.1

    out = upsample_forward(x, weight, upscale_factor=r)
    out = jax.block_until_ready(out)

    ref = _reference(x, weight, r=r)
    assert out.shape == (N, C // 2, H * r, W * r), out.shape
    np.testing.assert_allclose(np.asarray(out), np.asarray(ref), rtol=1e-5, atol=1e-5)

    print("KERNEL_OK")
</pallas_src>

<mosaic_0001>
module attributes {stable_mosaic.version = 11 : i64} {
  func.func @_fused_conv_shuffle_kernel(%arg0: i32, %arg1: i32, %arg2: memref<8x4xf32, #tpu.memory_space<vmem>>, %arg3: memref<1x4x256xf32, #tpu.memory_space<vmem>>, %arg4: memref<1x2x32x32xf32, #tpu.memory_space<vmem>>) attributes {dimension_semantics = [#tpu.dimension_semantics<parallel>, #tpu.dimension_semantics<parallel>], iteration_bounds = array<i64: 2, 1>, scalar_prefetch = 0 : i64, scratch_operands = 0 : i64, tpu.core_type = #tpu.core_type<tc>, window_params = [{pipeline_mode = #tpu.pipeline_mode<synchronous>, transform_indices = @transform_0, window_bounds = array<i64: 8, 4>}, {transform_indices = @transform_1, window_bounds = array<i64: 1, 4, 256>}, {transform_indices = @transform_2, window_bounds = array<i64: 1, 2, 32, 32>}]} {
    %c0 = arith.constant 0 : index
    %c0_0 = arith.constant 0 : index
    %0 = vector.load %arg2[%c0, %c0_0] : memref<8x4xf32, #tpu.memory_space<vmem>>, vector<8x4xf32>
    %c0_1 = arith.constant 0 : index
    %c0_2 = arith.constant 0 : index
    %c0_3 = arith.constant 0 : index
    %1 = vector.load %arg3[%c0_1, %c0_2, %c0_3] : memref<1x4x256xf32, #tpu.memory_space<vmem>>, vector<1x4x256xf32>
    %2 = vector.shape_cast %1 : vector<1x4x256xf32> to vector<4x256xf32>
    %cst = arith.constant dense<0.000000e+00> : vector<8x256xf32>
    %3 = tpu.matmul %0, %2, %cst {dimension_numbers = #tpu.dot_dimension_numbers<[1], [0], [0], [1], [0, 0, 1, 1], [], []>} : vector<8x4xf32>, vector<4x256xf32>, vector<8x256xf32> -> vector<8x256xf32>
    %4 = vector.shape_cast %3 : vector<8x256xf32> to vector<2x2x2x16x16xf32>
    %5 = tpu.transpose %4, [0, 3, 1, 4, 2] : vector<2x2x2x16x16xf32> -> vector<2x16x2x16x2xf32>
    %6 = vector.shape_cast %5 : vector<2x16x2x16x2xf32> to vector<2x32x32xf32>
    %c0_4 = arith.constant 0 : index
    %c0_5 = arith.constant 0 : index
    %c0_6 = arith.constant 0 : index
    %c0_7 = arith.constant 0 : index
    %7 = vector.load %arg4[%c0_4, %c0_5, %c0_6, %c0_7] : memref<1x2x32x32xf32, #tpu.memory_space<vmem>>, vector<1x2x32x32xf32>
    %8 = vector.shape_cast %7 : vector<1x2x32x32xf32> to vector<2x32x32xf32>
    %9 = vector.shape_cast %6 : vector<2x32x32xf32> to vector<1x2x32x32xf32>
    tpu.vector_store %arg4[%c0_4, %c0_5, %c0_6, %c0_7], %9 {strides = array<i32>} : memref<1x2x32x32xf32, #tpu.memory_space<vmem>>, vector<1x2x32x32xf32>,
    return
  }
  func.func @transform_0(%arg0: i32, %arg1: i32) -> (i32, i32) {
    %c0_i32 = arith.constant 0 : i32
    %c0_i32_0 = arith.constant 0 : i32
    %c0_i32_1 = arith.constant 0 : i32
    return %c0_i32, %c0_i32_0 : i32, i32
  }
  func.func @transform_1(%arg0: i32, %arg1: i32) -> (i32, i32, i32) {
    %c0_i32 = arith.constant 0 : i32
    %c0_i32_0 = arith.constant 0 : i32
    return %arg0, %c0_i32, %arg1 : i32, i32, i32
  }
  func.func @transform_2(%arg0: i32, %arg1: i32) -> (i32, i32, i32, i32) {
    %c0_i32 = arith.constant 0 : i32
    %c0_i32_0 = arith.constant 0 : i32
    %c0_i32_1 = arith.constant 0 : i32
    return %arg0, %c0_i32, %arg1, %c0_i32_0 : i32, i32, i32, i32
  }
}

module attributes {stable_mosaic.version = 11 : i64} {
  func.func @_conv1x1_kernel(%arg0: i32, %arg1: i32, %arg2: memref<8x4xf32, #tpu.memory_space<vmem>>, %arg3: memref<1x4x256xf32, #tpu.memory_space<vmem>>, %arg4: memref<1x8x256xf32, #tpu.memory_space<vmem>>) attributes {dimension_semantics = [#tpu.dimension_semantics<parallel>, #tpu.dimension_semantics<parallel>], iteration_bounds = array<i64: 2, 1>, scalar_prefetch = 0 : i64, scratch_operands = 0 : i64, tpu.core_type = #tpu.core_type<tc>, window_params = [{pipeline_mode = #tpu.pipeline_mode<synchronous>, transform_indices = @transform_0, window_bounds = array<i64: 8, 4>}, {transform_indices = @transform_1, window_bounds = array<i64: 1, 4, 256>}, {transform_indices = @transform_2, window_bounds = array<i64: 1, 8, 256>}]} {
    %c0 = arith.constant 0 : index
    %c0_0 = arith.constant 0 : index
    %0 = vector.load %arg2[%c0, %c0_0] : memref<8x4xf32, #tpu.memory_space<vmem>>, vector<8x4xf32>
    %c0_1 = arith.constant 0 : index
    %c0_2 = arith.constant 0 : index
    %c0_3 = arith.constant 0 : index
    %1 = vector.load %arg3[%c0_1, %c0_2, %c0_3] : memref<1x4x256xf32, #tpu.memory_space<vmem>>, vector<1x4x256xf32>
    %2 = vector.shape_cast %1 : vector<1x4x256xf32> to vector<4x256xf32>
    %cst = arith.constant dense<0.000000e+00> : vector<8x256xf32>
    %3 = tpu.matmul %0, %2, %cst {dimension_numbers = #tpu.dot_dimension_numbers<[1], [0], [0], [1], [0, 0, 1, 1], [], []>} : vector<8x4xf32>, vector<4x256xf32>, vector<8x256xf32> -> vector<8x256xf32>
    %c0_4 = arith.constant 0 : index
    %c0_5 = arith.constant 0 : index
    %c0_6 = arith.constant 0 : index
    %4 = vector.load %arg4[%c0_4, %c0_5, %c0_6] : memref<1x8x256xf32, #tpu.memory_space<vmem>>, vector<1x8x256xf32>
    %5 = vector.shape_cast %4 : vector<1x8x256xf32> to vector<8x256xf32>
    %6 = vector.shape_cast %3 : vector<8x256xf32> to vector<1x8x256xf32>
    tpu.vector_store %arg4[%c0_4, %c0_5, %c0_6], %6 {strides = array<i32>} : memref<1x8x256xf32, #tpu.memory_space<vmem>>, vector<1x8x256xf32>,
    return
  }
  func.func @transform_0(%arg0: i32, %arg1: i32) -> (i32, i32) {
    %c0_i32 = arith.constant 0 : i32
    %c0_i32_0 = arith.constant 0 : i32
    %c0_i32_1 = arith.constant 0 : i32
    return %c0_i32, %c0_i32_0 : i32, i32
  }
  func.func @transform_1(%arg0: i32, %arg1: i32) -> (i32, i32, i32) {
    %c0_i32 = arith.constant 0 : i32
    %c0_i32_0 = arith.constant 0 : i32
    return %arg0, %c0_i32, %arg1 : i32, i32, i32
  }
  func.func @transform_2(%arg0: i32, %arg1: i32) -> (i32, i32, i32) {
    %c0_i32 = arith.constant 0 : i32
    %c0_i32_0 = arith.constant 0 : i32
    return %arg0, %c0_i32, %arg1 : i32, i32, i32
  }
}

</mosaic_0001>

<bundles_post_ra>
// kernel: tpu_custom_call.1
= control target key start
LH: loop header
LB: loop body
LE: loop exit
PB: predicated region body
PF: predicated region fallthrough
CT: control target
= control target key end

     0   :  { %7 = vsyncpa [#allocation3], 0  ;;  %s11619_s0 = inlined_call_operand.vmem [shape: f32[8,4], index: 0, kind: input, shape index: {}]   ;;  %s11620_s1 = inlined_call_operand.hbm [shape: f32[2,4,256], index: 1, kind: input, shape index: {}]   ;;  %s11621_s2 = inlined_call_operand.hbm [shape: f32[2,2,32,32], index: 2, kind: output, shape index: {}]  }
   0x1   :  { %9 = vsyncpa [#allocation3 + $0x1], 0 }
   0x2   :  { %10 = vsyncpa [#allocation4], 0 }
   0x3   :  { %12 = vsyncpa [#allocation4 + $0x1], 0  ;;  %s8754_s9 = smov 0   ;;  %s8756_s10 = smov 0  }
   0x4   :  { %s8758_s11 = smov 0   ;;  %s8760_s12 = smov 0  }
   0x5   :  { %s8762_s13 = smov 0   ;;  %s8764_s14 = smov 0  }
   0x6 LB: > { %s8490_s15 = sadd.s32 4294967295, %s8710_s14   ;;  %s8491_s16 = sadd.s32 4294967294, %s8710_s14   ;;  %s8710_s14 = sphi %s8764_s14, %s18_s14   ;;  %s8706_s13 = sphi %s8762_s13, %s11909_s13   ;;  %s8702_s12 = sphi %s8760_s12, %s11908_s12   ;;  %s8698_s11 = sphi %s8758_s11, %s11907_s11   ;;  %s8694_s10 = sphi %s8756_s10, %s11906_s10   ;;  %s8690_s9 = sphi %s8754_s9, %s11905_s9  }
   0x7   : > { %s30_s17 = sadd.s32 1, %s8706_s13  ;;  %s60_s18 = sadd.s32 1, %s8698_s11 }
   0x8   : > { %p32_p0 = scmp.ge.s32.totalorder %s30_s17, 2  ;;  %p67_p1 = scmp.ne.s32.totalorder %s8698_s11, %s8694_s10 }
   0x9   : > { %p68_p2 = scmp.eq.s32.totalorder %s8710_s14, 0  ;;  %p73_p3 = scmp.ne.s32.totalorder %s8694_s10, %s8690_s9 }
   0xa   : > { %s11911_s17 = smov (%p32_p0, %s30_s17), 0  ;;  %p74_p5 = scmp.eq.s32.totalorder %s8490_s15, 0 }
   0xb   : > { %p8795_p4 = por %p68_p2, %p67_p1  ;;  %s55_s20 = ssub.s32 %s8706_s13, %s11911_s17 }
   0xc   : > { %p99_p6 = scmp.eq.s32.totalorder %s8490_s15, 1  ;;  %p58_p7 = scmp.eq.s32.totalorder %s55_s20, 0 }
   0xd   : > { %p8801_p8 = por %p74_p5, %p73_p3  ;;  %p105_p10 = scmp.eq.s32.totalorder %s8491_s16, 1 }
   0xe   : > { %p8805_p9 = por %p99_p6, %p67_p1  ;;  %p8522_p13 = scmp.lt.s32.totalorder %s8710_s14, 2 }
   0xf   : > { %s8810_s23 = scalar_select %p58_p7, %s8698_s11, %s60_s18  }
  0x10   : > { %s11698_s22 = scalar_select %p8805_p9, 1, 0 }
  0x11   : > { %p8812_p11 = por %p105_p10, %p73_p3  ;;  %s128_s25 = sand.u32 1, %s8698_s11  }
  0x12   : > { %s8494_s26 = sshll.u32 %s128_s25, 3  ;;  %s8508_s27 = sshll.u32 %s8706_s13, 7 }
  0x13   : > { %s11699_s24 = scalar_select %p8812_p11, 1, 0 }
  0x14   : > { %s8823_s30 = scalar_lea.hbm %s11620_s1, %s8508_s27  ;;  %s132_s3 = scalar_lea.vmem [#allocation2], %s8494_s26 }
  0x15   : > { %s142_s4 = sshll.u32 %s132_s3, 4  ;;  %p8829_p0 = pnand %p8522_p13, %p8795_p4  ;;  %s8825_s4 = int_to_ptr.vmem [resolvable:$true] %s142_s4 }
  0x16   : > { %s129_s6 = scalar_lea.sflag [#allocation3], %s128_s25  ;;  %s8598_s7 = scalar_lea.hbm %s8823_s30, 128 }
  0x17   : > { %p8599_p3 = scmp.ne.s32.totalorder %s8823_s30, %s8598_s7  ;;  %p8600_p5 = pneg %p8829_p0 }
  0x18   : > { %s8603_s16 = scalar_lea.hbm %s11620_s1, 256  ;;  %p8604_p4 = scmp.lt.u32.totalorder %s8823_s30, %s11620_s1 }
  0x19   : > { %p8601_p6 = pnand %p8600_p5, %p8599_p3  ;;  %p8605_p10 = scmp.lt.u32.totalorder %s8603_s16, %s8598_s7 }
  0x1a   : > { %p8607_p12 = scmp.lt.u32.totalorder %s8598_s7, %s8823_s30 }
  0x1b   : > { %p8602_p7 = pneg %p8601_p6  ;;  %p8606_p13 = por %p8605_p10, %p8604_p4 }
  0x1d   : > { %p8608_p1 = por %p8607_p12, %p8606_p13 }
  0x1f   : > { %p8609_p2 = pnand %p8608_p1, %p8602_p7 }
  0x21   : > { %8612 = shalt.err (!%p8609_p2)
}
  0x22   : > { %s8613_s20 = scalar_lea.vmem %s8825_s4, 128  ;;  %s8712_s25 = smov [#allocation2]  }
  0x23   : > { %p8614_p3 = scmp.ne.s32.totalorder %s8825_s4, %s8613_s20  ;;  %s8618_s26 = sshll.u32 %s8712_s25, 4  ;;  %s8619_s26 = int_to_ptr.vmem [resolvable:$false] %s8618_s26 }
  0x24   : > { %s8620_s27 = scalar_lea.vmem %s8619_s26, 256  ;;  %p8621_p9 = scmp.lt.s32.totalorder %s8825_s4, %s8619_s26 }
  0x25   : > { %p8616_p6 = pnand %p8614_p3, %p8600_p5  ;;  %p8622_p4 = scmp.lt.s32.totalorder %s8620_s27, %s8613_s20 }
  0x27   : > { %p8617_p11 = pneg %p8616_p6  ;;  %p8623_p10 = por %p8622_p4, %p8621_p9 }
  0x29   : > { %p8624_p12 = pnand %p8623_p10, %p8617_p11 }
  0x2b   : > { %8627 = shalt.err (!%p8624_p12)
}
  0x2c   : > { %8517 = dma.hbm_to_vmem [thread:$0]  (!%p8829_p0), %s8823_s30, 128, %s8825_s4, %s129_s6  }
  0x2d   : > { %p11701_p1 = scmp.lt.s32.totalorder %s8710_s14, 3  ;;  %p11702_p2 = scmp.ge.s32.totalorder %s8710_s14, 1 }
  0x2f   : > { %p148_p5 = pnand %p11702_p2, %p11701_p1 }
  0x31   : > { %151 = sbr.rel (%p148_p5) target bundleno = 1213 (0x4bd), region = 28 }
  0x38   : > { %s8865_s28 = sand.u32 1, %s8694_s10  }
  0x39   : > { %s8498_s29 = sshll.u32 %s8865_s28, 3  ;;  %s154_s3 = scalar_lea.sflag [#allocation3], %s8865_s28 }
  0x3a   : > { %s157_s7 = scalar_lea.vmem [#allocation2], %s8498_s29 }
  0x3b   : > { %8681 = dma.done.wait (%p8801_p8), %s154_s3, 128  }
  0x3c   : > { %8683 = vsyncadd (%p8801_p8), %s154_s3, 4294967168  ;;  %v8713_v0 = vmov 0.0   ;;  %v181_v1 = vld [vmem:[%s157_s7] sm:$0xff]  ;;  %vm188_vm0 = vcmask 1043456   ;;  %vm184_vm1 = vcmask 31744   ;;  %s8714_s5 = smov 80   ;;  %v313_v10 = vlaneseq }
  0x3d   : > { %257 = vmatprep.mubr.f32.mxu0 %v8713_v0  ;;  %v183_v2 = vcombine.high %v181_v1, %v181_v1  ;;  %v180_v3 = vld [vmem:[%s11619_s0] sm:$0xff]  ;;  %s8715_s21 = smov 112   ;;  %s8716_s6 = smov 64   ;;  %v8721_v8 = vmov 1983009808   ;;  %vm8244_vm2 = vcmask 15360  }
  0x3e   : > { %s8717_s8 = smov 96   ;;  %s8718_s15 = smov 32   ;;  %v311_v9 = vunpack.c.l.s4 %v8721_v8  ;;  %v314_v14 = vshrl.u32 %v313_v10, 7  ;;  %v8722_v18 = vmov 1934713408   ;;  %vm8261_vm3 = vcmask 48128  }
  0x3f   : > { %8500 = vmatprep.subr.msk.mxu0 %vm188_vm0, %v183_v2  ;;  %s8719_s16 = smov 48   ;;  %s8720_s18 = smov 16   ;;  %v375_v19 = vunpack.c.l.s4 %v8722_v18  ;;  %vm8270_vm4 = vcmask 64512   ;;  %vm8279_vm5 = vcmask 80896   ;;  %vm8288_vm6 = vcmask 97280  }
  0x40   : > { %8501 = vmatpush1.msk.msra.mxu0 %vm188_vm0, %v181_v1  ;;  %v312_v13 = vunpack.c.0.s8 %v311_v9  ;;  %s8723_s19 = smov 2   ;;  %s8724_s20 = smov 4   ;;  %vm8297_vm7 = vcmask 113664   ;;  %vm8306_vm8 = vcmask 130048   ;;  %vm8315_vm9 = vcmask 146432  }
  0x41   : > { %8502 = vmatmul.mubr.msk.f32.vlgmr.msra.gmra.mrb[0].mxu0 %vm184_vm1, %v180_v3  ;;  %v376_v26 = vunpack.c.0.s8 %v375_v19  ;;  %s8725_s25 = smov 6   ;;  %s8726_s26 = smov 8   ;;  %vm8324_vm10 = vcmask 162816   ;;  %vm8333_vm11 = vcmask 179200   ;;  %vm8342_vm12 = vcmask 195584  }
  0x42   : > { %v8899_v20 = vsub.s32 %v312_v13, %v314_v14  ;;  %s8727_s27 = smov 10   ;;  %s8728_s29 = smov 12   ;;  %vm8351_vm13 = vcmask 211968   ;;  %vm8360_vm14 = vcmask 228352   ;;  %vm8369_vm15 = vcmask 244736  }
  0x43   : > { %v8908_v34 = vsub.s32 %v376_v26, %v314_v14  ;;  %s8729_s3 = smov 14   ;;  %s8730_s7 = smov 18   ;;  %vm8378_vm0 = vcmask 261120  }
  0x44   : > { %s8731_s30 = smov 20   ;;  %s8732_s4 = smov 22  }
  0x45   : > { %p11902_p9 = scmp.ne.s32.totalorder %s11698_s22, 0 }
 0x114   : > { %v8878_v4 = vpop.f32.mrb[0].mxu0 }
 0x115   : > { %271 = vrot.lane.b32.xlu1 %v8878_v4, %s8714_s5  ;;  %265 = vrot.lane.b32.xlu0 %v8878_v4, %s8715_s21  ;;  %v8882_v5 = vpop.f32.mrb[1].mxu0 }
 0x119   : > { %274 = vrot.lane.b32.xlu1 %v8878_v4, %s8716_s6  ;;  %268 = vrot.lane.b32.xlu0 %v8878_v4, %s8717_s8 }
 0x11d   : > { %280 = vrot.lane.b32.xlu1 %v8878_v4, %s8718_s15  ;;  %277 = vrot.lane.b32.xlu0 %v8878_v4, %s8719_s16 }
 0x121   : > { %283 = vrot.lane.b32.xlu0 %v8878_v4, %s8720_s18  ;;  %287 = vrot.lane.b32.xlu1 %v8882_v5, %s8715_s21  ;;  %s8734_s21 = smov 26  }
 0x125   : > { %290 = vrot.lane.b32.xlu0 %v8882_v5, %s8717_s8  ;;  %293 = vrot.lane.b32.xlu1 %v8882_v5, %s8714_s5  ;;  %s8733_s5 = smov 24   ;;  %s8736_s8 = smov 30  }
 0x129   : > { %296 = vrot.lane.b32.xlu0 %v8882_v5, %s8716_s6  ;;  %299 = vrot.lane.b32.xlu1 %v8882_v5, %s8719_s16  ;;  %s8735_s6 = smov 28  }
 0x12d   : > { %302 = vrot.lane.b32.xlu0 %v8882_v5, %s8718_s15  ;;  %305 = vrot.lane.b32.xlu1 %v8882_v5, %s8720_s18  ;;  %s8499_s15 = sshll.u32 %s8865_s28, 6 }
 0x12e   : > { %s11491_s16 = scalar_lea.vmem [#allocation5], %s8499_s15 }
 0x187   : > { %v272_v6 = vpop.permute.xlu1 %271  ;;  %v266_v7 = vpop.permute.xlu0 %265 }
 0x188   : > { %v324_v21 = vcombine.low %v266_v7, %v272_v6  ;;  %v325_v49 = vcombine.high %v266_v7, %v272_v6 }
 0x18a   : > { %v332_v28 = vrot.slane %v324_v21, %v8899_v20  ;;  %v339_v1 = vrot.slane %v325_v49, %v8899_v20 }
 0x18b   : > { %v275_v11 = vpop.permute.xlu1 %274  ;;  %v269_v12 = vpop.permute.xlu0 %268 }
 0x18c   : > { %v308_v15 = vcombine.low %v8878_v4, %v269_v12  ;;  %v309_v43 = vcombine.high %v8878_v4, %v269_v12 }
 0x18e   : > { %v8902_v22 = vrot.slane %v308_v15, %v8899_v20  ;;  %v323_v57 = vrot.slane %v309_v43, %v8899_v20 }
 0x18f   : > { %v281_v16 = vpop.permute.xlu1 %280  ;;  %v278_v17 = vpop.permute.xlu0 %277 }
 0x190   : > { %v340_v23 = vcombine.low %v275_v11, %v281_v16  ;;  %v372_v33 = vcombine.low %v8902_v22, %v332_v28  ;;  %v341_v44 = vcombine.high %v275_v11, %v281_v16  ;;  %v388_v8 = vcombine.low %v323_v57, %v339_v1 }
 0x191   : > { %v373_v9 = vcombine.high %v8902_v22, %v332_v28 }
 0x192   : > { %v348_v30 = vrot.slane %v340_v23, %v8899_v20  ;;  %v380_v41 = vrot.slane %v372_v33, %v8908_v34  ;;  %v355_v58 = vrot.slane %v341_v44, %v8899_v20  ;;  %v396_v19 = vrot.slane %v388_v8, %v8908_v34 }
 0x193   : > { %v284_v24 = vpop.permute.xlu0 %283  ;;  %v288_v25 = vpop.permute.xlu1 %287  ;;  %v387_v23 = vrot.slane %v373_v9, %v8908_v34 }
 0x194   : > { %v356_v27 = vcombine.low %v278_v17, %v284_v24  ;;  %v357_v38 = vcombine.high %v278_v17, %v284_v24 }
 0x196   : > { %v364_v29 = vrot.slane %v356_v27, %v8899_v20  ;;  %v371_v50 = vrot.slane %v357_v38, %v8899_v20 }
 0x197   : > { %v291_v31 = vpop.permute.xlu0 %290  ;;  %v294_v32 = vpop.permute.xlu1 %293 }
 0x198   : > { %v404_v35 = vcombine.low %v348_v30, %v364_v29  ;;  %v444_v36 = vcombine.low %v8882_v5, %v291_v31  ;;  %v460_v37 = vcombine.low %v288_v25, %v294_v32  ;;  %v445_v59 = vcombine.high %v8882_v5, %v291_v31 }
 0x199   : > { %v461_v60 = vcombine.high %v288_v25, %v294_v32  ;;  %v420_v2 = vcombine.low %v355_v58, %v371_v50  ;;  %v405_v3 = vcombine.high %v348_v30, %v364_v29  ;;  %v421_v24 = vcombine.high %v355_v58, %v371_v50 }
 0x19a   : > { %v412_v42 = vrot.slane %v404_v35, %v8908_v34  ;;  %v452_v47 = vrot.slane %v444_v36, %v8899_v20  ;;  %v468_v48 = vrot.slane %v460_v37, %v8899_v20  ;;  %v459_v5 = vrot.slane %v445_v59, %v8899_v20 }
 0x19b   : > { %v297_v39 = vpop.permute.xlu0 %296  ;;  %v300_v40 = vpop.permute.xlu1 %299  ;;  %v475_v10 = vrot.slane %v461_v60, %v8899_v20  ;;  %v428_v13 = vrot.slane %v420_v2, %v8908_v34  ;;  %v419_v14 = vrot.slane %v405_v3, %v8908_v34  ;;  %v389_v31 = vcombine.high %v323_v57, %v339_v1 }
 0x19c   : > { %v436_v45 = vcombine.low %v380_v41, %v412_v42  ;;  %v437_v46 = vcombine.high %v380_v41, %v412_v42  ;;  %v508_v61 = vcombine.low %v452_v47, %v468_v48  ;;  %v509_v21 = vcombine.high %v452_v47, %v468_v48 }
 0x19d   : > { %v524_v22 = vcombine.low %v459_v5, %v475_v10  ;;  %v440_v25 = vcombine.low %v396_v19, %v428_v13  ;;  %v438_v26 = vcombine.low %v387_v23, %v419_v14  ;;  %v435_v36 = vrot.slane %v421_v24, %v8908_v34 }
 0x19e   : > { %580 = vxpose.xlu0.b32.start [1/2] (short) (narrow) %v436_v45, 16  ;;  %612 = vxpose.xlu1.b32.start [1/2] (short) (narrow) %v437_v46, 16  ;;  %v516_v11 = vrot.slane %v508_v61, %v8908_v34  ;;  %v523_v30 = vrot.slane %v509_v21, %v8908_v34  ;;  %v525_v37 = vcombine.high %v459_v5, %v475_v10 }
 0x19f   : > { %v303_v51 = vpop.permute.xlu0 %302  ;;  %v306_v52 = vpop.permute.xlu1 %305  ;;  %v532_v29 = vrot.slane %v524_v22, %v8908_v34  ;;  %v403_v38 = vrot.slane %v389_v31, %v8908_v34  ;;  %v441_v45 = vcombine.high %v396_v19, %v428_v13 }
 0x1a0   : > { %v476_v53 = vcombine.low %v297_v39, %v303_v51  ;;  %v477_v54 = vcombine.high %v297_v39, %v303_v51  ;;  %v492_v55 = vcombine.low %v300_v40, %v306_v52  ;;  %v493_v56 = vcombine.high %v300_v40, %v306_v52 }
 0x1a1   : > { %v442_v39 = vcombine.low %v403_v38, %v435_v36  ;;  %v439_v40 = vcombine.high %v387_v23, %v419_v14  ;;  %v539_v42 = vrot.slane %v525_v37, %v8908_v34  ;;  %v443_v47 = vcombine.high %v403_v38, %v435_v36 }
 0x1a2   : > { %v484_v62 = vrot.slane %v476_v53, %v8899_v20  ;;  %v500_v63 = vrot.slane %v492_v55, %v8899_v20  ;;  %v491_v4 = vrot.slane %v477_v54, %v8899_v20  ;;  %v507_v6 = vrot.slane %v493_v56, %v8899_v20 }
 0x1a4   : > { %v540_v7 = vcombine.low %v484_v62, %v500_v63  ;;  %v541_v15 = vcombine.high %v484_v62, %v500_v63  ;;  %v556_v16 = vcombine.low %v491_v4, %v507_v6  ;;  %v557_v32 = vcombine.high %v491_v4, %v507_v6 }
 0x1a6   : > { %v548_v12 = vrot.slane %v540_v7, %v8908_v34  ;;  %v564_v27 = vrot.slane %v556_v16, %v8908_v34  ;;  %v555_v28 = vrot.slane %v541_v15, %v8908_v34  ;;  %v571_v41 = vrot.slane %v557_v32, %v8908_v34 }
 0x1a8   : > { %v573_v17 = vcombine.high %v516_v11, %v548_v12  ;;  %v572_v18 = vcombine.low %v516_v11, %v548_v12  ;;  %v576_v33 = vcombine.low %v532_v29, %v564_v27  ;;  %v574_v35 = vcombine.low %v523_v30, %v555_v28 }
 0x1a9   : > { %v578_v43 = vcombine.low %v539_v42, %v571_v41  ;;  %v575_v44 = vcombine.high %v523_v30, %v555_v28  ;;  %v577_v46 = vcombine.high %v532_v29, %v564_v27  ;;  %v579_v48 = vcombine.high %v539_v42, %v571_v41 }
 0x1aa   : > { %613 = vxpose.xlu1.b32.end [2/2] (short) (narrow) %v573_v17, 16  ;;  %581 = vxpose.xlu0.b32.end [2/2] (short) (narrow) %v572_v18, 16 }
 0x1ae   : > { %708 = vxpose.xlu1.b32.start [1/2] (short) (narrow) %v440_v25, 16  ;;  %644 = vxpose.xlu0.b32.start [1/2] (short) (narrow) %v438_v26, 16 }
 0x1b2   : > { %709 = vxpose.xlu1.b32.end [2/2] (short) (narrow) %v576_v33, 16  ;;  %645 = vxpose.xlu0.b32.end [2/2] (short) (narrow) %v574_v35, 16 }
 0x1b6   : > { %772 = vxpose.xlu1.b32.start [1/2] (short) (narrow) %v442_v39, 16  ;;  %676 = vxpose.xlu0.b32.start [1/2] (short) (narrow) %v439_v40, 16 }
 0x1ba   : > { %773 = vxpose.xlu1.b32.end [2/2] (short) (narrow) %v578_v43, 16  ;;  %677 = vxpose.xlu0.b32.end [2/2] (short) (narrow) %v575_v44, 16 }
 0x1be   : > { %740 = vxpose.xlu0.b32.start [1/2] (short) (narrow) %v441_v45, 16 }
 0x1c2   : > { %741 = vxpose.xlu0.b32.end [2/2] (short) (narrow) %v577_v46, 16 }
 0x1c6   : > { %804 = vxpose.xlu0.b32.start [1/2] (short) (narrow) %v443_v47, 16 }
 0x1ca   : > { %805 = vxpose.xlu0.b32.end [2/2] (short) (narrow) %v579_v48, 16 }
 0x226   : > { %v8942_v49 = vpop.trf.xlu1  ;;  %v8944_v50 = vpop.trf.xlu0 }
 0x227   : > { %v858_v51 = vrot.slane %v8942_v49, %v8899_v20  ;;  %v843_v52 = vrot.slane %v8944_v50, %v8899_v20 }
 0x229   : > { %v867_v53 = vcombine.high %v843_v52, %v858_v51  ;;  %v866_v54 = vcombine.low %v843_v52, %v858_v51 }
 0x22a   : > { %v629_v55 = vpop.trf.xlu1  ;;  %v597_v56 = vpop.trf.xlu0 }
 0x22b   : > { %v917_v57 = vcombine.high %v629_v55, %v8713_v0  ;;  %v8952_v58 = vrot.slane %v629_v55, %v8899_v20  ;;  %v902_v59 = vcombine.high %v597_v56, %v8713_v0  ;;  %v8956_v60 = vrot.slane %v597_v56, %v8899_v20 }
 0x22c   : > { %v881_v61 = vrot.slane %v867_v53, %v8908_v34  ;;  %v8960_v62 = vrot.slane %v866_v54, %v8908_v34 }
 0x22d   : > { %v8963_v63 = vrot.slane %v917_v57, %v8899_v20  ;;  %v8966_v1 = vrot.slane %v902_v59, %v8899_v20  ;;  %v932_v2 = vcombine.low %v8956_v60, %v8952_v58  ;;  %v933_v3 = vcombine.high %v8956_v60, %v8952_v58 }
 0x22e   : > { %1428 = vxpose.xlu0.b32.start.end [1/1] (short) (narrow) %v881_v61, 16  ;;  %1364 = vxpose.xlu1.b32.start.end [1/1] (short) (narrow) %v8960_v62, 16  ;;  %v8973_v4 = vpop.trf.xlu0  ;;  %v899_v8 = vcombine.high %v881_v61, %v8713_v0  ;;  %v8987_v14 = vpop.trf.xlu1 }
 0x22f   : > { %v948_v6 = vcombine.low %v8966_v1, %v8963_v63  ;;  %v949_v7 = vcombine.high %v8966_v1, %v8963_v63  ;;  %v975_v10 = vrot.slane %v8973_v4, %v8899_v20  ;;  %v1107_v28 = vrot.slane %v8987_v14, %v8899_v20 }
 0x232   : > { %v661_v9 = vpop.trf.xlu0  ;;  %v725_v27 = vpop.trf.xlu1 }
 0x233   : > { %1460 = vxpose.xlu0.b32.start.end [1/1] (short) (narrow) %v899_v8, 16  ;;  %v1034_v12 = vcombine.high %v661_v9, %v8713_v0  ;;  %v8990_v17 = vrot.slane %v661_v9, %v8899_v20  ;;  %v1166_v33 = vcombine.high %v725_v27, %v8713_v0  ;;  %v9018_v36 = vrot.slane %v725_v27, %v8899_v20 }
 0x234   : > { %v851_v8 = vcombine.high %v8942_v49, %v8713_v0  ;;  %v836_v9 = vcombine.high %v8944_v50, %v8713_v0 }
 0x235   : > { %v8998_v22 = vrot.slane %v1034_v12, %v8899_v20  ;;  %v9022_v41 = vrot.slane %v1166_v33, %v8899_v20 }
 0x236   : > { %v8980_v5 = vpop.trf.xlu0  ;;  %v788_v44 = vpop.trf.xlu1  ;;  %v865_v12 = vrot.slane %v851_v8, %v8899_v20 }
 0x237   : > { %v990_v11 = vrot.slane %v8980_v5, %v8899_v20  ;;  %v1239_v52 = vrot.slane %v788_v44, %v8899_v20  ;;  %v983_v50 = vcombine.high %v8980_v5, %v8713_v0 }
 0x239   : > { %v998_v13 = vcombine.low %v975_v10, %v990_v11  ;;  %v999_v16 = vcombine.high %v975_v10, %v990_v11 }
 0x23a   : > { %v693_v15 = vpop.trf.xlu0  ;;  %v9107_v58 = vpop.trf.xlu1 }
 0x23b   : > { %v1049_v18 = vcombine.high %v693_v15, %v8713_v0  ;;  %v8994_v19 = vrot.slane %v693_v15, %v8899_v20  ;;  %v1006_v21 = vrot.slane %v998_v13, %v8908_v34  ;;  %v1013_v30 = vrot.slane %v999_v16, %v8908_v34 }
 0x23c   : > { %v850_v13 = vrot.slane %v836_v9, %v8899_v20 }
 0x23d   : > { %v9001_v23 = vrot.slane %v1049_v18, %v8899_v20  ;;  %v1064_v24 = vcombine.low %v8990_v17, %v8994_v19  ;;  %v1065_v25 = vcombine.high %v8990_v17, %v8994_v19  ;;  %1876 = vxpose.xlu1.b32.start.end [1/1] (short) (narrow) %v1006_v21, 16  ;;  %v1030_v26 = vcombine.high %v1006_v21, %v8713_v0 }
 0x23e   : > { %v756_v29 = vpop.trf.xlu0  ;;  %v1031_v37 = vcombine.high %v1013_v30, %v8713_v0  ;;  %v882_v18 = vcombine.low %v850_v13, %v865_v12  ;;  %v968_v21 = vcombine.high %v8973_v4, %v8713_v0  ;;  %v883_v27 = vcombine.high %v850_v13, %v865_v12 }
 0x23f   : > { %v1080_v31 = vcombine.low %v8998_v22, %v9001_v23  ;;  %v1081_v32 = vcombine.high %v8998_v22, %v9001_v23  ;;  %1908 = vxpose.xlu0.b32.start.end [1/1] (short) (narrow) %v1030_v26, 16  ;;  %v1122_v35 = vrot.slane %v756_v29, %v8899_v20  ;;  %v1100_v4 = vcombine.high %v8987_v14, %v8713_v0 }
 0x240   : > { %v890_v26 = vrot.slane %v882_v18, %v8908_v34  ;;  %v982_v33 = vrot.slane %v968_v21, %v8899_v20  ;;  %v897_v5 = vrot.slane %v883_v27, %v8908_v34  ;;  %v947_v21 = vrot.slane %v933_v3, %v8908_v34 }
 0x241   : > { %v1130_v39 = vcombine.low %v1107_v28, %v1122_v35  ;;  %v1131_v40 = vcombine.high %v1107_v28, %v1122_v35  ;;  %v997_v28 = vrot.slane %v983_v50, %v8899_v20  ;;  %v1072_v27 = vrot.slane %v1064_v24, %v8908_v34 }
 0x242   : > { %1940 = vxpose.xlu1.b32.start.end [1/1] (short) (narrow) %v1013_v30, 16  ;;  %v757_v38 = vpop.trf.xlu0  ;;  %v898_v30 = vcombine.high %v8960_v62, %v8713_v0  ;;  %v900_v35 = vcombine.high %v890_v26, %v8713_v0  ;;  %v1088_v63 = vrot.slane %v1080_v31, %v8908_v34 }
 0x243   : > { %v1181_v42 = vcombine.high %v757_v38, %v8713_v0  ;;  %v9026_v43 = vrot.slane %v757_v38, %v8899_v20  ;;  %v1138_v45 = vrot.slane %v1130_v39, %v8908_v34  ;;  %v1145_v54 = vrot.slane %v1131_v40, %v8908_v34 }
 0x244   : > { %1972 = vxpose.xlu0.b32.start.end [1/1] (short) (narrow) %v1031_v37, 16  ;;  %v1014_v37 = vcombine.low %v982_v33, %v997_v28  ;;  %v1115_v38 = vcombine.high %v756_v29, %v8713_v0  ;;  %v901_v39 = vcombine.high %v897_v5, %v8713_v0  ;;  %v1015_v62 = vcombine.high %v982_v33, %v997_v28 }
 0x245   : > { %v9030_v46 = vrot.slane %v1181_v42, %v8899_v20  ;;  %v1196_v47 = vcombine.low %v9018_v36, %v9026_v43  ;;  %v1197_v48 = vcombine.high %v9018_v36, %v9026_v43  ;;  %v1162_v51 = vcombine.high %v1138_v45, %v8713_v0 }
 0x246   : > { %v820_v53 = vpop.trf.xlu0  ;;  %v1163_v59 = vcombine.high %v1145_v54, %v8713_v0  ;;  %v1022_v40 = vrot.slane %v1014_v37, %v8908_v34  ;;  %v1114_v42 = vrot.slane %v1100_v4, %v8899_v20  ;;  %v1232_v29 = vcombine.high %v788_v44, %v8713_v0 }
 0x247   : > { %v1212_v55 = vcombine.low %v9022_v41, %v9030_v46  ;;  %v1213_v56 = vcombine.high %v9022_v41, %v9030_v46  ;;  %2388 = vxpose.xlu1.b32.start.end [1/1] (short) (narrow) %v1138_v45, 16  ;;  %v1254_v57 = vrot.slane %v820_v53, %v8899_v20  ;;  %v1129_v45 = vrot.slane %v1115_v38, %v8899_v20 }
 0x248   : > { %v1246_v8 = vrot.slane %v1232_v29, %v8899_v20  ;;  %v1079_v28 = vrot.slane %v1065_v25, %v8908_v34  ;;  %v1204_v24 = vrot.slane %v1196_v47, %v8908_v34  ;;  %v1211_v33 = vrot.slane %v1197_v48, %v8908_v34 }
 0x249   : > { %2420 = vxpose.xlu0.b32.start.end [1/1] (short) (narrow) %v1162_v51, 16  ;;  %v1262_v61 = vcombine.low %v1239_v52, %v1254_v57  ;;  %v1263_v11 = vcombine.high %v1239_v52, %v1254_v57  ;;  %v1032_v51 = vcombine.high %v1022_v40, %v8713_v0  ;;  %v1029_v52 = vrot.slane %v1015_v62, %v8908_v34 }
 0x24a   : > { %v1146_v14 = vcombine.low %v1114_v42, %v1129_v45  ;;  %v9109_v60 = vpop.trf.xlu0  ;;  %v1097_v3 = vcombine.high %v1079_v28, %v8713_v0  ;;  %v1228_v19 = vcombine.high %v1204_v24, %v8713_v0  ;;  %v956_v36 = vrot.slane %v948_v6, %v8908_v34 }
 0x24b   : > { %v1270_v10 = vrot.slane %v1262_v61, %v8908_v34  ;;  %v1277_v16 = vrot.slane %v1263_v11, %v8908_v34  ;;  %v1033_v57 = vcombine.high %v1029_v52, %v8713_v0  ;;  %v1147_v61 = vcombine.high %v1114_v42, %v1129_v45 }
 0x24c   : > { %2452 = vxpose.xlu1.b32.start.end [1/1] (short) (narrow) %v1145_v54, 16  ;;  %v1247_v54 = vcombine.high %v820_v53, %v8713_v0  ;;  %v1320_v17 = vrot.slane %v9109_v60, %v8899_v20  ;;  %v966_v43 = vcombine.high %v956_v36, %v8713_v0  ;;  %v963_v6 = vrot.slane %v949_v7, %v8908_v34 }
 0x24d   : > { %v1294_v15 = vcombine.high %v1270_v10, %v8713_v0  ;;  %v1295_v49 = vcombine.high %v1277_v16, %v8713_v0  ;;  %v1161_v11 = vrot.slane %v1147_v61, %v8908_v34  ;;  %v1095_v61 = vrot.slane %v1081_v32, %v8908_v34 }
 0x24e   : > { %2484 = vxpose.xlu0.b32.start.end [1/1] (short) (narrow) %v1163_v59, 16  ;;  %v1154_v59 = vrot.slane %v1146_v14, %v8908_v34  ;;  %v1261_v9 = vrot.slane %v1247_v54, %v8899_v20  ;;  %v967_v14 = vcombine.high %v963_v6, %v8713_v0  ;;  %v1098_v54 = vcombine.high %v1088_v63, %v8713_v0 }
 0x24f   : > { %v1165_v53 = vcombine.high %v1161_v11, %v8713_v0  ;;  %v1099_v31 = vcombine.high %v1095_v61, %v8713_v0 }
 0x250   : > { %v1278_v44 = vcombine.low %v1246_v8, %v1261_v9  ;;  %v1279_v13 = vcombine.high %v1246_v8, %v1261_v9 }
 0x251   : > { %2900 = vxpose.xlu1.b32.start.end [1/1] (short) (narrow) %v1270_v10, 16  ;;  %v1164_v10 = vcombine.high %v1154_v59, %v8713_v0 }
 0x252   : > { %v1286_v12 = vrot.slane %v1278_v44, %v8908_v34 }
 0x253   : > { %2932 = vxpose.xlu0.b32.start.end [1/1] (short) (narrow) %v1294_v15, 16 }
 0x254   : > { %v1296_v15 = vcombine.high %v1286_v12, %v8713_v0 }
 0x256   : > { %2964 = vxpose.xlu1.b32.start.end [1/1] (short) (narrow) %v1277_v16, 16  ;;  %v1293_v16 = vrot.slane %v1279_v13, %v8908_v34 }
 0x258   : > { %2996 = vxpose.xlu0.b32.start.end [1/1] (short) (narrow) %v1295_v49, 16  ;;  %v1297_v18 = vcombine.high %v1293_v16, %v8713_v0  ;;  %v940_v49 = vrot.slane %v932_v2, %v8908_v34  ;;  %v1096_v2 = vcombine.high %v1072_v27, %v8713_v0 }
 0x25a   : > { %v964_v50 = vcombine.high %v940_v49, %v8713_v0 }
 0x25b   : > { %1396 = vxpose.xlu1.b32.start.end [1/1] (short) (narrow) %v898_v30, 16  ;;  %v1305_v30 = vrot.slane %v9107_v58, %v8899_v20 }
 0x25d   : > { %1524 = vxpose.xlu0.b32.start.end [1/1] (short) (narrow) %v900_v35, 16  ;;  %v1328_v25 = vcombine.low %v1305_v30, %v1320_v17  ;;  %v1329_v47 = vcombine.high %v1305_v30, %v1320_v17  ;;  %v1227_v17 = vrot.slane %v1213_v56, %v8908_v34 }
 0x25f   : > { %v1336_v35 = vrot.slane %v1328_v25, %v8908_v34  ;;  %v1343_v4 = vrot.slane %v1329_v47, %v8908_v34  ;;  %v1231_v41 = vcombine.high %v1227_v17, %v8713_v0 }
 0x260   : > { %1492 = vxpose.xlu1.b32.start.end [1/1] (short) (narrow) %v890_v26, 16  ;;  %v965_v26 = vcombine.high %v947_v21, %v8713_v0 }
 0x261   : > { %v1360_v37 = vcombine.high %v1336_v35, %v8713_v0  ;;  %v1361_v38 = vcombine.high %v1343_v4, %v8713_v0 }
 0x262   : > { %1588 = vxpose.xlu0.b32.start.end [1/1] (short) (narrow) %v901_v39, 16 }
 0x265   : > { %1556 = vxpose.xlu1.b32.start.end [1/1] (short) (narrow) %v897_v5, 16  ;;  %v1229_v5 = vcombine.high %v1211_v33, %v8713_v0 }
 0x267   : > { %2036 = vxpose.xlu0.b32.start.end [1/1] (short) (narrow) %v1032_v51, 16 }
 0x26a   : > { %2004 = vxpose.xlu1.b32.start.end [1/1] (short) (narrow) %v1022_v40, 16 }
 0x26c   : > { %2100 = vxpose.xlu0.b32.start.end [1/1] (short) (narrow) %v1033_v57, 16 }
 0x26f   : > { %2068 = vxpose.xlu1.b32.start.end [1/1] (short) (narrow) %v1029_v52, 16 }
 0x271   : > { %2548 = vxpose.xlu0.b32.start.end [1/1] (short) (narrow) %v1164_v10, 16 }
 0x274   : > { %2516 = vxpose.xlu1.b32.start.end [1/1] (short) (narrow) %v1154_v59, 16 }
 0x276   : > { %2612 = vxpose.xlu0.b32.start.end [1/1] (short) (narrow) %v1165_v53, 16 }
 0x279   : > { %2580 = vxpose.xlu1.b32.start.end [1/1] (short) (narrow) %v1161_v11, 16 }
 0x27b   : > { %3060 = vxpose.xlu0.b32.start.end [1/1] (short) (narrow) %v1296_v15, 16 }
 0x27e   : > { %3028 = vxpose.xlu1.b32.start.end [1/1] (short) (narrow) %v1286_v12, 16  ;;  %v1220_v12 = vrot.slane %v1212_v55, %v8908_v34 }
 0x280   : > { %3124 = vxpose.xlu0.b32.start.end [1/1] (short) (narrow) %v1297_v18, 16  ;;  %v1313_v18 = vcombine.high %v9109_v60, %v8713_v0 }
 0x282   : > { %v1327_v30 = vrot.slane %v1313_v18, %v8899_v20 }
 0x283   : > { %3092 = vxpose.xlu1.b32.start.end [1/1] (short) (narrow) %v1293_v16, 16  ;;  %v1298_v16 = vcombine.high %v9107_v58, %v8713_v0 }
 0x285   : > { %1652 = vxpose.xlu0.b32.start.end [1/1] (short) (narrow) %v964_v50, 16 }
 0x288   : > { %1620 = vxpose.xlu1.b32.start.end [1/1] (short) (narrow) %v940_v49, 16 }
 0x28a   : > { %1716 = vxpose.xlu0.b32.start.end [1/1] (short) (narrow) %v965_v26, 16 }
 0x28d   : > { %1684 = vxpose.xlu1.b32.start.end [1/1] (short) (narrow) %v947_v21, 16 }
 0x28f   : > { %2164 = vxpose.xlu0.b32.start.end [1/1] (short) (narrow) %v1096_v2, 16 }
 0x292   : > { %2132 = vxpose.xlu1.b32.start.end [1/1] (short) (narrow) %v1072_v27, 16  ;;  %v1230_v27 = vcombine.high %v1220_v12, %v8713_v0 }
 0x294   : > { %2228 = vxpose.xlu0.b32.start.end [1/1] (short) (narrow) %v1097_v3, 16 }
 0x297   : > { %2196 = vxpose.xlu1.b32.start.end [1/1] (short) (narrow) %v1079_v28, 16 }
 0x299   : > { %2676 = vxpose.xlu0.b32.start.end [1/1] (short) (narrow) %v1228_v19, 16 }
 0x29c   : > { %2644 = vxpose.xlu1.b32.start.end [1/1] (short) (narrow) %v1204_v24, 16  ;;  %v1312_v24 = vrot.slane %v1298_v16, %v8899_v20 }
 0x29e   : > { %2740 = vxpose.xlu0.b32.start.end [1/1] (short) (narrow) %v1229_v5, 16 }
 0x2a1   : > { %2708 = vxpose.xlu1.b32.start.end [1/1] (short) (narrow) %v1211_v33, 16 }
 0x2a3   : > { %3188 = vxpose.xlu0.b32.start.end [1/1] (short) (narrow) %v1360_v37, 16  ;;  %v1344_v37 = vcombine.low %v1312_v24, %v1327_v30 }
 0x2a6   : > { %3156 = vxpose.xlu1.b32.start.end [1/1] (short) (narrow) %v1336_v35, 16 }
 0x2a8   : > { %3252 = vxpose.xlu0.b32.start.end [1/1] (short) (narrow) %v1361_v38, 16 }
 0x2ab   : > { %3220 = vxpose.xlu1.b32.start.end [1/1] (short) (narrow) %v1343_v4, 16 }
 0x2ae   : > { %v9135_v48 = vpop.trf.xlu0  ;;  %1780 = vxpose.xlu0.b32.start.end [1/1] (short) (narrow) %v966_v43, 16  ;;  %v9137_v39 = vpop.trf.xlu1 }
 0x2af   : > { %v3412_v40 = vcombine.low %v9137_v39, %v9135_v48  ;;  %v3413_v62 = vcombine.high %v9137_v39, %v9135_v48 }
 0x2b0   : > { %1748 = vxpose.xlu1.b32.start.end [1/1] (short) (narrow) %v956_v36, 16  ;;  %v1345_v36 = vcombine.high %v1312_v24, %v1327_v30 }
 0x2b2   : > { %v9147_v42 = vpop.trf.xlu0  ;;  %v9149_v45 = vpop.trf.xlu1 }
 0x2b3   : > { %v3684_v51 = vcombine.low %v9149_v45, %v9147_v42  ;;  %v3685_v52 = vcombine.high %v9149_v45, %v9147_v42 }
 0x2b6   : > { %v9156_v29 = vpop.trf.xlu0  ;;  %1844 = vxpose.xlu0.b32.start.end [1/1] (short) (narrow) %v967_v14, 16 }
 0x2ba   : > { %v9162_v1 = vpop.trf.xlu0 }
 0x2bd   : > { %v9164_v7 = vpop.trf.xlu1  ;;  %1812 = vxpose.xlu1.b32.start.end [1/1] (short) (narrow) %v963_v6, 16  ;;  %v1352_v6 = vrot.slane %v1344_v37, %v8908_v34 }
 0x2bf   : > { %v1924_v57 = vpop.trf.xlu0  ;;  %2292 = vxpose.xlu0.b32.start.end [1/1] (short) (narrow) %v1098_v54, 16 }
 0x2c1   : > { %v1893_v59 = vpop.trf.xlu1 }
 0x2c3   : > { %v1925_v8 = vpop.trf.xlu0 }
 0x2c5   : > { %v1956_v9 = vpop.trf.xlu1  ;;  %2260 = vxpose.xlu1.b32.start.end [1/1] (short) (narrow) %v1088_v63, 16 }
 0x2c6   : > { %v3957_v10 = vcombine.high %v9164_v7, %v1956_v9  ;;  %v3956_v38 = vcombine.low %v9164_v7, %v1956_v9  ;;  %v1362_v7 = vcombine.high %v1352_v6, %v8713_v0  ;;  %v9230_v9 = vrot.slane %v1345_v36, %v8908_v34 }
 0x2c7   : > { %v1988_v11 = vpop.trf.xlu0  ;;  %2356 = vxpose.xlu0.b32.start.end [1/1] (short) (narrow) %v1099_v31, 16 }
 0x2c8   : > { %v3973_v44 = vcombine.high %v1924_v57, %v1988_v11  ;;  %v9178_v13 = vrot.slane %v3957_v10, %v8899_v20  ;;  %v3972_v46 = vcombine.low %v1924_v57, %v1988_v11 }
 0x2c9   : > { %v1957_v53 = vpop.trf.xlu1 }
 0x2ca   : > { %v9181_v22 = vrot.slane %v3973_v44, %v8899_v20  ;;  %v4228_v23 = vcombine.low %v1893_v59, %v1957_v53  ;;  %v4229_v32 = vcombine.high %v1893_v59, %v1957_v53  ;;  %v3980_v14 = vrot.slane %v3972_v46, %v8899_v20 }
 0x2cb   : > { %v1989_v15 = vpop.trf.xlu0 }
 0x2cc   : > { %v4036_v49 = vcombine.low %v9178_v13, %v9181_v22  ;;  %v4037_v55 = vcombine.high %v9178_v13, %v9181_v22  ;;  %v4244_v50 = vcombine.low %v1925_v8, %v1989_v15  ;;  %v4245_v21 = vcombine.high %v1925_v8, %v1989_v15 }
 0x2cd   : > { %v9191_v26 = vpop.trf.xlu1  ;;  %2324 = vxpose.xlu1.b32.start.end [1/1] (short) (narrow) %v1095_v61, 16  ;;  %v9195_v2 = vrot.slane %v4228_v23, %v8899_v20  ;;  %v9198_v28 = vrot.slane %v4229_v32, %v8899_v20  ;;  %v3964_v8 = vrot.slane %v3956_v38, %v8899_v20  ;;  %v9283_v13 = vrot.slane %v3685_v52, %v8899_v20 }
 0x2ce   : > { %v9201_v58 = vrot.slane %v4244_v50, %v8899_v20  ;;  %v9204_v60 = vrot.slane %v4245_v21, %v8899_v20 }
 0x2cf   : > { %v2436_v3 = vpop.trf.xlu0  ;;  %2804 = vxpose.xlu0.b32.start.end [1/1] (short) (narrow) %v1230_v27, 16  ;;  %v4020_v44 = vcombine.low %v3964_v8, %v3980_v14  ;;  %v4021_v53 = vcombine.high %v3964_v8, %v3980_v14 }
 0x2d0   : > { %v4292_v19 = vcombine.low %v9195_v2, %v9201_v58  ;;  %v4293_v25 = vcombine.high %v9195_v2, %v9201_v58  ;;  %v4308_v33 = vcombine.low %v9198_v28, %v9204_v60  ;;  %v4309_v35 = vcombine.high %v9198_v28, %v9204_v60 }
 0x2d1   : > { %v2405_v47 = vpop.trf.xlu1  ;;  %v4028_v24 = vrot.slane %v4020_v44, %v8908_v34  ;;  %v4035_v30 = vrot.slane %v4021_v53, %v8908_v34 }
 0x2d2   : > { %v4300_v46 = vrot.slane %v4292_v19, %v8908_v34  ;;  %v4316_v38 = vrot.slane %v4308_v33, %v8908_v34  ;;  %v4323_v48 = vrot.slane %v4309_v35, %v8908_v34 }
 0x2d3   : > { %v2437_v5 = vpop.trf.xlu0  ;;  %v9286_v22 = vrot.slane %v4028_v24, %v8899_v20 }
 0x2d4   : > { %v9306_v14 = vrot.slane %v4316_v38, %v8899_v20 }
 0x2d5   : > { %v2468_v4 = vpop.trf.xlu1  ;;  %2772 = vxpose.xlu1.b32.start.end [1/1] (short) (narrow) %v1220_v12, 16 }
 0x2d6   : > { %v4500_v31 = vcombine.low %v9191_v26, %v2468_v4  ;;  %v4501_v21 = vcombine.high %v9191_v26, %v2468_v4  ;;  %v9251_v26 = vrot.slane %v3412_v40, %v8899_v20  ;;  %v4051_v40 = vrot.slane %v4037_v55, %v8908_v34 }
 0x2d7   : > { %v2500_v56 = vpop.trf.xlu0  ;;  %2868 = vxpose.xlu0.b32.start.end [1/1] (short) (narrow) %v1231_v41, 16  ;;  %v9258_v41 = vrot.slane %v3413_v62, %v8899_v20  ;;  %v9289_v55 = vrot.slane %v4035_v30, %v8899_v20 }
 0x2d8   : > { %v4516_v63 = vcombine.low %v2436_v3, %v2500_v56  ;;  %v4517_v12 = vcombine.high %v2436_v3, %v2500_v56  ;;  %v4508_v27 = vrot.slane %v4500_v31, %v8899_v20  ;;  %v4307_v56 = vrot.slane %v4293_v25, %v8908_v34 }
 0x2d9   : > { %v2469_v43 = vpop.trf.xlu1  ;;  %v4515_v39 = vrot.slane %v4501_v21, %v8899_v20  ;;  %v9297_v42 = vrot.slane %v4051_v40, %v8899_v20 }
 0x2da   : > { %v4772_v54 = vcombine.low %v2405_v47, %v2469_v43  ;;  %v4773_v59 = vcombine.high %v2405_v47, %v2469_v43  ;;  %v4524_v23 = vrot.slane %v4516_v63, %v8899_v20  ;;  %v4531_v47 = vrot.slane %v4517_v12, %v8899_v20 }
 0x2db   : > { %v2501_v61 = vpop.trf.xlu0  ;;  %v9300_v43 = vrot.slane %v4300_v46, %v8899_v20  ;;  %v9309_v63 = vrot.slane %v4323_v48, %v8899_v20 }
 0x2dc   : > { %v4788_v10 = vcombine.low %v2437_v5, %v2501_v61  ;;  %v4789_v57 = vcombine.high %v2437_v5, %v2501_v61  ;;  %v4780_v32 = vrot.slane %v4772_v54, %v8899_v20  ;;  %v9235_v15 = vrot.slane %v4773_v59, %v8899_v20 }
 0x2dd   : > { %v9226_v11 = vpop.trf.xlu1  ;;  %2836 = vxpose.xlu1.b32.start.end [1/1] (short) (narrow) %v1227_v17, 16  ;;  %v1363_v17 = vcombine.high %v9230_v9, %v8713_v0  ;;  %v4564_v5 = vcombine.low %v4508_v27, %v4524_v23  ;;  %v4565_v37 = vcombine.high %v4508_v27, %v4524_v23  ;;  %v4044_v0 = vrot.slane %v4036_v49, %v8908_v34 }
 0x2de   : > { %v4796_v16 = vrot.slane %v4788_v10, %v8899_v20  ;;  %v4803_v18 = vrot.slane %v4789_v57, %v8899_v20  ;;  %v9277_v49 = vrot.slane %v3684_v51, %v8899_v20  ;;  %v4580_v33 = vcombine.low %v4515_v39, %v4531_v47 }
 0x2df   : > { %v2948_v50 = vpop.trf.xlu0  ;;  %3316 = vxpose.xlu0.b32.start.end [1/1] (short) (narrow) %v1362_v7, 16  ;;  %v4572_v19 = vrot.slane %v4564_v5, %v8908_v34  ;;  %v4579_v25 = vrot.slane %v4565_v37, %v8908_v34  ;;  %v4581_v35 = vcombine.high %v4515_v39, %v4531_v47  ;;  %v9294_v36 = vrot.slane %v4044_v0, %v8899_v20 }
 0x2e0   : > { %v4836_v2 = vcombine.low %v4780_v32, %v4796_v16  ;;  %v4837_v28 = vcombine.high %v4780_v32, %v4796_v16  ;;  %v4852_v58 = vcombine.low %v9235_v15, %v4803_v18  ;;  %v4853_v60 = vcombine.high %v9235_v15, %v4803_v18 }
 0x2e1   : > { %v2917_v3 = vpop.trf.xlu1  ;;  %v4588_v10 = vrot.slane %v4580_v33, %v8908_v34  ;;  %v4595_v57 = vrot.slane %v4581_v35, %v8908_v34  ;;  %v9316_v7 = vrot.slane %v4572_v19, %v8899_v20  ;;  %v9319_v44 = vrot.slane %v4579_v25, %v8899_v20 }
 0x2e2   : > { %v4844_v12 = vrot.slane %v4836_v2, %v8908_v34  ;;  %v4851_v23 = vrot.slane %v4837_v28, %v8908_v34  ;;  %v4860_v15 = vrot.slane %v4852_v58, %v8908_v34  ;;  %v4867_v16 = vrot.slane %v4853_v60, %v8908_v34 }
 0x2e3   : > { %v2949_v4 = vpop.trf.xlu0  ;;  %v9346_v19 = vrot.slane %v4595_v57, %v8899_v20 }
 0x2e4   : > { %v9349_v25 = vrot.slane %v4844_v12, %v8899_v20  ;;  %v9352_v33 = vrot.slane %v4851_v23, %v8899_v20 }
 0x2e5   : > { %v2980_v62 = vpop.trf.xlu1  ;;  %3284 = vxpose.xlu1.b32.start.end [1/1] (short) (narrow) %v1352_v6, 16  ;;  %v9303_v6 = vrot.slane %v4307_v56, %v8899_v20 }
 0x2e6   : > { %v5044_v59 = vcombine.low %v9226_v11, %v2980_v62  ;;  %v5045_v61 = vcombine.high %v9226_v11, %v2980_v62 }
 0x2e7   : > { %v3012_v51 = vpop.trf.xlu0  ;;  %3380 = vxpose.xlu0.b32.start.end [1/1] (short) (narrow) %v1363_v17, 16 }
 0x2e8   : > { %v5060_v45 = vcombine.low %v2948_v50, %v3012_v51  ;;  %v5061_v52 = vcombine.high %v2948_v50, %v3012_v51  ;;  %v5052_v27 = vrot.slane %v5044_v59, %v8899_v20  ;;  %v9364_v59 = vrot.slane %v4867_v16, %v8899_v20 }
 0x2e9   : > { %v2981_v54 = vpop.trf.xlu1 }
 0x2ea   : > { %v5316_v8 = vcombine.low %v2917_v3, %v2981_v54  ;;  %v5317_v31 = vcombine.high %v2917_v3, %v2981_v54  ;;  %v5068_v32 = vrot.slane %v5060_v45, %v8899_v20  ;;  %v5075_v11 = vrot.slane %v5061_v52, %v8899_v20  ;;  %11703 = vst [vmem:[#allocation8_spill] sm:$0xff] %v9364_v59 }
 0x2eb   : > { %v3013_v53 = vpop.trf.xlu0  ;;  %v5059_v3 = vrot.slane %v5045_v61, %v8899_v20  ;;  %v9361_v54 = vrot.slane %v4860_v15, %v8899_v20 }
 0x2ec   : > { %v5332_v18 = vcombine.low %v2949_v4, %v3013_v53  ;;  %v5333_v50 = vcombine.high %v2949_v4, %v3013_v53  ;;  %v5324_v2 = vrot.slane %v5316_v8, %v8899_v20  ;;  %v5331_v28 = vrot.slane %v5317_v31, %v8899_v20 }
 0x2ed   : > { %v1412_v21 = vpop.trf.xlu1  ;;  %3348 = vxpose.xlu1.b32.start.end [1/1] (short) (narrow) %v9230_v9, 16  ;;  %v5108_v47 = vcombine.low %v5052_v27, %v5068_v32  ;;  %v5109_v9 = vcombine.high %v5052_v27, %v5068_v32  ;;  %v5124_v5 = vcombine.low %v5059_v3, %v5075_v11  ;;  %v5125_v37 = vcombine.high %v5059_v3, %v5075_v11 }
 0x2ee   : > { %v5340_v24 = vrot.slane %v5332_v18, %v8899_v20  ;;  %v5347_v30 = vrot.slane %v5333_v50, %v8899_v20  ;;  %v3428_v58 = vcombine.low %v1412_v21, %v9156_v29  ;;  %v3429_v60 = vcombine.high %v1412_v21, %v9156_v29 }
 0x2ef   : > { %v9336_v17 = vpop.trf.xlu0  ;;  %v9343_v29 = vrot.slane %v4588_v10, %v8899_v20  ;;  %v5116_v61 = vrot.slane %v5108_v47, %v8908_v34  ;;  %v5123_v8 = vrot.slane %v5109_v9, %v8908_v34  ;;  %v5132_v10 = vrot.slane %v5124_v5, %v8908_v34 }
 0x2f0   : > { %v5380_v4 = vcombine.low %v5324_v2, %v5340_v24  ;;  %v5381_v0 = vcombine.high %v5324_v2, %v5340_v24  ;;  %v5396_v40 = vcombine.low %v5331_v28, %v5347_v30  ;;  %v5397_v46 = vcombine.high %v5331_v28, %v5347_v30 }
 0x2f1   : > { %v1413_v56 = vpop.trf.xlu1  ;;  %v3436_v38 = vrot.slane %v3428_v58, %v8899_v20  ;;  %v3443_v48 = vrot.slane %v3429_v60, %v8899_v20  ;;  %v5139_v57 = vrot.slane %v5125_v37, %v8908_v34  ;;  %v9389_v24 = vrot.slane %v5116_v61, %v8899_v20 }
 0x2f2   : > { %v3700_v39 = vcombine.low %v1413_v56, %v9162_v1  ;;  %v3701_v62 = vcombine.high %v1413_v56, %v9162_v1  ;;  %v5395_v12 = vrot.slane %v5381_v0, %v8908_v34  ;;  %v9397_v47 = vrot.slane %v5123_v8, %v8899_v20 }
 0x2f3   : > { %v9354_v35 = vpop.trf.xlu0  ;;  %v3476_v51 = vcombine.low %v9251_v26, %v3436_v38  ;;  %v3477_v45 = vcombine.high %v9251_v26, %v3436_v38  ;;  %v3492_v1 = vcombine.low %v9258_v41, %v3443_v48  ;;  %v3493_v52 = vcombine.high %v9258_v41, %v3443_v48 }
 0x2f4   : > { %v5388_v41 = vrot.slane %v5380_v4, %v8908_v34  ;;  %v3708_v23 = vrot.slane %v3700_v39, %v8899_v20  ;;  %v3715_v32 = vrot.slane %v3701_v62, %v8899_v20  ;;  %v5411_v9 = vrot.slane %v5397_v46, %v8908_v34 }
 0x2f5   : > { %v1508_v31 = vpop.trf.xlu1  ;;  %v3484_v26 = vrot.slane %v3476_v51, %v8908_v34  ;;  %v3491_v53 = vrot.slane %v3477_v45, %v8908_v34  ;;  %v3500_v15 = vrot.slane %v3492_v1, %v8908_v34  ;;  %v3507_v16 = vrot.slane %v3493_v52, %v8908_v34 }
 0x2f6   : > { %v3748_v21 = vcombine.low %v9277_v49, %v3708_v23  ;;  %v3749_v27 = vcombine.high %v9277_v49, %v3708_v23  ;;  %v3764_v3 = vcombine.low %v9283_v13, %v3715_v32  ;;  %v3765_v2 = vcombine.high %v9283_v13, %v3715_v32 }
 0x2f7   : > { %v1604_v11 = vpop.trf.xlu0  ;;  %v9379_v18 = vrot.slane %v3484_v26, %v8899_v20  ;;  %v9382_v50 = vrot.slane %v3491_v53, %v8899_v20  ;;  %v9400_v49 = vrot.slane %v5132_v10, %v8899_v20  ;;  %v5404_v13 = vrot.slane %v5396_v40, %v8908_v34 }
 0x2f8   : > { %v3460_v30 = vcombine.low %v9336_v17, %v1604_v11  ;;  %v9405_v37 = vrot.slane %v3500_v15, %v8899_v20  ;;  %v9408_v4 = vrot.slane %v3507_v16, %v8899_v20  ;;  %v9413_v38 = vrot.slane %v5139_v57, %v8899_v20 }
 0x2f9   : > { %v1509_v28 = vpop.trf.xlu1  ;;  %v5652_v58 = vcombine.low %v9379_v18, %v9286_v22  ;;  %v5684_v60 = vcombine.low %v9382_v50, %v9289_v55  ;;  %v9416_v48 = vrot.slane %v5388_v41, %v8899_v20  ;;  %v9419_v40 = vrot.slane %v5395_v12, %v8899_v20 }
 0x2fa   : > { %v3461_v46 = vcombine.high %v9336_v17, %v1604_v11  ;;  %v3756_v62 = vrot.slane %v3748_v21, %v8908_v34  ;;  %v3468_v51 = vrot.slane %v3460_v30, %v8899_v20  ;;  %v9428_v52 = vrot.slane %v5411_v9, %v8899_v20 }
 0x2fb   : > { %v1605_v5 = vpop.trf.xlu0  ;;  %v6740_v8 = vcombine.low %v9316_v7, %v9389_v24  ;;  %v6772_v17 = vcombine.low %v9319_v44, %v9397_v47  ;;  %v3763_v10 = vrot.slane %v3749_v27, %v8908_v34  ;;  %v5820_v26 = vcombine.low %v9408_v4, %v9297_v42 }
 0x2fc   : > { %v3732_v0 = vcombine.low %v9354_v35, %v1605_v5  ;;  %v3733_v56 = vcombine.high %v9354_v35, %v1605_v5  ;;  %v9425_v35 = vrot.slane %v5404_v13, %v8899_v20  ;;  %11704 = vst [vmem:[#allocation9_spill] sm:$0xff] %v9428_v52  ;;  %v3772_v53 = vrot.slane %v3764_v3, %v8908_v34 }
 0x2fd   : > { %v1572_v39 = vpop.trf.xlu1  ;;  %v3779_v41 = vrot.slane %v3765_v2, %v8908_v34  ;;  %v3475_v12 = vrot.slane %v3461_v46, %v8899_v20  ;;  %v9447_v11 = vrot.slane %v3756_v62, %v8899_v20  ;;  %v9454_v3 = vrot.slane %v5652_v58, %v8908_v34 }
 0x2fe   : > { %v3444_v45 = vcombine.low %v1508_v31, %v1572_v39  ;;  %v3445_v1 = vcombine.high %v1508_v31, %v1572_v39  ;;  %v5788_v31 = vcombine.low %v9405_v37, %v9294_v36  ;;  %v3740_v15 = vrot.slane %v3732_v0, %v8899_v20 }
 0x2ff   : > { %v9430_v61 = vpop.trf.xlu0  ;;  %v3747_v16 = vrot.slane %v3733_v56, %v8899_v20  ;;  %11705 = vst [vmem:[#allocation10_spill] sm:$0xff] %v9454_v3  ;;  %v9457_v2 = vrot.slane %v5684_v60, %v8908_v34  ;;  %v9460_v9 = vrot.slane %v6740_v8, %v8908_v34  ;;  %v9463_v5 = vrot.slane %v6772_v17, %v8908_v34 }
 0x300   : > { %v3452_v57 = vrot.slane %v3444_v45, %v8899_v20  ;;  %v3459_v23 = vrot.slane %v3445_v1, %v8899_v20  ;;  %v6876_v0 = vcombine.low %v9343_v29, %v9400_v49  ;;  %v9473_v1 = vrot.slane %v5788_v31, %v8908_v34 }
 0x301   : > { %v1573_v32 = vpop.trf.xlu1  ;;  %11706 = vst [vmem:[#allocation11_spill] sm:$0xff] %v9457_v2  ;;  %11707 = vst [vmem:[#allocation12_spill] sm:$0xff] %v9460_v9  ;;  %v9476_v8 = vrot.slane %v5820_v26, %v8908_v34  ;;  %v5653_v31 = vcombine.high %v9379_v18, %v9286_v22 }
 0x302   : > { %v3508_v21 = vcombine.low %v3452_v57, %v3468_v51  ;;  %v3716_v27 = vcombine.low %v1509_v28, %v1573_v32  ;;  %v3717_v30 = vcombine.high %v1509_v28, %v1573_v32  ;;  %11708 = vst [vmem:[#allocation13_spill] sm:$0xff] %v9463_v5  ;;  %v6908_v28 = vcombine.low %v9346_v19, %v9413_v38 }
 0x303   : > { %v9451_v13 = vpop.trf.xlu0  ;;  %v3509_v56 = vcombine.high %v3452_v57, %v3468_v51  ;;  %v3524_v46 = vcombine.low %v3459_v23, %v3475_v12  ;;  %v3525_v45 = vcombine.high %v3459_v23, %v3475_v12  ;;  %11709 = vst [vmem:[#allocation14_spill] sm:$0xff] %v9473_v1  ;;  %11710 = vst [vmem:[#allocation15_spill] sm:$0xff] %v9476_v8 }
 0x304   : > { %v3724_v58 = vrot.slane %v3716_v27, %v8899_v20  ;;  %v3731_v39 = vrot.slane %v3717_v30, %v8899_v20  ;;  %v3516_v62 = vrot.slane %v3508_v21, %v8908_v34  ;;  %v9479_v57 = vrot.slane %v3763_v10, %v8899_v20 }
 0x305   : > { %v2020_v60 = vpop.trf.xlu1  ;;  %v9482_v27 = vrot.slane %v3772_v53, %v8899_v20  ;;  %v9485_v21 = vrot.slane %v3779_v41, %v8899_v20  ;;  %v9490_v26 = vrot.slane %v3509_v56, %v8908_v34  ;;  %v9493_v12 = vrot.slane %v3524_v46, %v8908_v34 }
 0x306   : > { %v3780_v17 = vcombine.low %v3724_v58, %v3740_v15  ;;  %v3781_v32 = vcombine.high %v3724_v58, %v3740_v15  ;;  %v3796_v59 = vcombine.low %v3731_v39, %v3747_v16  ;;  %v3797_v52 = vcombine.high %v3731_v39, %v3747_v16 }
 0x307   : > { %v2116_v51 = vpop.trf.xlu0  ;;  %v5717_v10 = vcombine.high %v9454_v3, %v9457_v2  ;;  %v6805_v53 = vcombine.high %v9460_v9, %v9463_v5  ;;  %v9500_v15 = vrot.slane %v3525_v45, %v8908_v34  ;;  %v5853_v18 = vcombine.high %v9473_v1, %v9476_v8 }
 0x308   : > { %v4004_v41 = vcombine.low %v9430_v61, %v2116_v51  ;;  %v4005_v22 = vcombine.high %v9430_v61, %v2116_v51  ;;  %v9507_v16 = vrot.slane %v3516_v62, %v8899_v20  ;;  %v9510_v30 = vrot.slane %v3780_v17, %v8908_v34 }
 0x309   : > { %v2021_v23 = vpop.trf.xlu1  ;;  %v9513_v46 = vrot.slane %v6876_v0, %v8908_v34  ;;  %v9516_v58 = vrot.slane %v6908_v28, %v8908_v34  ;;  %v5685_v45 = vcombine.high %v9382_v50, %v9289_v55  ;;  %v5789_v62 = vcombine.high %v9405_v37, %v9294_v36 }
 0x30a   : > { %v3795_v17 = vrot.slane %v3781_v32, %v8908_v34  ;;  %v3804_v51 = vrot.slane %v3796_v59, %v8908_v34  ;;  %v9527_v0 = vrot.slane %v5653_v31, %v8908_v34  ;;  %v5821_v28 = vcombine.high %v9408_v4, %v9297_v42 }
 0x30b   : > { %v2117_v56 = vpop.trf.xlu0  ;;  %11711 = vst [vmem:[#allocation16_spill] sm:$0xff] %v9513_v46  ;;  %11712 = vst [vmem:[#allocation17_spill] sm:$0xff] %v9516_v58  ;;  %v4012_v5 = vrot.slane %v4004_v41, %v8899_v20  ;;  %v3811_v50 = vrot.slane %v3797_v52, %v8908_v34  ;;  %v9538_v59 = vrot.slane %v5685_v45, %v8908_v34 }
 0x30c   : > { %v4276_v39 = vcombine.low %v9451_v13, %v2117_v56  ;;  %v4277_v61 = vcombine.high %v9451_v13, %v2117_v56  ;;  %v4019_v13 = vrot.slane %v4005_v22, %v8899_v20  ;;  %v9541_v37 = vrot.slane %v5789_v62, %v8908_v34 }
 0x30d   : > { %v2084_v9 = vpop.trf.xlu1  ;;  %v9544_v42 = vrot.slane %v5821_v28, %v8908_v34  ;;  %v6741_v52 = vcombine.high %v9316_v7, %v9389_v24  ;;  %v5718_v31 = vcombine.low %v9527_v0, %v9538_v59  ;;  %v6877_v41 = vcombine.high %v9343_v29, %v9400_v49 }
 0x30e   : > { %v3988_v56 = vcombine.low %v2020_v60, %v2084_v9  ;;  %v3989_v55 = vcombine.high %v2020_v60, %v2084_v9  ;;  %v6773_v60 = vcombine.high %v9319_v44, %v9397_v47  ;;  %v6909_v7 = vcombine.high %v9346_v19, %v9413_v38 }
 0x30f   : > { %7772 = vrot.lane.b32.xlu1 %v5717_v10, %s8723_s19  ;;  %v9535_v36 = vpop.trf.xlu0  ;;  %v5854_v10 = vcombine.low %v9541_v37, %v9544_v42  ;;  %v4284_v44 = vrot.slane %v4276_v39, %v8899_v20  ;;  %v4291_v24 = vrot.slane %v4277_v61, %v8899_v20  ;;  %v6941_v49 = vcombine.high %v9513_v46, %v9516_v58 }
 0x310   : > { %v3996_v4 = vrot.slane %v3988_v56, %v8899_v20  ;;  %v4003_v9 = vrot.slane %v3989_v55, %v8899_v20  ;;  %v9574_v19 = vrot.slane %v6773_v60, %v8908_v34 }
 0x311   : > { %v2085_v32 = vpop.trf.xlu1 }
 0x312   : > { %v4052_v45 = vcombine.low %v3996_v4, %v4012_v5  ;;  %v4053_v62 = vcombine.high %v3996_v4, %v4012_v5  ;;  %v4068_v28 = vcombine.low %v4003_v9, %v4019_v13  ;;  %v4260_v47 = vcombine.low %v2021_v23, %v2085_v32 }
 0x313   : > { %v4261_v56 = vcombine.high %v2021_v23, %v2085_v32  ;;  %7780 = vrot.lane.b32.xlu1 %v6805_v53, %s8723_s19  ;;  %v9565_v55 = vpop.trf.xlu0  ;;  %v4069_v29 = vcombine.high %v4003_v9, %v4019_v13  ;;  %v9571_v5 = vrot.slane %v6741_v52, %v8908_v34  ;;  %v9584_v4 = vrot.slane %v6877_v41, %v8908_v34 }
 0x314   : > { %7774 = vrot.lane.b32.xlu0 %v5853_v18, %s8723_s19  ;;  %v4060_v38 = vrot.slane %v4052_v45, %v8908_v34  ;;  %v4268_v23 = vrot.slane %v4260_v47, %v8899_v20  ;;  %v4067_v18 = vrot.slane %v4053_v62, %v8908_v34  ;;  %v4076_v13 = vrot.slane %v4068_v28, %v8908_v34 }
 0x315   : > { %v4275_v53 = vrot.slane %v4261_v56, %v8899_v20  ;;  %v2532_v39 = vpop.trf.xlu1  ;;  %v9587_v9 = vrot.slane %v6909_v7, %v8908_v34  ;;  %v9592_v56 = vrot.slane %v9490_v26, %v8899_v20  ;;  %v9596_v62 = vrot.slane %v9493_v12, %v8899_v20 }
 0x316   : > { %v4324_v52 = vcombine.low %v4268_v23, %v4284_v44  ;;  %v4325_v60 = vcombine.high %v4268_v23, %v4284_v44  ;;  %v9600_v41 = vrot.slane %v9500_v15, %v8899_v20  ;;  %v4083_v28 = vrot.slane %v4069_v29, %v8908_v34 }
 0x317   : > { %v4340_v32 = vcombine.low %v4275_v53, %v4291_v24  ;;  %v4341_v45 = vcombine.high %v4275_v53, %v4291_v24  ;;  %7782 = vrot.lane.b32.xlu1 %v6941_v49, %s8723_s19  ;;  %v2628_v47 = vpop.trf.xlu0  ;;  %v9606_v7 = vrot.slane %v9510_v30, %v8899_v20  ;;  %v9609_v26 = vrot.slane %v3795_v17, %v8899_v20 }
 0x318   : > { %7804 = vrot.lane.b32.xlu0 %v5718_v31, %s8724_s20  ;;  %v9612_v44 = vrot.slane %v3804_v51, %v8899_v20  ;;  %v9615_v12 = vrot.slane %v4060_v38, %v8899_v20  ;;  %v9618_v24 = vrot.slane %v3811_v50, %v8899_v20  ;;  %v9621_v29 = vrot.slane %v4067_v18, %v8899_v20 }
 0x319   : > { %11713 = vst [vmem:[#allocation18_spill] sm:$0xff] %v9606_v7  ;;  %11714 = vst [vmem:[#allocation19_spill] sm:$0xff] %v9609_v26  ;;  %v2533_v15 = vpop.trf.xlu1  ;;  %v4548_v31 = vcombine.low %v9535_v36, %v2628_v47  ;;  %v6806_v30 = vcombine.low %v9571_v5, %v9574_v19  ;;  %v5755_v17 = vrot.slane %v4076_v13, %v8899_v20 }
 0x31a   : > { %11715 = vst [vmem:[#allocation20_spill] sm:$0xff] %v9618_v24  ;;  %v4332_v51 = vrot.slane %v4324_v52, %v8908_v34  ;;  %v4549_v49 = vcombine.high %v9535_v36, %v2628_v47  ;;  %v6942_v50 = vcombine.low %v9584_v4, %v9587_v9  ;;  %v5787_v23 = vrot.slane %v4083_v28, %v8899_v20 }
 0x31b   : > { %7806 = vrot.lane.b32.xlu1 %v5854_v10, %s8724_s20  ;;  %v2629_v38 = vpop.trf.xlu0  ;;  %v6807_v13 = vcombine.high %v9571_v5, %v9574_v19  ;;  %v4339_v52 = vrot.slane %v4325_v60, %v8908_v34  ;;  %v4348_v36 = vrot.slane %v4340_v32, %v8908_v34  ;;  %v6943_v47 = vcombine.high %v9584_v4, %v9587_v9 }
 0x31c   : > { %v4820_v53 = vcombine.low %v9565_v55, %v2629_v38  ;;  %v4821_v18 = vcombine.high %v9565_v55, %v2629_v38  ;;  %7812 = vrot.lane.b32.xlu0 %v6806_v30, %s8724_s20  ;;  %v5668_v28 = vcombine.low %v9507_v16, %v9615_v12  ;;  %v4556_v61 = vrot.slane %v4548_v31, %v8899_v20 }
 0x31d   : > { %v2596_v10 = vpop.trf.xlu1  ;;  %v5700_v30 = vcombine.low %v9592_v56, %v9621_v29  ;;  %v4355_v5 = vrot.slane %v4341_v45, %v8908_v34  ;;  %v9649_v19 = vrot.slane %v4332_v51, %v8899_v20  ;;  %v4563_v60 = vrot.slane %v4549_v49, %v8899_v20 }
 0x31e   : > { %v4532_v22 = vcombine.low %v2532_v39, %v2596_v10  ;;  %v4533_v55 = vcombine.high %v2532_v39, %v2596_v10  ;;  %v5804_v9 = vcombine.low %v9596_v62, %v5755_v17  ;;  %v11717_v45 = vcombine.high %v9527_v0, %v9538_v59 }
 0x31f   : > { %11716 = vst [vmem:[#allocation21_spill] sm:$0xff] %v9649_v19  ;;  %7814 = vrot.lane.b32.xlu1 %v6942_v50, %s8724_s20  ;;  %v9653_v4 = vpop.trf.xlu0  ;;  %v5836_v31 = vcombine.low %v9600_v41, %v5787_v23  ;;  %v5805_v51 = vcombine.high %v9596_v62, %v5755_v17  ;;  %v9665_v49 = vrot.slane %v4339_v52, %v8899_v20 }
 0x320   : > { %v4540_v32 = vrot.slane %v4532_v22, %v8899_v20  ;;  %v4547_v39 = vrot.slane %v4533_v55, %v8899_v20  ;;  %7836 = vrot.lane.b32.xlu0 %v11717_v45, %s8725_s25  ;;  %v9668_v38 = vrot.slane %v4348_v36, %v8899_v20  ;;  %v9671_v22 = vrot.slane %v5668_v28, %v8908_v34 }
 0x321   : > { %11718 = vst [vmem:[#allocation22_spill] sm:$0xff] %v9665_v49  ;;  %v2597_v50 = vpop.trf.xlu1  ;;  %v5837_v10 = vcombine.high %v9600_v41, %v5787_v23  ;;  %v9675_v55 = vrot.slane %v4820_v53, %v8899_v20  ;;  %v9678_v45 = vrot.slane %v5700_v30, %v8908_v34  ;;  %v9681_v62 = vrot.slane %v4821_v18, %v8899_v20 }
 0x322   : > { %v4596_v0 = vcombine.low %v4540_v32, %v4556_v61  ;;  %v4597_v59 = vcombine.high %v4540_v32, %v4556_v61  ;;  %v4804_v17 = vcombine.low %v2533_v15, %v2597_v50  ;;  %v4805_v52 = vcombine.high %v2533_v15, %v2597_v50 }
 0x323   : > { %v11719_v36 = vcombine.high %v9541_v37, %v9544_v42  ;;  %v9687_v28 = vpop.trf.xlu0  ;;  %v9690_v41 = vrot.slane %v5804_v9, %v8908_v34  ;;  %v4612_v23 = vcombine.low %v4547_v39, %v4563_v60  ;;  %v4613_v61 = vcombine.high %v4547_v39, %v4563_v60 }
 0x324   : > { %7844 = vrot.lane.b32.xlu0 %v6807_v13, %s8725_s25  ;;  %v9694_v53 = vrot.slane %v5836_v31, %v8908_v34  ;;  %v9697_v18 = vrot.slane %v5805_v51, %v8908_v34  ;;  %v4812_v15 = vrot.slane %v4804_v17, %v8899_v20  ;;  %v4819_v37 = vrot.slane %v4805_v52, %v8899_v20 }
 0x325   : > { %7838 = vrot.lane.b32.xlu1 %v11719_v36, %s8725_s25  ;;  %v3044_v42 = vpop.trf.xlu1  ;;  %v9702_v30 = vrot.slane %v5837_v10, %v8908_v34  ;;  %v5669_v9 = vcombine.high %v9507_v16, %v9615_v12  ;;  %v4604_v60 = vrot.slane %v4596_v0, %v8908_v34  ;;  %v4611_v13 = vrot.slane %v4597_v59, %v8908_v34 }
 0x326   : > { %v5720_v32 = vcombine.low %v9671_v22, %v9678_v45  ;;  %v5701_v39 = vcombine.high %v9592_v56, %v9621_v29  ;;  %v4868_v31 = vcombine.low %v4812_v15, %v9675_v55  ;;  %v4869_v51 = vcombine.high %v4812_v15, %v9675_v55 }
 0x327   : > { %v4884_v50 = vcombine.low %v4819_v37, %v9681_v62  ;;  %v4885_v10 = vcombine.high %v4819_v37, %v9681_v62  ;;  %v3140_v16 = vpop.trf.xlu0  ;;  %v9718_v12 = vrot.slane %v4355_v5, %v8899_v20  ;;  %v4620_v0 = vrot.slane %v4612_v23, %v8908_v34 }
 0x328   : > { %v4627_v59 = vrot.slane %v4613_v61, %v8908_v34  ;;  %7868 = vrot.lane.b32.xlu0 %v5720_v32, %s8726_s26  ;;  %v5856_v55 = vcombine.low %v9690_v41, %v9694_v53  ;;  %v9732_v62 = vrot.slane %v5669_v9, %v8908_v34  ;;  %v5092_v17 = vcombine.low %v9653_v4, %v3140_v16 }
 0x329   : > { %7846 = vrot.lane.b32.xlu1 %v6943_v47, %s8725_s25  ;;  %11720 = vst [vmem:[#allocation23_spill] sm:$0xff] %v9718_v12  ;;  %v3045_v29 = vpop.trf.xlu1  ;;  %v5093_v52 = vcombine.high %v9653_v4, %v3140_v16  ;;  %v5924_v36 = vcombine.low %v9447_v11, %v9300_v43  ;;  %v5956_v23 = vcombine.low %v9479_v57, %v9303_v6 }
 0x32a   : > { %v9741_v61 = vrot.slane %v4604_v60, %v8899_v20  ;;  %v9744_v15 = vrot.slane %v4611_v13, %v8899_v20  ;;  %v9748_v9 = vrot.slane %v5701_v39, %v8908_v34  ;;  %v9753_v32 = vrot.slane %v4620_v0, %v8899_v20 }
 0x32b   : > { %v3141_v37 = vpop.trf.xlu0  ;;  %v9756_v16 = vrot.slane %v4627_v59, %v8899_v20  ;;  %v7044_v39 = vcombine.low %v9352_v33, %v9419_v40  ;;  %v6060_v4 = vcombine.low %v9482_v27, %v9306_v14  ;;  %v6092_v0 = vcombine.low %v9485_v21, %v9309_v63 }
 0x32c   : > { %v5364_v60 = vcombine.low %v9687_v28, %v3141_v37  ;;  %v5365_v13 = vcombine.high %v9687_v28, %v3141_v37  ;;  %v5100_v59 = vrot.slane %v5092_v17, %v8899_v20  ;;  %v5107_v56 = vrot.slane %v5093_v52, %v8899_v20 }
 0x32d   : > { %7870 = vrot.lane.b32.xlu1 %v5856_v55, %s8726_s26  ;;  %v3108_v5 = vpop.trf.xlu1  ;;  %v7012_v55 = vcombine.low %v9349_v25, %v9416_v48  ;;  %v4876_v28 = vrot.slane %v4868_v31, %v8908_v34  ;;  %v4883_v37 = vrot.slane %v4869_v51, %v8908_v34  ;;  %v4892_v58 = vrot.slane %v4884_v50, %v8908_v34 }
 0x32e   : > { %v5076_v47 = vcombine.low %v3044_v42, %v3108_v5  ;;  %v5077_v46 = vcombine.high %v3044_v42, %v3108_v5  ;;  %v4899_v3 = vrot.slane %v4885_v10, %v8908_v34  ;;  %v9779_v17 = vrot.slane %v5924_v36, %v8908_v34  ;;  %v11723_v10 = vld [vmem:[#allocation9_spill] sm:$0xff] }
 0x32f   : > { %v9774_v2 = vpop.trf.xlu0  ;;  %v5925_v42 = vcombine.high %v9447_v11, %v9300_v43  ;;  %v9784_v31 = vrot.slane %v5956_v23, %v8908_v34  ;;  %v5957_v51 = vcombine.high %v9479_v57, %v9303_v6  ;;  %v7148_v50 = vcombine.low %v9361_v54, %v9425_v35 }
 0x330   : > { %v5084_v1 = vrot.slane %v5076_v47, %v8899_v20  ;;  %v5091_v8 = vrot.slane %v5077_v46, %v8899_v20  ;;  %11721 = vst [vmem:[#allocation24_spill] sm:$0xff] %v9779_v17  ;;  %v11724_v47 = vld [vmem:[#allocation8_spill] sm:$0xff]  ;;  %v5372_v7 = vrot.slane %v5364_v60, %v8899_v20  ;;  %v9794_v43 = vrot.slane %v5365_v13, %v8899_v20 }
 0x331   : > { %v3109_v5 = vpop.trf.xlu1  ;;  %11722 = vst [vmem:[#allocation25_spill] sm:$0xff] %v9784_v31  ;;  %v9802_v52 = vrot.slane %v7012_v55, %v8908_v34  ;;  %v9820_v55 = vrot.slane %v6092_v0, %v8908_v34 }
 0x332   : > { %v5140_v46 = vcombine.low %v5084_v1, %v5100_v59  ;;  %v5141_v26 = vcombine.high %v5084_v1, %v5100_v59  ;;  %v5156_v36 = vcombine.low %v5091_v8, %v5107_v56  ;;  %v5157_v49 = vcombine.high %v5091_v8, %v5107_v56 }
 0x333   : > { %v5348_v11 = vcombine.low %v3045_v29, %v3109_v5  ;;  %v5349_v23 = vcombine.high %v3045_v29, %v3109_v5  ;;  %v9796_v19 = vpop.trf.xlu0  ;;  %11725 = vst [vmem:[#allocation9_spill] sm:$0xff] %v9802_v52  ;;  %v9808_v29 = vrot.slane %v7044_v39, %v8908_v34  ;;  %11728 = vst [vmem:[#allocation27_spill] sm:$0xff] %v9820_v55 }
 0x334   : > { %v5148_v6 = vrot.slane %v5140_v46, %v8908_v34  ;;  %v5164_v57 = vrot.slane %v5156_v36, %v8908_v34  ;;  %v5171_v24 = vrot.slane %v5157_v49, %v8908_v34  ;;  %v5155_v1 = vrot.slane %v5141_v26, %v8908_v34 }
 0x335   : > { %v5356_v8 = vrot.slane %v5348_v11, %v8899_v20  ;;  %v5363_v56 = vrot.slane %v5349_v23, %v8899_v20  ;;  %v1636_v60 = vpop.trf.xlu1  ;;  %11726 = vst [vmem:[#allocation8_spill] sm:$0xff] %v9808_v29  ;;  %v9817_v49 = vrot.slane %v6060_v4, %v8908_v34  ;;  %v9834_v23 = vrot.slane %v4876_v28, %v8899_v20 }
 0x336   : > { %v9811_v13 = vrot.slane %v5164_v57, %v8899_v20  ;;  %v9814_v59 = vrot.slane %v5171_v24, %v8899_v20  ;;  %v9825_v11 = vrot.slane %v5148_v6, %v8899_v20 }
 0x337   : > { %11727 = vst [vmem:[#allocation26_spill] sm:$0xff] %v9817_v49  ;;  %v5412_v26 = vcombine.low %v5356_v8, %v5372_v7  ;;  %v5413_v5 = vcombine.high %v5356_v8, %v5372_v7  ;;  %v5428_v46 = vcombine.low %v5363_v56, %v9794_v43  ;;  %v5429_v36 = vcombine.high %v5363_v56, %v9794_v43  ;;  %v1732_v39 = vpop.trf.xlu0 }
 0x338   : > { %v6892_v24 = vcombine.low %v9753_v32, %v9811_v13  ;;  %v6924_v4 = vcombine.low %v9756_v16, %v9814_v59  ;;  %11729 = vst [vmem:[#allocation28_spill] sm:$0xff] %v9834_v23  ;;  %v9837_v7 = vrot.slane %v4883_v37, %v8899_v20  ;;  %v9840_v43 = vrot.slane %v5155_v1, %v8899_v20 }
 0x339   : > { %v1637_v6 = vpop.trf.xlu1  ;;  %v9845_v8 = vrot.slane %v4892_v58, %v8899_v20  ;;  %v3564_v56 = vcombine.low %v9774_v2, %v1732_v39  ;;  %v9851_v23 = vrot.slane %v4899_v3, %v8899_v20  ;;  %v9865_v3 = vrot.slane %v5957_v51, %v8908_v34 }
 0x33a   : > { %11730 = vst [vmem:[#allocation29_spill] sm:$0xff] %v9837_v7  ;;  %v6900_v0 = vrot.slane %v6892_v24, %v8908_v34  ;;  %v6932_v28 = vrot.slane %v6924_v4, %v8908_v34  ;;  %v9862_v24 = vrot.slane %v5925_v42, %v8908_v34  ;;  %v5420_v4 = vrot.slane %v5412_v26, %v8908_v34 }
 0x33b   : > { %11731 = vst [vmem:[#allocation30_spill] sm:$0xff] %v9845_v8  ;;  %11732 = vst [vmem:[#allocation31_spill] sm:$0xff] %v9851_v23  ;;  %v1733_v37 = vpop.trf.xlu0  ;;  %v6756_v8 = vcombine.low %v9741_v61, %v9825_v11  ;;  %v3565_v1 = vcombine.high %v9774_v2, %v1732_v39  ;;  %v6788_v7 = vcombine.low %v9744_v15, %v9840_v43 }
 0x33c   : > { %v6944_v57 = vcombine.low %v6900_v0, %v6932_v28  ;;  %v9872_v58 = vrot.slane %v7148_v50, %v8908_v34  ;;  %v5427_v12 = vrot.slane %v5413_v5, %v8908_v34  ;;  %v3572_v29 = vrot.slane %v3564_v56, %v8899_v20 }
 0x33d   : > { %v1700_v23 = vpop.trf.xlu1  ;;  %v3836_v51 = vcombine.low %v9796_v19, %v1733_v37  ;;  %v3837_v26 = vcombine.high %v9796_v19, %v1733_v37  ;;  %v6764_v2 = vrot.slane %v6756_v8, %v8908_v34  ;;  %v6796_v39 = vrot.slane %v6788_v7, %v8908_v34 }
 0x33e   : > { %11733 = vst [vmem:[#allocation32_spill] sm:$0xff] %v9872_v58  ;;  %v3548_v42 = vcombine.low %v1636_v60, %v1700_v23  ;;  %v3549_v52 = vcombine.high %v1636_v60, %v1700_v23  ;;  %7878 = vrot.lane.b32.xlu1 %v6944_v57, %s8726_s26  ;;  %v5436_v50 = vrot.slane %v5428_v46, %v8908_v34 }
 0x33f   : > { %v9881_v55 = vpop.trf.xlu0  ;;  %v6893_v56 = vcombine.high %v9753_v32, %v9811_v13  ;;  %v6925_v60 = vcombine.high %v9756_v16, %v9814_v59  ;;  %v5443_v23 = vrot.slane %v5429_v36, %v8908_v34  ;;  %v3579_v19 = vrot.slane %v3565_v1, %v8899_v20 }
 0x340   : > { %v3556_v5 = vrot.slane %v3548_v42, %v8899_v20  ;;  %v3563_v57 = vrot.slane %v3549_v52, %v8899_v20  ;;  %v6808_v8 = vcombine.low %v6764_v2, %v6796_v39  ;;  %v11734_v46 = vcombine.high %v9690_v41, %v9694_v53 }
 0x341   : > { %v1701_v7 = vpop.trf.xlu1  ;;  %v6757_v32 = vcombine.high %v9741_v61, %v9825_v11  ;;  %v6789_v16 = vcombine.high %v9744_v15, %v9840_v43  ;;  %v9901_v13 = vrot.slane %v3836_v51, %v8899_v20  ;;  %v9904_v52 = vrot.slane %v3837_v26, %v8899_v20 }
 0x342   : > { %v3612_v37 = vcombine.low %v3556_v5, %v3572_v29  ;;  %v3613_v49 = vcombine.high %v3556_v5, %v3572_v29  ;;  %7902 = vrot.lane.b32.xlu1 %v11734_v46, %s8727_s27  ;;  %7876 = vrot.lane.b32.xlu0 %v6808_v8, %s8726_s26  ;;  %v3820_v29 = vcombine.low %v1637_v6, %v1701_v7 }
 0x343   : > { %v3821_v59 = vcombine.high %v1637_v6, %v1701_v7  ;;  %v9907_v36 = vpop.trf.xlu0  ;;  %v9910_v41 = vrot.slane %v5420_v4, %v8899_v20  ;;  %v6945_v53 = vcombine.high %v6900_v0, %v6932_v28  ;;  %v9913_v61 = vrot.slane %v6893_v56, %v8908_v34 }
 0x344   : > { %v9916_v15 = vrot.slane %v6925_v60, %v8908_v34  ;;  %v3628_v11 = vcombine.low %v3563_v57, %v3579_v19  ;;  %v3629_v43 = vcombine.high %v3563_v57, %v3579_v19  ;;  %v9919_v1 = vrot.slane %v3820_v29, %v8899_v20 }
 0x345   : > { %v9922_v42 = vrot.slane %v3821_v59, %v8899_v20  ;;  %v2148_v6 = vpop.trf.xlu1  ;;  %v3620_v51 = vrot.slane %v3612_v37, %v8908_v34  ;;  %v3627_v4 = vrot.slane %v3613_v49, %v8908_v34  ;;  %v9928_v0 = vrot.slane %v6757_v32, %v8908_v34 }
 0x346   : > { %7910 = vrot.lane.b32.xlu1 %v6945_v53, %s8727_s27  ;;  %v9931_v28 = vrot.slane %v6789_v16, %v8908_v34  ;;  %v3884_v26 = vcombine.low %v9919_v1, %v9901_v13  ;;  %v3885_v5 = vcombine.high %v9919_v1, %v9901_v13  ;;  %v11735_v60 = vcombine.high %v9671_v22, %v9678_v45 }
 0x347   : > { %v3900_v56 = vcombine.low %v9922_v42, %v9904_v52  ;;  %v3901_v49 = vcombine.high %v9922_v42, %v9904_v52  ;;  %v2244_v19 = vpop.trf.xlu0  ;;  %v9946_v57 = vrot.slane %v5427_v12, %v8899_v20  ;;  %v5990_v37 = vcombine.low %v9862_v24, %v9865_v3 }
 0x348   : > { %7900 = vrot.lane.b32.xlu0 %v11735_v60, %s8727_s27  ;;  %v4108_v8 = vcombine.low %v9881_v55, %v2244_v19  ;;  %v4109_v7 = vcombine.high %v9881_v55, %v2244_v19  ;;  %v9953_v46 = vrot.slane %v5436_v50, %v8899_v20  ;;  %v9956_v32 = vrot.slane %v5443_v23, %v8899_v20 }
 0x349   : > { %v6809_v16 = vcombine.high %v6764_v2, %v6796_v39  ;;  %v2149_v22 = vpop.trf.xlu1  ;;  %v6946_v45 = vcombine.low %v9913_v61, %v9916_v15  ;;  %v3636_v12 = vrot.slane %v3628_v11, %v8908_v34  ;;  %v9962_v29 = vrot.slane %v3629_v43, %v8908_v34 }
 0x34a   : > { %v11736_v55 = vcombine.low %v9697_v18, %v9702_v30  ;;  %v6947_v50 = vcombine.high %v9913_v61, %v9916_v15  ;;  %v7013_v2 = vcombine.high %v9349_v25, %v9416_v48  ;;  %v9973_v39 = vrot.slane %v3620_v51, %v8899_v20 }
 0x34b   : > { %v9976_v23 = vrot.slane %v3627_v4, %v8899_v20  ;;  %v2245_v59 = vpop.trf.xlu0  ;;  %v6810_v53 = vcombine.low %v9928_v0, %v9931_v28  ;;  %v6811_v11 = vcombine.high %v9928_v0, %v9931_v28  ;;  %v4116_v61 = vrot.slane %v4108_v8, %v8899_v20 }
 0x34c   : > { %7934 = vrot.lane.b32.xlu1 %v11736_v55, %s8728_s29  ;;  %7908 = vrot.lane.b32.xlu0 %v6809_v16, %s8727_s27  ;;  %v4123_v15 = vrot.slane %v4109_v7, %v8899_v20  ;;  %v9986_v25 = vrot.slane %v7013_v2, %v8908_v34  ;;  %v7045_v48 = vcombine.high %v9352_v33, %v9419_v40 }
 0x34d   : > { %v2212_v43 = vpop.trf.xlu1  ;;  %v6061_v51 = vcombine.high %v9482_v27, %v9306_v14  ;;  %v6093_v4 = vcombine.high %v9485_v21, %v9309_v63  ;;  %v7149_v19 = vcombine.high %v9361_v54, %v9425_v35  ;;  %v4380_v8 = vcombine.low %v9907_v36, %v2245_v59 }
 0x34e   : > { %v4381_v7 = vcombine.high %v9907_v36, %v2245_v59  ;;  %v4092_v16 = vcombine.low %v2148_v6, %v2212_v43  ;;  %v4093_v55 = vcombine.high %v2148_v6, %v2212_v43  ;;  %v11737_v14 = vcombine.low %v9732_v62, %v9748_v9 }
 0x34f   : > { %v10005_v63 = vpop.trf.xlu0  ;;  %v10008_v33 = vrot.slane %v7045_v48, %v8908_v34  ;;  %v10011_v54 = vrot.slane %v6061_v51, %v8908_v34  ;;  %v10014_v40 = vrot.slane %v6093_v4, %v8908_v34  ;;  %v10017_v35 = vrot.slane %v7149_v19, %v8908_v34 }
 0x350   : > { %7942 = vrot.lane.b32.xlu1 %v6946_v45, %s8728_s29  ;;  %7932 = vrot.lane.b32.xlu0 %v11737_v14, %s8728_s29  ;;  %v4100_v27 = vrot.slane %v4092_v16, %v8899_v20  ;;  %v4107_v21 = vrot.slane %v4093_v55, %v8899_v20  ;;  %v7181_v36 = vcombine.high %v11724_v47, %v11723_v10 }
 0x351   : > { %v6076_v6 = vcombine.low %v9612_v44, %v9668_v38  ;;  %v2213_v45 = vpop.trf.xlu1  ;;  %v11738_v55 = vcombine.high %v9697_v18, %v9702_v30  ;;  %v10038_v14 = vrot.slane %v3636_v12, %v8899_v20  ;;  %v6308_v13 = vrot.slane %v9962_v29, %v8899_v20 }
 0x352   : > { %v4156_v51 = vcombine.low %v4100_v27, %v4116_v61  ;;  %v4157_v4 = vcombine.high %v4100_v27, %v4116_v61  ;;  %v4172_v19 = vcombine.low %v4107_v21, %v4123_v15  ;;  %v4173_v16 = vcombine.high %v4107_v21, %v4123_v15 }
 0x353   : > { %v4364_v60 = vcombine.low %v2149_v22, %v2213_v45  ;;  %v4365_v48 = vcombine.high %v2149_v22, %v2213_v45  ;;  %v10041_v2 = vpop.trf.xlu0  ;;  %v10044_v43 = vrot.slane %v7181_v36, %v8908_v34  ;;  %v4388_v61 = vrot.slane %v4380_v8, %v8899_v20 }
 0x354   : > { %7966 = vrot.lane.b32.xlu1 %v11738_v55, %s8729_s3  ;;  %7940 = vrot.lane.b32.xlu0 %v6810_v53, %s8728_s29  ;;  %v4395_v15 = vrot.slane %v4381_v7, %v8899_v20  ;;  %v4164_v27 = vrot.slane %v4156_v51, %v8908_v34  ;;  %v4171_v18 = vrot.slane %v4157_v4, %v8908_v34 }
 0x355   : > { %v4372_v30 = vrot.slane %v4364_v60, %v8899_v20  ;;  %v4379_v12 = vrot.slane %v4365_v48, %v8899_v20  ;;  %v2660_v53 = vpop.trf.xlu1  ;;  %v3892_v8 = vrot.slane %v3884_v26, %v8908_v34  ;;  %v4180_v7 = vrot.slane %v4172_v19, %v8908_v34 }
 0x356   : > { %v4187_v36 = vrot.slane %v4173_v16, %v8908_v34  ;;  %v11739_v60 = vcombine.low %v11724_v47, %v11723_v10  ;;  %v3899_v48 = vrot.slane %v3885_v5, %v8908_v34  ;;  %v3908_v26 = vrot.slane %v3900_v56, %v8908_v34 }
 0x357   : > { %v10078_v51 = vrot.slane %v4164_v27, %v8899_v20  ;;  %v11741_v10 = vcombine.high %v9732_v62, %v9748_v9  ;;  %v2756_v47 = vpop.trf.xlu0  ;;  %v3915_v1 = vrot.slane %v3901_v49, %v8908_v34  ;;  %v4428_v5 = vcombine.low %v4372_v30, %v4388_v61 }
 0x358   : > { %7974 = vrot.lane.b32.xlu1 %v6947_v50, %s8729_s3  ;;  %v10067_v45 = vrot.slane %v11739_v60, %v8908_v34  ;;  %v10081_v50 = vrot.slane %v4171_v18, %v8899_v20  ;;  %v4429_v56 = vcombine.high %v4372_v30, %v4388_v61  ;;  %v4444_v4 = vcombine.low %v4379_v12, %v4395_v15 }
 0x359   : > { %7964 = vrot.lane.b32.xlu0 %v11741_v10, %s8729_s3  ;;  %v4445_v19 = vcombine.high %v4379_v12, %v4395_v15  ;;  %v4652_v16 = vcombine.low %v10005_v63, %v2756_v47  ;;  %v4653_v55 = vcombine.high %v10005_v63, %v2756_v47  ;;  %v10095_v27 = vpop.trf.xlu1  ;;  %v10098_v62 = vrot.slane %v3892_v8, %v8899_v20  ;;  %v11747_v10 = vld [vmem:[#allocation26_spill] sm:$0xff]  ;;  %v11748_v47 = vld [vmem:[#allocation27_spill] sm:$0xff] }
 0x35a   : > { %11740 = vst [vmem:[#allocation33_spill] sm:$0xff] %v10067_v45  ;;  %v6292_v9 = vrot.slane %v4180_v7, %v8899_v20  ;;  %v6324_v29 = vrot.slane %v4187_v36, %v8899_v20  ;;  %v11743_v52 = vcombine.high %v9779_v17, %v9784_v31  ;;  %v7213_v42 = vcombine.high %v9872_v58, %v10067_v45  ;;  %v11767_v17 = vld [vmem:[#allocation19_spill] sm:$0xff] }
 0x35b   : > { %11742 = vst [vmem:[#allocation34_spill] sm:$0xff] %v10098_v62  ;;  %v10109_v49 = vrot.slane %v3899_v48, %v8899_v20  ;;  %v10112_v63 = vrot.slane %v3908_v26, %v8899_v20  ;;  %v2757_v61 = vpop.trf.xlu0  ;;  %v6196_v15 = vcombine.low %v9973_v39, %v10078_v51  ;;  %v6228_v18 = vcombine.low %v9976_v23, %v10081_v50 }
 0x35c   : > { %7776 = vrot.lane.b32.xlu1 %v11743_v52, %s8723_s19  ;;  %v10123_v30 = vrot.slane %v3915_v1, %v8899_v20  ;;  %v4436_v12 = vrot.slane %v4428_v5, %v8908_v34  ;;  %v4443_v8 = vrot.slane %v4429_v56, %v8908_v34  ;;  %v10128_v7 = vrot.slane %v6076_v6, %v8908_v34  ;;  %v11750_v56 = vld [vmem:[#allocation9_spill] sm:$0xff] }
 0x35d   : > { %11744 = vst [vmem:[#allocation35_spill] sm:$0xff] %v10109_v49  ;;  %11745 = vst [vmem:[#allocation36_spill] sm:$0xff] %v10112_v63  ;;  %7972 = vrot.lane.b32.xlu0 %v6811_v11, %s8729_s3  ;;  %v4452_v0 = vrot.slane %v4444_v4, %v8908_v34  ;;  %v4459_v28 = vrot.slane %v4445_v19, %v8908_v34  ;;  %v4660_v11 = vrot.slane %v4652_v16, %v8899_v20  ;;  %v2724_v60 = vpop.trf.xlu1  ;;  %v11751_v4 = vld [vmem:[#allocation8_spill] sm:$0xff] }
 0x35e   : > { %11746 = vst [vmem:[#allocation37_spill] sm:$0xff] %v10123_v30  ;;  %v4667_v36 = vrot.slane %v4653_v55, %v8899_v20  ;;  %v4636_v48 = vcombine.low %v2660_v53, %v2724_v60  ;;  %v4637_v26 = vcombine.high %v2660_v53, %v2724_v60  ;;  %v11749_v1 = vcombine.high %v11747_v10, %v11748_v47 }
 0x35f   : > { %v6332_v5 = vcombine.low %v10038_v14, %v6292_v9  ;;  %v6364_v6 = vcombine.low %v6308_v13, %v6324_v29  ;;  %v11752_v52 = vcombine.high %v11750_v56, %v11751_v4  ;;  %v10143_v19 = vpop.trf.xlu0  ;;  %v10146_v16 = vrot.slane %v6196_v15, %v8908_v34  ;;  %v11768_v56 = vld [vmem:[#allocation30_spill] sm:$0xff] }
 0x360   : > { %7778 = vrot.lane.b32.xlu1 %v11749_v1, %s8723_s19  ;;  %v10149_v53 = vrot.slane %v6228_v18, %v8908_v34  ;;  %v6333_v55 = vcombine.high %v10038_v14, %v6292_v9  ;;  %v6365_v60 = vcombine.high %v6308_v13, %v6324_v29  ;;  %v10153_v1 = vrot.slane %v4436_v12, %v8899_v20 }
 0x361   : > { %7784 = vrot.lane.b32.xlu0 %v11752_v52, %s8723_s19  ;;  %v10156_v21 = vrot.slane %v4443_v8, %v8899_v20  ;;  %v4924_v22 = vcombine.low %v10041_v2, %v2757_v61  ;;  %v4925_v52 = vcombine.high %v10041_v2, %v2757_v61  ;;  %v10161_v59 = vrot.slane %v4452_v0, %v8899_v20  ;;  %v2725_v13 = vpop.trf.xlu1 }
 0x362   : > { %11753 = vst [vmem:[#allocation38_spill] sm:$0xff] %v10153_v1  ;;  %v10164_v15 = vrot.slane %v4459_v28, %v8899_v20  ;;  %v4644_v18 = vrot.slane %v4636_v48, %v8899_v20  ;;  %v4651_v14 = vrot.slane %v4637_v26, %v8899_v20  ;;  %v10170_v9 = vrot.slane %v6332_v5, %v8908_v34 }
 0x363   : > { %11754 = vst [vmem:[#allocation39_spill] sm:$0xff] %v10156_v21  ;;  %11755 = vst [vmem:[#allocation40_spill] sm:$0xff] %v10161_v59  ;;  %v10173_v29 = vrot.slane %v6364_v6, %v8908_v34  ;;  %v6197_v2 = vcombine.high %v9973_v39, %v10078_v51  ;;  %v6229_v61 = vcombine.high %v9976_v23, %v10081_v50  ;;  %v10185_v8 = vpop.trf.xlu0 }
 0x364   : > { %11756 = vst [vmem:[#allocation41_spill] sm:$0xff] %v10164_v15  ;;  %7786 = vrot.lane.b32.xlu1 %v7213_v42, %s8723_s19  ;;  %v4908_v12 = vcombine.low %v10095_v27, %v2725_v13  ;;  %v4909_v42 = vcombine.high %v10095_v27, %v2725_v13  ;;  %v10188_v0 = vrot.slane %v6333_v55, %v8908_v34  ;;  %v11761_v55 = vld [vmem:[#allocation21_spill] sm:$0xff]  ;;  %s8509_s19 = sshll.u32 %s8702_s12, 10  ;;  %s8388_s12 = scalar_lea.sflag [#allocation4], %s8865_s28 }
 0x365   : > { %7808 = vrot.lane.b32.xlu0 %v5990_v37, %s8724_s20  ;;  %v10191_v28 = vrot.slane %v6365_v60, %v8908_v34  ;;  %v10194_v39 = vrot.slane %v4924_v22, %v8899_v20  ;;  %v10197_v23 = vrot.slane %v4925_v52, %v8899_v20  ;;  %v4700_v50 = vcombine.low %v4644_v18, %v4660_v11  ;;  %v3172_v5 = vpop.trf.xlu1  ;;  %v11762_v37 = vld [vmem:[#allocation18_spill] sm:$0xff] }
 0x366   : > { %v4701_v27 = vcombine.high %v4644_v18, %v4660_v11  ;;  %v4716_v48 = vcombine.low %v4651_v14, %v4667_v36  ;;  %v4717_v26 = vcombine.high %v4651_v14, %v4667_v36  ;;  %v10204_v6 = vrot.slane %v4908_v12, %v8899_v20 }
 0x367   : > { %v11757_v22 = vcombine.low %v10011_v54, %v10014_v40  ;;  %v10213_v60 = vrot.slane %v6197_v2, %v8908_v34  ;;  %v10216_v52 = vrot.slane %v6229_v61, %v8908_v34  ;;  %v10219_v11 = vrot.slane %v4909_v42, %v8899_v20  ;;  %v3268_v18 = vpop.trf.xlu0  ;;  %v11759_v42 = vld [vmem:[#allocation23_spill] sm:$0xff] }
 0x368   : > { %v11758_v36 = vcombine.low %v9986_v25, %v10008_v33  ;;  %v5196_v61 = vcombine.low %v10143_v19, %v3268_v18  ;;  %v5197_v12 = vcombine.high %v10143_v19, %v3268_v18  ;;  %v10238_v58 = vrot.slane %v4700_v50, %v8908_v34  ;;  %v11766_v19 = vld [vmem:[#allocation22_spill] sm:$0xff] }
 0x369   : > { %7810 = vrot.lane.b32.xlu1 %v11757_v22, %s8724_s20  ;;  %v11760_v22 = vld [vmem:[#allocation20_spill] sm:$0xff]  ;;  %v10241_v14 = vrot.slane %v4701_v27, %v8908_v34  ;;  %v10244_v13 = vrot.slane %v4716_v48, %v8908_v34  ;;  %v10247_v2 = vrot.slane %v4717_v26, %v8908_v34  ;;  %v10249_v45 = vpop.trf.xlu1  ;;  %v11763_v18 = vcombine.low %v10017_v35, %v10044_v43 }
 0x36a   : > { %7816 = vrot.lane.b32.xlu0 %v11758_v36, %s8724_s20  ;;  %v6108_v51 = vcombine.low %v11760_v22, %v11759_v42  ;;  %v5940_v36 = vcombine.low %v11762_v37, %v11761_v55  ;;  %v5204_v50 = vrot.slane %v5196_v61, %v8899_v20  ;;  %v5972_v31 = vcombine.low %v11767_v17, %v11766_v19  ;;  %v11770_v61 = vld [vmem:[#allocation28_spill] sm:$0xff] }
 0x36b   : > { %v3269_v27 = vpop.trf.xlu0  ;;  %v7164_v4 = vcombine.low %v11768_v56, %v9953_v46  ;;  %v11772_v1 = vcombine.high %v10011_v54, %v10014_v40  ;;  %v11773_v30 = vcombine.high %v9986_v25, %v10008_v33 }
 0x36c   : > { %v10262_v48 = vrot.slane %v6108_v51, %v8908_v34  ;;  %v5211_v51 = vrot.slane %v5197_v12, %v8899_v20  ;;  %v10279_v26 = vrot.slane %v5940_v36, %v8908_v34  ;;  %v11771_v12 = vld [vmem:[#allocation29_spill] sm:$0xff]  ;;  %v5468_v47 = vcombine.low %v10185_v8, %v3269_v27 }
 0x36d   : > { %7818 = vrot.lane.b32.xlu1 %v11763_v18, %s8724_s20  ;;  %v11764_v18 = vcombine.high %v9862_v24, %v9865_v3  ;;  %v3236_v10 = vpop.trf.xlu1  ;;  %v11769_v24 = vld [vmem:[#allocation31_spill] sm:$0xff]  ;;  %v7060_v49 = vcombine.low %v11771_v12, %v9946_v57  ;;  %v5469_v36 = vcombine.high %v10185_v8, %v3269_v27  ;;  %v10304_v63 = vrot.slane %v5972_v31, %v8908_v34 }
 0x36e   : > { %11765 = vst [vmem:[#allocation23_spill] sm:$0xff] %v10279_v26  ;;  %v7196_v3 = vcombine.low %v11769_v24, %v9956_v32  ;;  %v5180_v21 = vcombine.low %v3172_v5, %v3236_v10  ;;  %v5181_v62 = vcombine.high %v3172_v5, %v3236_v10  ;;  %v10307_v59 = vrot.slane %v7164_v4, %v8908_v34 }
 0x36f   : > { %7840 = vrot.lane.b32.xlu0 %v11764_v18, %s8725_s25  ;;  %v7028_v18 = vcombine.low %v11770_v61, %v9910_v41  ;;  %v10301_v15 = vpop.trf.xlu0  ;;  %11774 = vst [vmem:[#allocation20_spill] sm:$0xff] %v10304_v63  ;;  %v10318_v25 = vrot.slane %v7060_v49, %v8908_v34 }
 0x370   : > { %v10310_v10 = vrot.slane %v7196_v3, %v8908_v34  ;;  %v5188_v54 = vrot.slane %v5180_v21, %v8899_v20  ;;  %v5195_v40 = vrot.slane %v5181_v62, %v8899_v20  ;;  %v11777_v3 = vcombine.high %v10017_v35, %v10044_v43 }
 0x371   : > { %7842 = vrot.lane.b32.xlu1 %v11772_v1, %s8725_s25  ;;  %v10313_v8 = vrot.slane %v7028_v18, %v8908_v34  ;;  %11776 = vst [vmem:[#allocation18_spill] sm:$0xff] %v10318_v25  ;;  %v3237_v33 = vpop.trf.xlu1  ;;  %v11778_v18 = vcombine.low %v10146_v16, %v10149_v53  ;;  %v5476_v35 = vrot.slane %v5468_v47, %v8899_v20 }
 0x372   : > { %v5244_v62 = vcombine.low %v5188_v54, %v5204_v50  ;;  %v5245_v5 = vcombine.high %v5188_v54, %v5204_v50  ;;  %v5260_v49 = vcombine.low %v5195_v40, %v5211_v51  ;;  %v5261_v27 = vcombine.high %v5195_v40, %v5211_v51 }
 0x373   : > { %7848 = vrot.lane.b32.xlu0 %v11773_v30, %s8725_s25  ;;  %11775 = vst [vmem:[#allocation21_spill] sm:$0xff] %v10313_v8  ;;  %v5452_v31 = vcombine.low %v10249_v45, %v3237_v33  ;;  %v5453_v1 = vcombine.high %v10249_v45, %v3237_v33  ;;  %v10340_v30 = vpop.trf.xlu0  ;;  %v10358_v47 = vrot.slane %v10244_v13, %v8899_v20 }
 0x374   : > { %v5252_v43 = vrot.slane %v5244_v62, %v8908_v34  ;;  %v5268_v54 = vrot.slane %v5260_v49, %v8908_v34  ;;  %v5275_v40 = vrot.slane %v5261_v27, %v8908_v34  ;;  %v10362_v62 = vrot.slane %v10247_v2, %v8899_v20 }
 0x375   : > { %7850 = vrot.lane.b32.xlu1 %v11777_v3, %s8725_s25  ;;  %v5259_v3 = vrot.slane %v5245_v5, %v8908_v34  ;;  %v5460_v45 = vrot.slane %v5452_v31, %v8899_v20  ;;  %v1764_v33 = vpop.trf.xlu1  ;;  %v11779_v5 = vcombine.low %v10170_v9, %v10173_v29  ;;  %v10376_v27 = vrot.slane %v10238_v58, %v8899_v20 }
 0x376   : > { %v10365_v49 = vrot.slane %v5268_v54, %v8899_v20  ;;  %v10368_v31 = vrot.slane %v5275_v40, %v8899_v20  ;;  %v11780_v13 = vcombine.low %v10204_v6, %v10194_v39  ;;  %v5483_v54 = vrot.slane %v5469_v36, %v8899_v20 }
 0x377   : > { %7996 = vrot.lane.b32.xlu0 %v11778_v18, %s8720_s18  ;;  %v5467_v51 = vrot.slane %v5453_v1, %v8899_v20  ;;  %v1860_v40 = vpop.trf.xlu0  ;;  %v11781_v50 = vcombine.high %v10204_v6, %v10194_v39  ;;  %v11782_v36 = vcombine.low %v10219_v11, %v10197_v23  ;;  %v7276_v6 = vrot.slane %v5259_v3, %v8899_v20 }
 0x378   : > { %v4980_v2 = vrot.slane %v11780_v13, %v8908_v34  ;;  %v7420_v58 = vcombine.low %v10358_v47, %v10365_v49  ;;  %v7452_v21 = vcombine.low %v10362_v62, %v10368_v31  ;;  %v11783_v13 = vcombine.high %v10219_v11, %v10197_v23 }
 0x379   : > { %7998 = vrot.lane.b32.xlu1 %v11779_v5, %s8720_s18  ;;  %v4987_v4 = vrot.slane %v11781_v50, %v8908_v34  ;;  %v10389_v5 = vrot.slane %v5252_v43, %v8899_v20  ;;  %v4996_v1 = vrot.slane %v11782_v36, %v8908_v34  ;;  %v5516_v50 = vcombine.low %v5460_v45, %v5476_v35  ;;  %v10404_v43 = vpop.trf.xlu1 }
 0x37a   : > { %v5003_v39 = vrot.slane %v11783_v13, %v8908_v34  ;;  %v5517_v18 = vcombine.high %v5460_v45, %v5476_v35  ;;  %v3596_v25 = vcombine.low %v10301_v15, %v1860_v40  ;;  %v7428_v8 = vrot.slane %v7420_v58, %v8908_v34 }
 0x37b   : > { %v7460_v63 = vrot.slane %v7452_v21, %v8908_v34  ;;  %v7260_v36 = vrot.slane %v10241_v14, %v8899_v20  ;;  %v10412_v26 = vrot.slane %v4980_v2, %v8899_v20  ;;  %v5532_v23 = vcombine.low %v5467_v51, %v5483_v54  ;;  %v1861_v13 = vpop.trf.xlu0 }
 0x37c   : > { %v5533_v11 = vcombine.high %v5467_v51, %v5483_v54  ;;  %v10415_v3 = vrot.slane %v4987_v4, %v8899_v20  ;;  %v3597_v35 = vcombine.high %v10301_v15, %v1860_v40  ;;  %v7284_v58 = vcombine.low %v10376_v27, %v10389_v5 }
 0x37d   : > { %11784 = vst [vmem:[#allocation22_spill] sm:$0xff] %v10412_v26  ;;  %v7484_v45 = vcombine.low %v7428_v8, %v7460_v63  ;;  %v10421_v21 = vrot.slane %v4996_v1, %v8899_v20  ;;  %v10424_v14 = vrot.slane %v5003_v39, %v8899_v20  ;;  %v5524_v2 = vrot.slane %v5516_v50, %v8908_v34  ;;  %v1828_v26 = vpop.trf.xlu1 }
 0x37e   : > { %11785 = vst [vmem:[#allocation19_spill] sm:$0xff] %v10415_v3  ;;  %v7316_v51 = vcombine.low %v7260_v36, %v7276_v6  ;;  %v5531_v54 = vrot.slane %v5517_v18, %v8908_v34  ;;  %v3604_v4 = vrot.slane %v3596_v25, %v8899_v20  ;;  %v3580_v3 = vcombine.low %v1764_v33, %v1828_v26 }
 0x37f   : > { %11786 = vst [vmem:[#allocation30_spill] sm:$0xff] %v10421_v21  ;;  %11787 = vst [vmem:[#allocation31_spill] sm:$0xff] %v10424_v14  ;;  %v3581_v15 = vcombine.high %v1764_v33, %v1828_v26  ;;  %8006 = vrot.lane.b32.xlu1 %v7484_v45, %s8720_s18  ;;  %v5540_v40 = vrot.slane %v5532_v23, %v8908_v34  ;;  %v5547_v1 = vrot.slane %v5533_v11, %v8908_v34  ;;  %v10436_v50 = vpop.trf.xlu0 }
 0x380   : > { %v10433_v21 = vrot.slane %v7284_v58, %v8908_v34  ;;  %v7324_v39 = vrot.slane %v7316_v51, %v8908_v34  ;;  %v3611_v14 = vrot.slane %v3597_v35, %v8899_v20  ;;  %v3588_v18 = vrot.slane %v3580_v3, %v8899_v20 }
 0x381   : > { %v7421_v26 = vcombine.high %v10358_v47, %v10365_v49  ;;  %v7453_v25 = vcombine.high %v10362_v62, %v10368_v31  ;;  %v3595_v33 = vrot.slane %v3581_v15, %v8899_v20  ;;  %v1829_v11 = vpop.trf.xlu1  ;;  %v7285_v45 = vcombine.high %v10376_v27, %v10389_v5 }
 0x382   : > { %v7348_v23 = vcombine.low %v10433_v21, %v7324_v39  ;;  %v7317_v58 = vcombine.high %v7260_v36, %v7276_v6  ;;  %v10449_v51 = vrot.slane %v5524_v2, %v8899_v20  ;;  %v3868_v3 = vcombine.low %v10340_v30, %v1861_v13 }
 0x383   : > { %v3869_v35 = vcombine.high %v10340_v30, %v1861_v13  ;;  %v3644_v47 = vcombine.low %v3588_v18, %v3604_v4  ;;  %v11788_v62 = vcombine.high %v10170_v9, %v10173_v29  ;;  %v10458_v49 = vrot.slane %v5531_v54, %v8899_v20  ;;  %v10463_v6 = vpop.trf.xlu0 }
 0x384   : > { %v3645_v31 = vcombine.high %v3588_v18, %v3604_v4  ;;  %8004 = vrot.lane.b32.xlu0 %v7348_v23, %s8720_s18  ;;  %v3852_v27 = vcombine.low %v10404_v43, %v1829_v11  ;;  %v3853_v5 = vcombine.high %v10404_v43, %v1829_v11  ;;  %v10466_v30 = vrot.slane %v5540_v40, %v8899_v20 }
 0x385   : > { %8030 = vrot.lane.b32.xlu1 %v11788_v62, %s8730_s7  ;;  %v7485_v36 = vcombine.high %v7428_v8, %v7460_v63  ;;  %v10469_v13 = vrot.slane %v7421_v26, %v8908_v34  ;;  %v10472_v9 = vrot.slane %v7453_v25, %v8908_v34  ;;  %v3660_v29 = vcombine.low %v3595_v33, %v3611_v14  ;;  %v2276_v54 = vpop.trf.xlu1 }
 0x386   : > { %v3661_v2 = vcombine.high %v3595_v33, %v3611_v14  ;;  %v10475_v4 = vrot.slane %v7285_v45, %v8908_v34  ;;  %v10478_v43 = vrot.slane %v7317_v58, %v8908_v34  ;;  %v10481_v15 = vrot.slane %v5547_v1, %v8899_v20 }
 0x387   : > { %v10484_v63 = vrot.slane %v3868_v3, %v8899_v20  ;;  %v10487_v8 = vrot.slane %v3869_v35, %v8899_v20  ;;  %v3652_v40 = vrot.slane %v3644_v47, %v8908_v34  ;;  %v3659_v14 = vrot.slane %v3645_v31, %v8908_v34  ;;  %v2372_v33 = vpop.trf.xlu0 }
 0x388   : > { %v10493_v18 = vrot.slane %v3852_v27, %v8899_v20  ;;  %v10496_v26 = vrot.slane %v3853_v5, %v8899_v20  ;;  %v11789_v1 = vcombine.high %v10146_v16, %v10149_v53  ;;  %v7349_v25 = vcombine.high %v10433_v21, %v7324_v39 }
 0x389   : > { %8038 = vrot.lane.b32.xlu1 %v7485_v36, %s8730_s7  ;;  %v4141_v23 = vcombine.high %v10436_v50, %v2372_v33  ;;  %v7486_v11 = vcombine.low %v10469_v13, %v10472_v9  ;;  %v11790_v45 = vcombine.high %v9612_v44, %v9668_v38  ;;  %v11791_v3 = vcombine.high %v11760_v22, %v11759_v42  ;;  %v10522_v39 = vpop.trf.xlu1 }
 0x38a   : > { %8028 = vrot.lane.b32.xlu0 %v11789_v1, %s8730_s7  ;;  %v3668_v53 = vrot.slane %v3660_v29, %v8908_v34  ;;  %v10520_v21 = vrot.slane %v3661_v2, %v8908_v34  ;;  %v7350_v35 = vcombine.low %v10475_v4, %v10478_v43  ;;  %v7487_v44 = vcombine.high %v10469_v13, %v10472_v9 }
 0x38b   : > { %v10510_v58 = vrot.slane %v11790_v45, %v8908_v34  ;;  %v10516_v16 = vrot.slane %v11791_v3, %v8908_v34  ;;  %v10529_v38 = vrot.slane %v3652_v40, %v8899_v20  ;;  %v11792_v42 = vcombine.low %v10188_v0, %v10191_v28  ;;  %v2373_v29 = vpop.trf.xlu0 }
 0x38c   : > { %v7351_v22 = vcombine.high %v10475_v4, %v10478_v43  ;;  %v5941_v62 = vcombine.high %v11762_v37, %v11761_v55  ;;  %v10542_v31 = vrot.slane %v3659_v14, %v8899_v20  ;;  %v3916_v27 = vcombine.low %v10493_v18, %v10484_v63 }
 0x38d   : > { %8062 = vrot.lane.b32.xlu1 %v11792_v42, %s8731_s30  ;;  %v3917_v5 = vcombine.high %v10493_v18, %v10484_v63  ;;  %v3932_v36 = vcombine.low %v10496_v26, %v10487_v8  ;;  %v4140_v2 = vcombine.low %v10436_v50, %v2372_v33  ;;  %v4155_v40 = vrot.slane %v4141_v23, %v8899_v20  ;;  %v2340_v14 = vpop.trf.xlu1 }
 0x38e   : > { %8036 = vrot.lane.b32.xlu0 %v7349_v25, %s8730_s7  ;;  %v10554_v37 = vrot.slane %v5941_v62, %v8908_v34  ;;  %v5973_v55 = vcombine.high %v11767_v17, %v11766_v19  ;;  %v7165_v63 = vcombine.high %v11768_v56, %v9953_v46  ;;  %v7197_v18 = vcombine.high %v11769_v24, %v9956_v32 }
 0x38f   : > { %v7029_v1 = vcombine.high %v11770_v61, %v9910_v41  ;;  %v7061_v50 = vcombine.high %v11771_v12, %v9946_v57  ;;  %v4412_v25 = vcombine.low %v10463_v6, %v2373_v29  ;;  %v4413_v33 = vcombine.high %v10463_v6, %v2373_v29  ;;  %v10573_v46 = vpop.trf.xlu0 }
 0x390   : > { %v4124_v23 = vcombine.low %v2276_v54, %v2340_v14  ;;  %v4125_v45 = vcombine.high %v2276_v54, %v2340_v14  ;;  %v11793_v17 = vcombine.low %v10213_v60, %v10216_v52  ;;  %v10576_v41 = vrot.slane %v5973_v55, %v8908_v34 }
 0x391   : > { %8070 = vrot.lane.b32.xlu1 %v7486_v11, %s8731_s30  ;;  %v10579_v57 = vrot.slane %v7165_v63, %v8908_v34  ;;  %v10582_v32 = vrot.slane %v7197_v18, %v8908_v34  ;;  %v10585_v56 = vrot.slane %v7029_v1, %v8908_v34  ;;  %v4148_v19 = vrot.slane %v4140_v2, %v8899_v20  ;;  %v2341_v54 = vpop.trf.xlu1 }
 0x392   : > { %8060 = vrot.lane.b32.xlu0 %v11793_v17, %s8731_s30  ;;  %v4132_v24 = vrot.slane %v4124_v23, %v8899_v20  ;;  %v4139_v61 = vrot.slane %v4125_v45, %v8899_v20  ;;  %v10591_v12 = vrot.slane %v7061_v50, %v8908_v34  ;;  %v3933_v6 = vcombine.high %v10496_v26, %v10487_v8 }
 0x393   : > { %v4420_v62 = vrot.slane %v4412_v25, %v8899_v20  ;;  %v4427_v29 = vrot.slane %v4413_v33, %v8899_v20  ;;  %v11794_v8 = vcombine.high %v10188_v0, %v10191_v28  ;;  %v4396_v26 = vcombine.low %v10522_v39, %v2341_v54  ;;  %v10610_v63 = vpop.trf.xlu0 }
 0x394   : > { %v4204_v2 = vcombine.low %v4139_v61, %v4155_v40  ;;  %v4205_v55 = vcombine.high %v4139_v61, %v4155_v40  ;;  %v4397_v14 = vcombine.high %v10522_v39, %v2341_v54  ;;  %v10617_v1 = vrot.slane %v3668_v53, %v8899_v20  ;;  %v11812_v40 = vld [vmem:[#allocation20_spill] sm:$0xff] }
 0x395   : > { %8094 = vrot.lane.b32.xlu1 %v11794_v8, %s8732_s4  ;;  %v3924_v0 = vrot.slane %v3916_v27, %v8908_v34  ;;  %v4188_v28 = vcombine.low %v4132_v24, %v4148_v19  ;;  %v4189_v50 = vcombine.high %v4132_v24, %v4148_v19  ;;  %v4404_v25 = vrot.slane %v4396_v26, %v8899_v20  ;;  %v2788_v33 = vpop.trf.xlu1 }
 0x396   : > { %8068 = vrot.lane.b32.xlu0 %v7350_v35, %s8731_s30  ;;  %v4212_v35 = vrot.slane %v4204_v2, %v8908_v34  ;;  %v4411_v39 = vrot.slane %v4397_v14, %v8899_v20  ;;  %v3931_v45 = vrot.slane %v3917_v5, %v8908_v34  ;;  %v3940_v17 = vrot.slane %v3932_v36, %v8908_v34 }
 0x397   : > { %v3947_v53 = vrot.slane %v3933_v6, %v8908_v34  ;;  %v4219_v27 = vrot.slane %v4205_v55, %v8908_v34  ;;  %v10635_v19 = vrot.slane %v10520_v21, %v8899_v20  ;;  %v4460_v24 = vcombine.low %v4404_v25, %v4420_v62  ;;  %v2884_v36 = vpop.trf.xlu0 }
 0x398   : > { %v4461_v61 = vcombine.high %v4404_v25, %v4420_v62  ;;  %v4476_v54 = vcombine.low %v4411_v39, %v4427_v29  ;;  %v11795_v5 = vcombine.high %v10213_v60, %v10216_v52  ;;  %v10642_v6 = vrot.slane %v3924_v0, %v8899_v20  ;;  %v11802_v25 = vld [vmem:[#allocation14_spill] sm:$0xff] }
 0x399   : > { %8102 = vrot.lane.b32.xlu1 %v7487_v44, %s8732_s4  ;;  %v4196_v2 = vrot.slane %v4188_v28, %v8908_v34  ;;  %v4203_v13 = vrot.slane %v4189_v50, %v8908_v34  ;;  %v10649_v21 = vrot.slane %v4212_v35, %v8899_v20  ;;  %v4477_v44 = vcombine.high %v4411_v39, %v4427_v29  ;;  %v2789_v52 = vpop.trf.xlu1  ;;  %v11801_v35 = vld [vmem:[#allocation15_spill] sm:$0xff] }
 0x39a   : > { %8092 = vrot.lane.b32.xlu0 %v11795_v5, %s8732_s4  ;;  %11796 = vst [vmem:[#allocation28_spill] sm:$0xff] %v10642_v6  ;;  %v4684_v62 = vcombine.low %v10573_v46, %v2884_v36  ;;  %v4685_v60 = vcombine.high %v10573_v46, %v2884_v36  ;;  %v10654_v55 = vrot.slane %v3931_v45, %v8899_v20 }
 0x39b   : > { %v10657_v8 = vrot.slane %v3940_v17, %v8899_v20  ;;  %v10660_v26 = vrot.slane %v3947_v53, %v8899_v20  ;;  %v6331_v14 = vrot.slane %v4219_v27, %v8899_v20  ;;  %v11800_v29 = vcombine.low %v10128_v7, %v10262_v48  ;;  %v2885_v50 = vpop.trf.xlu0  ;;  %v11803_v53 = vld [vmem:[#allocation11_spill] sm:$0xff]  ;;  %v11804_v27 = vld [vmem:[#allocation10_spill] sm:$0xff] }
 0x39c   : > { %11797 = vst [vmem:[#allocation29_spill] sm:$0xff] %v10654_v55  ;;  %v4468_v0 = vrot.slane %v4460_v24, %v8908_v34  ;;  %v4475_v46 = vrot.slane %v4461_v61, %v8908_v34  ;;  %v4484_v28 = vrot.slane %v4476_v54, %v8908_v34  ;;  %v10677_v45 = vrot.slane %v4196_v2, %v8899_v20  ;;  %v11805_v61 = vld [vmem:[#allocation13_spill] sm:$0xff]  ;;  %v11806_v54 = vld [vmem:[#allocation12_spill] sm:$0xff]  ;;  %v11811_v24 = vld [vmem:[#allocation23_spill] sm:$0xff] }
 0x39d   : > { %11798 = vst [vmem:[#allocation42_spill] sm:$0xff] %v10657_v8  ;;  %11799 = vst [vmem:[#allocation43_spill] sm:$0xff] %v10660_v26  ;;  %7874 = vrot.lane.b32.xlu1 %v11800_v29, %s8726_s26  ;;  %v10680_v17 = vrot.slane %v4203_v13, %v8899_v20  ;;  %v4491_v36 = vrot.slane %v4477_v44, %v8908_v34  ;;  %v4692_v4 = vrot.slane %v4684_v62, %v8899_v20  ;;  %v11816_v55 = vld [vmem:[#allocation21_spill] sm:$0xff] }
 0x39e   : > { %8100 = vrot.lane.b32.xlu0 %v7351_v22, %s8732_s4  ;;  %v4699_v43 = vrot.slane %v4685_v60, %v8899_v20  ;;  %v2852_v22 = vpop.trf.xlu1  ;;  %v6348_v2 = vcombine.low %v10617_v1, %v10649_v21  ;;  %v4956_v29 = vcombine.low %v10610_v63, %v2885_v50  ;;  %v11807_v9 = vcombine.low %v10307_v59, %v10310_v10 }
 0x39f   : > { %v4668_v13 = vcombine.low %v2788_v33, %v2852_v22  ;;  %v4669_v39 = vcombine.high %v2788_v33, %v2852_v22  ;;  %v6380_v5 = vcombine.low %v10635_v19, %v6331_v14  ;;  %v10698_v44 = vrot.slane %v4468_v0, %v8899_v20  ;;  %v10711_v23 = vpop.trf.xlu0 }
 0x3a0   : > { %v10701_v62 = vrot.slane %v4475_v46, %v8899_v20  ;;  %v10704_v60 = vrot.slane %v4484_v28, %v8899_v20  ;;  %v11813_v33 = vcombine.low %v11811_v24, %v11812_v40  ;;  %v4957_v22 = vcombine.high %v10610_v63, %v2885_v50 }
 0x3a1   : > { %7882 = vrot.lane.b32.xlu1 %v11807_v9, %s8726_s26  ;;  %11808 = vst [vmem:[#allocation15_spill] sm:$0xff] %v10698_v44  ;;  %v4676_v9 = vrot.slane %v4668_v13, %v8899_v20  ;;  %v4683_v0 = vrot.slane %v4669_v39, %v8899_v20  ;;  %v6212_v46 = vcombine.low %v10529_v38, %v10677_v45 }
 0x3a2   : > { %11809 = vst [vmem:[#allocation14_spill] sm:$0xff] %v10701_v62  ;;  %11810 = vst [vmem:[#allocation11_spill] sm:$0xff] %v10704_v60  ;;  %7872 = vrot.lane.b32.xlu0 %v11813_v33, %s8726_s26  ;;  %v6244_v28 = vcombine.low %v10542_v31, %v10680_v17  ;;  %v10720_v18 = vrot.slane %v4491_v36, %v8899_v20  ;;  %v2853_v42 = vpop.trf.xlu1  ;;  %v10723_v33 = vrot.slane %v6348_v2, %v8908_v34  ;;  %v11817_v62 = vld [vmem:[#allocation18_spill] sm:$0xff] }
 0x3a3   : > { %v6349_v63 = vcombine.high %v10617_v1, %v10649_v21  ;;  %v6381_v50 = vcombine.high %v10635_v19, %v6331_v14  ;;  %v4964_v39 = vrot.slane %v4956_v29, %v8899_v20  ;;  %v4732_v13 = vcombine.low %v4676_v9, %v4692_v4  ;;  %v10740_v14 = vpop.trf.xlu0 }
 0x3a4   : > { %11814 = vst [vmem:[#allocation10_spill] sm:$0xff] %v10720_v18  ;;  %v4733_v11 = vcombine.high %v4676_v9, %v4692_v4  ;;  %v11815_v3 = vcombine.high %v10128_v7, %v10262_v48  ;;  %v10734_v36 = vrot.slane %v6380_v5, %v8908_v34  ;;  %v4748_v47 = vcombine.low %v4683_v0, %v4699_v43  ;;  %v11819_v48 = vld [vmem:[#allocation17_spill] sm:$0xff] }
 0x3a5   : > { %v4749_v2 = vcombine.high %v4683_v0, %v4699_v43  ;;  %v11818_v1 = vcombine.low %v11816_v55, %v11817_v62  ;;  %v4940_v19 = vcombine.low %v2789_v52, %v2853_v42  ;;  %v4941_v21 = vcombine.high %v2789_v52, %v2853_v42 }
 0x3a6   : > { %7906 = vrot.lane.b32.xlu1 %v11815_v3, %s8727_s27  ;;  %v4971_v4 = vrot.slane %v4957_v22, %v8899_v20  ;;  %v10744_v29 = vrot.slane %v6212_v46, %v8908_v34  ;;  %v10747_v7 = vrot.slane %v6244_v28, %v8908_v34  ;;  %v11820_v3 = vld [vmem:[#allocation16_spill] sm:$0xff]  ;;  %v3300_v0 = vpop.trf.xlu1  ;;  %v10754_v42 = vrot.slane %v6349_v63, %v8908_v34 }
 0x3a7   : > { %7880 = vrot.lane.b32.xlu0 %v11818_v1, %s8726_s26  ;;  %v4948_v43 = vrot.slane %v4940_v19, %v8899_v20  ;;  %v4955_v9 = vrot.slane %v4941_v21, %v8899_v20  ;;  %v10757_v52 = vrot.slane %v6381_v50, %v8908_v34  ;;  %v4740_v22 = vrot.slane %v4732_v13, %v8908_v34  ;;  %v3396_v13 = vpop.trf.xlu0  ;;  %v11829_v1 = vld [vmem:[#allocation41_spill] sm:$0xff] }
 0x3a8   : > { %11821 = vst [vmem:[#allocation13_spill] sm:$0xff] %v10754_v42  ;;  %v4747_v46 = vrot.slane %v4733_v11, %v8908_v34  ;;  %v11823_v28 = vcombine.high %v10307_v59, %v10310_v10  ;;  %v6213_v19 = vcombine.high %v10529_v38, %v10677_v45  ;;  %v4756_v63 = vrot.slane %v4748_v47, %v8908_v34  ;;  %v11832_v45 = vld [vmem:[#allocation34_spill] sm:$0xff] }
 0x3a9   : > { %11822 = vst [vmem:[#allocation12_spill] sm:$0xff] %v10757_v52  ;;  %v4763_v50 = vrot.slane %v4749_v2, %v8908_v34  ;;  %v5004_v21 = vcombine.low %v4948_v43, %v4964_v39  ;;  %v5005_v5 = vcombine.high %v4948_v43, %v4964_v39  ;;  %v11824_v11 = vcombine.high %v11811_v24, %v11812_v40  ;;  %v11828_v40 = vld [vmem:[#allocation36_spill] sm:$0xff] }
 0x3aa   : > { %7914 = vrot.lane.b32.xlu1 %v11823_v28, %s8727_s27  ;;  %v5020_v59 = vcombine.low %v4955_v9, %v4971_v4  ;;  %v5021_v10 = vcombine.high %v4955_v9, %v4971_v4  ;;  %v5228_v28 = vcombine.low %v10711_v23, %v3396_v13  ;;  %v5229_v38 = vcombine.high %v10711_v23, %v3396_v13  ;;  %v10779_v47 = vpop.trf.xlu1 }
 0x3ab   : > { %7904 = vrot.lane.b32.xlu0 %v11824_v11, %s8727_s27  ;;  %v10788_v24 = vrot.slane %v4740_v22, %v8899_v20  ;;  %v10791_v2 = vrot.slane %v4747_v46, %v8899_v20  ;;  %v11825_v23 = vcombine.low %v10510_v58, %v10516_v16  ;;  %v10798_v4 = vrot.slane %v6213_v19, %v8908_v34  ;;  %v3397_v19 = vpop.trf.xlu0 }
 0x3ac   : > { %v6245_v43 = vcombine.high %v10542_v31, %v10680_v17  ;;  %v10803_v9 = vrot.slane %v4756_v63, %v8899_v20  ;;  %v10806_v22 = vrot.slane %v4763_v50, %v8899_v20  ;;  %v5012_v46 = vrot.slane %v5004_v21, %v8908_v34 }
 0x3ad   : > { %v5019_v11 = vrot.slane %v5005_v5, %v8908_v34  ;;  %v11826_v13 = vcombine.high %v11816_v55, %v11817_v62  ;;  %v10818_v31 = vrot.slane %v5021_v10, %v8908_v34  ;;  %v5236_v17 = vrot.slane %v5228_v28, %v8899_v20  ;;  %v11827_v5 = vld [vmem:[#allocation40_spill] sm:$0xff]  ;;  %v11830_v55 = vld [vmem:[#allocation37_spill] sm:$0xff] }
 0x3ae   : > { %7938 = vrot.lane.b32.xlu1 %v11825_v23, %s8728_s29  ;;  %v10815_v23 = vrot.slane %v5020_v59, %v8908_v34  ;;  %v5500_v63 = vcombine.low %v10740_v14, %v3397_v19  ;;  %v5243_v50 = vrot.slane %v5229_v38, %v8899_v20  ;;  %v3364_v21 = vpop.trf.xlu1  ;;  %v6604_v39 = vcombine.low %v11828_v40, %v11827_v5 }
 0x3af   : > { %7912 = vrot.lane.b32.xlu0 %v11826_v13, %s8727_s27  ;;  %v6636_v62 = vcombine.low %v11830_v55, %v11829_v1  ;;  %v11831_v13 = vld [vmem:[#allocation38_spill] sm:$0xff]  ;;  %v5501_v6 = vcombine.high %v10740_v14, %v3397_v19  ;;  %v5212_v10 = vcombine.low %v3300_v0, %v3364_v21  ;;  %v5213_v44 = vcombine.high %v3300_v0, %v3364_v21  ;;  %v10841_v18 = vpop.permute.xlu0 %7774  ;;  %v11835_v19 = vld [vmem:[#allocation39_spill] sm:$0xff]  ;;  %s11566_s27 = scalar_lea.hbm %s11621_s2, %s8509_s19 }
 0x3b0   : > { %v6468_v59 = vcombine.low %v11832_v45, %v11831_v13  ;;  %v11833_v28 = vcombine.low %v10579_v57, %v10582_v32  ;;  %v10835_v38 = vrot.slane %v6245_v43, %v8908_v34  ;;  %v11834_v26 = vcombine.low %v10554_v37, %v10576_v41  ;;  %v11836_v21 = vld [vmem:[#allocation35_spill] sm:$0xff]  ;;  %v11837_v13 = vld [vmem:[#allocation30_spill] sm:$0xff] }
 0x3b1   : > { %v10844_v8 = vrot.slane %v6604_v39, %v8908_v34  ;;  %v10847_v14 = vrot.slane %v6636_v62, %v8908_v34  ;;  %v6500_v43 = vcombine.low %v11836_v21, %v11835_v19  ;;  %v5220_v60 = vrot.slane %v5212_v10, %v8899_v20 }
 0x3b2   : > { %7946 = vrot.lane.b32.xlu1 %v11833_v28, %s8728_s29  ;;  %v10850_v0 = vrot.slane %v6468_v59, %v8908_v34  ;;  %v5508_v28 = vrot.slane %v5500_v63, %v8899_v20  ;;  %v3365_v39 = vpop.trf.xlu1  ;;  %v7692_v21 = vcombine.low %v11837_v13, %v10466_v30  ;;  %v11838_v63 = vld [vmem:[#allocation31_spill] sm:$0xff]  ;;  %v11839_v45 = vcombine.high %v10510_v58, %v10516_v16 }
 0x3b3   : > { %7936 = vrot.lane.b32.xlu0 %v11834_v26, %s8728_s29  ;;  %v5227_v26 = vrot.slane %v5213_v44, %v8899_v20  ;;  %v10862_v59 = vrot.slane %v6500_v43, %v8908_v34  ;;  %v7724_v19 = vcombine.low %v11838_v63, %v10481_v15  ;;  %v5276_v10 = vcombine.low %v5220_v60, %v5236_v17  ;;  %v7805_v63 = vpop.permute.xlu0 %7804 }
 0x3b4   : > { %v5277_v55 = vcombine.high %v5220_v60, %v5236_v17  ;;  %v5515_v62 = vrot.slane %v5501_v6, %v8899_v20  ;;  %v11840_v43 = vcombine.low %v10585_v56, %v10591_v12  ;;  %v5484_v52 = vcombine.low %v10779_v47, %v3365_v39 }
 0x3b5   : > { %v5292_v44 = vcombine.low %v5227_v26, %v5243_v50  ;;  %v5293_v1 = vcombine.high %v5227_v26, %v5243_v50  ;;  %v5485_v42 = vcombine.high %v10779_v47, %v3365_v39  ;;  %v5284_v17 = vrot.slane %v5276_v10, %v8908_v34  ;;  %v11842_v39 = vld [vmem:[#allocation22_spill] sm:$0xff] }
 0x3b6   : > { %7970 = vrot.lane.b32.xlu1 %v11839_v45, %s8729_s3  ;;  %v5291_v58 = vrot.slane %v5277_v55, %v8908_v34  ;;  %v10886_v45 = vrot.slane %v5012_v46, %v8899_v20  ;;  %v5492_v50 = vrot.slane %v5484_v52, %v8899_v20  ;;  %v7773_v47 = vpop.permute.xlu1 %7772  ;;  %v10893_v10 = vrot.slane %v5019_v11, %v8899_v20 }
 0x3b7   : > { %7944 = vrot.lane.b32.xlu0 %v11840_v43, %s8728_s29  ;;  %v5300_v16 = vrot.slane %v5292_v44, %v8908_v34  ;;  %v5307_v6 = vrot.slane %v5293_v1, %v8908_v34  ;;  %v5499_v26 = vrot.slane %v5485_v42, %v8899_v20  ;;  %v7556_v43 = vcombine.low %v11842_v39, %v10449_v51 }
 0x3b8   : > { %11841 = vst [vmem:[#allocation23_spill] sm:$0xff] %v10886_v45  ;;  %v10896_v55 = vrot.slane %v5284_v17, %v8899_v20  ;;  %v11843_v42 = vcombine.high %v10579_v57, %v10582_v32  ;;  %v5548_v52 = vcombine.low %v5492_v50, %v5508_v28  ;;  %v5549_v44 = vcombine.high %v5492_v50, %v5508_v28  ;;  %v7813_v17 = vpop.permute.xlu0 %7812 }
 0x3b9   : > { %v10899_v1 = vrot.slane %v5300_v16, %v8899_v20  ;;  %v10902_v46 = vrot.slane %v5307_v6, %v8899_v20  ;;  %v5564_v60 = vcombine.low %v5499_v26, %v5515_v62  ;;  %v5565_v45 = vcombine.high %v5499_v26, %v5515_v62 }
 0x3ba   : > { %7978 = vrot.lane.b32.xlu1 %v11843_v42, %s8729_s3  ;;  %v11844_v11 = vcombine.high %v10554_v37, %v10576_v41  ;;  %v10913_v16 = vrot.slane %v5291_v58, %v8899_v20  ;;  %v7300_v32 = vcombine.low %v10788_v24, %v10896_v55  ;;  %v10923_v28 = vrot.slane %v10815_v23, %v8899_v20  ;;  %v7781_v62 = vpop.permute.xlu1 %7780 }
 0x3bb   : > { %v7436_v6 = vcombine.low %v10803_v9, %v10899_v1  ;;  %v7468_v57 = vcombine.low %v10806_v22, %v10902_v46  ;;  %v10927_v37 = vrot.slane %v10818_v31, %v8899_v20  ;;  %v5556_v41 = vrot.slane %v5548_v52, %v8908_v34 }
 0x3bc   : > { %7968 = vrot.lane.b32.xlu0 %v11844_v11, %s8729_s3  ;;  %v5563_v50 = vrot.slane %v5549_v44, %v8908_v34  ;;  %v11845_v26 = vcombine.low %v11804_v27, %v11803_v53  ;;  %v11846_v23 = vcombine.low %v10723_v33, %v10734_v36  ;;  %v5572_v11 = vrot.slane %v5564_v60, %v8908_v34  ;;  %v7837_v27 = vpop.permute.xlu0 %7836 }
 0x3bd   : > { %v7444_v31 = vrot.slane %v7436_v6, %v8908_v34  ;;  %v7476_v52 = vrot.slane %v7468_v57, %v8908_v34  ;;  %v5579_v58 = vrot.slane %v5565_v45, %v8908_v34  ;;  %v11847_v53 = vcombine.high %v10585_v56, %v10591_v12 }
 0x3be   : > { %v8245_v42 = vsel %vm8244_vm2, %v11845_v26, %v7773_v47  ;;  %8126 = vrot.lane.b32.xlu1 %v11846_v23, %s8733_s5  ;;  %v10950_v47 = vrot.slane %v7692_v21, %v8908_v34  ;;  %v10953_v44 = vrot.slane %v7724_v19, %v8908_v34  ;;  %v10956_v6 = vrot.slane %v7300_v32, %v8908_v34  ;;  %v7783_v23 = vpop.permute.xlu1 %7782 }
 0x3bf   : > { %v7488_v26 = vcombine.low %v7444_v31, %v7476_v52  ;;  %v7332_v60 = vcombine.low %v10791_v2, %v10913_v16  ;;  %v6267_v45 = vcombine.high %v10798_v4, %v10835_v38  ;;  %v11848_v56 = vcombine.low %v11802_v25, %v11801_v35 }
 0x3c0   : > { %7976 = vrot.lane.b32.xlu0 %v11847_v53, %s8729_s3  ;;  %v10968_v21 = vrot.slane %v5556_v41, %v8899_v20  ;;  %v11849_v19 = vcombine.low %v11806_v54, %v11805_v61  ;;  %v8253_v32 = vsel %vm184_vm1, %v8245_v42, %v7805_v63  ;;  %v10976_v53 = vrot.slane %v5563_v50, %v8899_v20  ;;  %v7845_v41 = vpop.permute.xlu0 %7844  ;;  %s8737_s3 = smov [#allocation5]  }
 0x3c1   : > { %v8246_v12 = vsel %vm8244_vm2, %v11848_v56, %v10841_v18  ;;  %v10980_v35 = vrot.slane %v7332_v60, %v8908_v34  ;;  %v7437_v18 = vcombine.high %v10803_v9, %v10899_v1  ;;  %v7469_v25 = vcombine.high %v10806_v22, %v10902_v46  ;;  %v11854_v56 = vld [vmem:[#allocation41_spill] sm:$0xff] }
 0x3c2   : > { %v8249_v57 = vsel %vm8244_vm2, %v11849_v19, %v7781_v62  ;;  %8134 = vrot.lane.b32.xlu1 %v7488_v26, %s8733_s5  ;;  %v10987_v61 = vrot.slane %v5572_v11, %v8899_v20  ;;  %v10990_v54 = vrot.slane %v5579_v58, %v8899_v20  ;;  %v11850_v63 = vcombine.low %v10744_v29, %v10747_v7  ;;  %v11852_v11 = vld [vmem:[#allocation19_spill] sm:$0xff]  ;;  %v11855_v19 = vld [vmem:[#allocation37_spill] sm:$0xff] }
 0x3c3   : > { %v7301_v62 = vcombine.high %v10788_v24, %v10896_v55  ;;  %v11001_v22 = vsel %vm8261_vm3, %v8253_v32, %v7837_v27  ;;  %v7352_v1 = vcombine.low %v10956_v6, %v10980_v35  ;;  %v8257_v20 = vsel %vm184_vm1, %v8249_v57, %v7813_v17  ;;  %v7807_v24 = vpop.permute.xlu1 %7806  ;;  %v11856_v32 = vld [vmem:[#allocation38_spill] sm:$0xff] }
 0x3c4   : > { %8124 = vrot.lane.b32.xlu0 %v11850_v63, %s8733_s5  ;;  %v7333_v46 = vcombine.high %v10791_v2, %v10913_v16  ;;  %v11851_v58 = vcombine.low %v11820_v3, %v11819_v48  ;;  %v7489_v55 = vcombine.high %v7444_v31, %v7476_v52  ;;  %v11013_v42 = vrot.slane %v7556_v43, %v8908_v34  ;;  %v7869_v31 = vpop.permute.xlu0 %7868 }
 0x3c5   : > { %v7588_v27 = vcombine.low %v11852_v11, %v10458_v49  ;;  %v11853_v17 = vcombine.high %v10723_v33, %v10734_v36  ;;  %v11022_v2 = vrot.slane %v7437_v18, %v8908_v34  ;;  %v11025_v48 = vrot.slane %v7469_v25, %v8908_v34 }
 0x3c6   : > { %v8250_v50 = vsel %vm8244_vm2, %v11851_v58, %v7783_v23  ;;  %v11033_v16 = vsel %vm8261_vm3, %v8257_v20, %v7845_v41  ;;  %v11036_v33 = vrot.slane %v7301_v62, %v8908_v34  ;;  %v11044_v26 = vrot.slane %v7333_v46, %v8908_v34  ;;  %v11857_v23 = vld [vmem:[#allocation34_spill] sm:$0xff]  ;;  %v11858_v62 = vld [vmem:[#allocation39_spill] sm:$0xff] }
 0x3c7   : > { %8158 = vrot.lane.b32.xlu1 %v11853_v17, %s8734_s21  ;;  %v11039_v36 = vrot.slane %v7588_v27, %v8908_v34  ;;  %v6605_v60 = vcombine.high %v11828_v40, %v11827_v5  ;;  %v6637_v57 = vcombine.high %v11855_v19, %v11854_v56  ;;  %v6469_v18 = vcombine.high %v11857_v23, %v11856_v32  ;;  %v7815_v25 = vpop.permute.xlu1 %7814  ;;  %v11872_v23 = vld [vmem:[#allocation29_spill] sm:$0xff]  ;;  %v11873_v41 = vld [vmem:[#allocation23_spill] sm:$0xff] }
 0x3c8   : > { %8132 = vrot.lane.b32.xlu0 %v7352_v1, %s8733_s5  ;;  %v11859_v1 = vld [vmem:[#allocation35_spill] sm:$0xff]  ;;  %v7693_v46 = vcombine.high %v11837_v13, %v10466_v30  ;;  %v8258_v40 = vsel %vm184_vm1, %v8250_v50, %v7815_v25  ;;  %v11860_v17 = vcombine.high %v10744_v29, %v10747_v7  ;;  %v7877_v30 = vpop.permute.xlu0 %7876  ;;  %v7557_v56 = vcombine.high %v11842_v39, %v10449_v51 }
 0x3c9   : > { %v6501_v20 = vcombine.high %v11859_v1, %v11858_v62  ;;  %v11063_v5 = vrot.slane %v6605_v60, %v8908_v34  ;;  %v11066_v58 = vrot.slane %v6637_v57, %v8908_v34  ;;  %v11069_v27 = vrot.slane %v6469_v18, %v8908_v34  ;;  %v11870_v18 = vld [vmem:[#allocation28_spill] sm:$0xff] }
 0x3ca   : > { %v11079_v50 = vrot.slane %v7693_v46, %v8908_v34  ;;  %v8254_v19 = vsel %vm184_vm1, %v8246_v12, %v7807_v24  ;;  %v7353_v57 = vcombine.high %v10956_v6, %v10980_v35  ;;  %v7589_v7 = vcombine.high %v11852_v11, %v10458_v49  ;;  %v11862_v12 = vld [vmem:[#allocation13_spill] sm:$0xff]  ;;  %v11863_v49 = vld [vmem:[#allocation12_spill] sm:$0xff]  ;;  %v11871_v46 = vld [vmem:[#allocation14_spill] sm:$0xff] }
 0x3cb   : > { %8166 = vrot.lane.b32.xlu1 %v7489_v55, %s8734_s21  ;;  %v11076_v13 = vrot.slane %v6501_v20, %v8908_v34  ;;  %v11861_v55 = vld [vmem:[#allocation31_spill] sm:$0xff]  ;;  %v7839_v32 = vpop.permute.xlu1 %7838  ;;  %v11098_v51 = vrot.slane %v7557_v56, %v8908_v34  ;;  %v11864_v35 = vcombine.low %v11862_v12, %v11863_v49  ;;  %v7490_v24 = vcombine.low %v11022_v2, %v11025_v48 }
 0x3cc   : > { %8156 = vrot.lane.b32.xlu0 %v11860_v17, %s8734_s21  ;;  %v7725_v60 = vcombine.high %v11861_v55, %v10481_v15  ;;  %v8263_v6 = vsel %vm8261_vm3, %v8254_v19, %v7839_v32  ;;  %v11110_v11 = vrot.slane %v7589_v7, %v8908_v34  ;;  %v7901_v25 = vpop.permute.xlu0 %7900  ;;  %v7354_v62 = vcombine.low %v11036_v33, %v11044_v26  ;;  %v11865_v56 = vld [vmem:[#allocation11_spill] sm:$0xff]  ;;  %v11866_v19 = vld [vmem:[#allocation42_spill] sm:$0xff] }
 0x3cd   : > { %v7491_v1 = vcombine.high %v11022_v2, %v11025_v48  ;;  %v8271_v17 = vsel %vm8270_vm4, %v11001_v22, %v7869_v31  ;;  %v11867_v2 = vld [vmem:[#allocation10_spill] sm:$0xff]  ;;  %v11868_v48 = vld [vmem:[#allocation43_spill] sm:$0xff]  ;;  %v6516_v20 = vcombine.low %v11872_v23, %v11871_v46  ;;  %v7708_v22 = vcombine.low %v10923_v28, %v10987_v61 }
 0x3ce   : > { %v11095_v15 = vrot.slane %v7725_v60, %v8908_v34  ;;  %v6652_v32 = vcombine.low %v11868_v48, %v11867_v2  ;;  %v7740_v55 = vcombine.low %v10927_v37, %v10990_v54  ;;  %v7572_v29 = vcombine.low %v11873_v41, %v10968_v21 }
 0x3cf   : > { %8190 = vrot.lane.b32.xlu1 %v11864_v35, %s8735_s6  ;;  %v7847_v7 = vpop.permute.xlu1 %7846  ;;  %v11869_v35 = vld [vmem:[#allocation15_spill] sm:$0xff]  ;;  %v11874_v43 = vcombine.low %v10798_v4, %v10835_v38 }
 0x3d0   : > { %8164 = vrot.lane.b32.xlu0 %v7353_v57, %s8734_s21  ;;  %v6620_v57 = vcombine.low %v11866_v19, %v11865_v56  ;;  %v6484_v39 = vcombine.low %v11870_v18, %v11869_v35  ;;  %v8267_v31 = vsel %vm8261_vm3, %v8258_v40, %v7847_v7  ;;  %v7909_v52 = vpop.permute.xlu0 %7908  ;;  %v11153_v63 = vrot.slane %v6652_v32, %v8908_v34 }
 0x3d1   : > { %v8275_v7 = vsel %vm8270_vm4, %v11033_v16, %v7877_v30  ;;  %v11167_v3 = vrot.slane %v7740_v55, %v8908_v34  ;;  %v7604_v32 = vcombine.low %v10893_v10, %v10976_v53 }
 0x3d2   : > { %v11142_v60 = vrot.slane %v6620_v57, %v8908_v34  ;;  %v11156_v40 = vrot.slane %v6484_v39, %v8908_v34  ;;  %v11162_v57 = vrot.slane %v7708_v22, %v8908_v34  ;;  %v8280_v39 = vsel %vm8279_vm5, %v8271_v17, %v7901_v25 }
 0x3d3   : > { %8198 = vrot.lane.b32.xlu1 %v7490_v24, %s8735_s6  ;;  %v11159_v24 = vrot.slane %v6516_v20, %v8908_v34  ;;  %v7871_v9 = vpop.permute.xlu1 %7870  ;;  %v11189_v17 = vrot.slane %v7604_v32, %v8908_v34  ;;  %v8284_v16 = vsel %vm8279_vm5, %v8275_v7, %v7909_v52  ;;  %v6485_v52 = vcombine.high %v11870_v18, %v11869_v35 }
 0x3d4   : > { %8188 = vrot.lane.b32.xlu0 %v11874_v43, %s8735_s6  ;;  %v11170_v43 = vrot.slane %v7572_v29, %v8908_v34  ;;  %v6672_v20 = vcombine.low %v11142_v60, %v11153_v63  ;;  %v8272_v30 = vsel %vm8270_vm4, %v8263_v6, %v7871_v9  ;;  %v11875_v29 = vcombine.high %v11862_v12, %v11863_v49  ;;  %v7933_v9 = vpop.permute.xlu0 %7932 }
 0x3d5   : > { %v6536_v22 = vcombine.low %v11156_v40, %v11159_v24  ;;  %v7760_v25 = vcombine.low %v11162_v57, %v11167_v3  ;;  %v7761_v6 = vcombine.high %v11162_v57, %v11167_v3  ;;  %v6621_v12 = vcombine.high %v11866_v19, %v11865_v56 }
 0x3d6   : > { %v6653_v49 = vcombine.high %v11868_v48, %v11867_v2  ;;  %v8289_v32 = vsel %vm8288_vm6, %v8280_v39, %v7933_v9  ;;  %v6517_v19 = vcombine.high %v11872_v23, %v11871_v46  ;;  %v7709_v2 = vcombine.high %v10923_v28, %v10987_v61 }
 0x3d7   : > { %8222 = vrot.lane.b32.xlu1 %v11875_v29, %s8736_s8  ;;  %v7624_v29 = vcombine.low %v11170_v43, %v11189_v17  ;;  %v7879_v7 = vpop.permute.xlu1 %7878  ;;  %v11209_v55 = vrot.slane %v6621_v12, %v8908_v34  ;;  %v11221_v39 = vrot.slane %v6485_v52, %v8908_v34  ;;  %v7741_v18 = vcombine.high %v10927_v37, %v10990_v54 }
 0x3d8   : > { %8196 = vrot.lane.b32.xlu0 %v7354_v62, %s8735_s6  ;;  %v7625_v62 = vcombine.high %v11170_v43, %v11189_v17  ;;  %v11212_v56 = vrot.slane %v6653_v49, %v8908_v34  ;;  %v8276_v48 = vsel %vm8270_vm4, %v8267_v31, %v7879_v7  ;;  %v7573_v35 = vcombine.high %v11873_v41, %v10968_v21  ;;  %v7941_v23 = vpop.permute.xlu0 %7940 }
 0x3d9   : > { %v11234_v61 = vrot.slane %v6517_v19, %v8908_v34  ;;  %v7605_v37 = vcombine.high %v10893_v10, %v10976_v53  ;;  %v7355_v21 = vcombine.high %v11036_v33, %v11044_v26  ;;  %v8293_v54 = vsel %vm8288_vm6, %v8284_v16, %v7941_v23 }
 0x3da   : > { %v6674_v28 = vcombine.low %v11209_v55, %v11212_v56  ;;  %v11245_v4 = vrot.slane %v7741_v18, %v8908_v34  ;;  %v11248_v38 = vrot.slane %v7573_v35, %v8908_v34  ;;  %v6675_v10 = vcombine.high %v11209_v55, %v11212_v56 }
 0x3db   : > { %8230 = vrot.lane.b32.xlu1 %v7491_v1, %s8736_s8  ;;  %v11237_v1 = vrot.slane %v7709_v2, %v8908_v34  ;;  %v6538_v41 = vcombine.low %v11221_v39, %v11234_v61  ;;  %v11253_v46 = vrot.slane %v7605_v37, %v8908_v34  ;;  %v6539_v53 = vcombine.high %v11221_v39, %v11234_v61 }
 0x3dc   : > { %8220 = vrot.lane.b32.xlu0 %v6267_v45, %s8736_s8  ;;  %v7903_v45 = vpop.permute.xlu1 %7902  ;;  %v11876_v26 = vcombine.low %v10844_v8, %v10847_v14  ;;  %v7965_v16 = vpop.permute.xlu0 %7964  ;;  %v11877_v7 = vcombine.low %v10950_v47, %v10953_v44  ;;  %v11878_v19 = vcombine.low %v10850_v0, %v10862_v59 }
 0x3dd   : > { %v8281_v33 = vsel %vm8279_vm5, %v8272_v30, %v7903_v45  ;;  %v7762_v31 = vcombine.low %v11237_v1, %v11245_v4  ;;  %v7763_v34 = vcombine.high %v11237_v1, %v11245_v4  ;;  %v7626_v9 = vcombine.low %v11248_v38, %v11253_v46 }
 0x3de   : > { %v7627_v30 = vcombine.high %v11248_v38, %v11253_v46  ;;  %v8298_v12 = vsel %vm8297_vm7, %v8289_v32, %v7965_v16  ;;  %v11879_v32 = vcombine.high %v10844_v8, %v10847_v14  ;;  %v11883_v14 = vld [vmem:[#allocation8_spill] sm:$0xff] }
 0x3df   : > { %8002 = vrot.lane.b32.xlu1 %v11876_v26, %s8720_s18  ;;  %v11884_v26 = vld [vmem:[#allocation9_spill] sm:$0xff] }
 0x3e0   : > { %8228 = vrot.lane.b32.xlu0 %v7355_v21, %s8736_s8  ;;  %v7911_v49 = vpop.permute.xlu1 %7910  ;;  %v7973_v2 = vpop.permute.xlu0 %7972  ;;  %v7076_v16 = vcombine.low %v11884_v26, %v11883_v14 }
 0x3e1   : > { %v8285_v52 = vsel %vm8279_vm5, %v8276_v48, %v7911_v49  ;;  %v8302_v18 = vsel %vm8297_vm7, %v8293_v54, %v7973_v2  ;;  %v11880_v48 = vcombine.low %v11013_v42, %v11039_v36  ;;  %v11881_v54 = vcombine.high %v10950_v47, %v10953_v44 }
 0x3e3   : > { %8010 = vrot.lane.b32.xlu1 %v11877_v7, %s8720_s18 }
 0x3e4   : > { %8000 = vrot.lane.b32.xlu0 %v11878_v19, %s8720_s18  ;;  %v7935_v35 = vpop.permute.xlu1 %7934  ;;  %v7785_v37 = vpop.permute.xlu0 %7784 }
 0x3e5   : > { %v8290_v23 = vsel %vm8288_vm6, %v8281_v33, %v7935_v35  ;;  %v11882_v33 = vcombine.high %v10850_v0, %v10862_v59  ;;  %v8251_v47 = vsel %vm8244_vm2, %v7076_v16, %v7785_v37  ;;  %v11886_v0 = vcombine.high %v11013_v42, %v11039_v36  ;;  %v11890_v42 = vld [vmem:[#allocation24_spill] sm:$0xff] }
 0x3e6   : > { %v11887_v35 = vcombine.low %v11079_v50, %v11095_v15 }
 0x3e7   : > { %8034 = vrot.lane.b32.xlu1 %v11879_v32, %s8730_s7 }
 0x3e8   : > { %8008 = vrot.lane.b32.xlu0 %v11880_v48, %s8720_s18  ;;  %v7943_v21 = vpop.permute.xlu1 %7942  ;;  %v7809_v8 = vpop.permute.xlu0 %7808  ;;  %v11889_v48 = vld [vmem:[#allocation25_spill] sm:$0xff]  ;;  %s8403_s18 = sshll.u32 %s11491_s16, 4  ;;  %s11559_s18 = int_to_ptr.vmem [resolvable:$true] %s8403_s18 }
 0x3e9   : > { %v8294_v45 = vsel %vm8288_vm6, %v8285_v52, %v7943_v21  ;;  %v11885_v52 = vcombine.low %v11063_v5, %v11066_v58  ;;  %v5988_v36 = vcombine.low %v11890_v42, %v11889_v48  ;;  %s8628_s29 = scalar_lea.vmem %s11559_s18, 1024 }
 0x3ea   : > { %p8629_p8 = scmp.ne.s32.totalorder %s11559_s18, %s8628_s29 }
 0x3eb   : > { %8042 = vrot.lane.b32.xlu1 %v11881_v54, %s8730_s7  ;;  %v11892_v54 = vcombine.low %v11098_v51, %v11110_v11 }
 0x3ec   : > { %8032 = vrot.lane.b32.xlu0 %v11882_v33, %s8730_s7  ;;  %v7967_v49 = vpop.permute.xlu1 %7966  ;;  %v7817_v59 = vpop.permute.xlu0 %7816  ;;  %p8630_p11 = pnand %p8629_p8, %p11902_p9 }
 0x3ed   : > { %v11305_v7 = vsel %vm8297_vm7, %v8290_v23, %v7967_v49  ;;  %v8259_v44 = vsel %vm184_vm1, %v8251_v47, %v7817_v59  ;;  %v11888_v23 = vcombine.low %v11069_v27, %v11076_v13  ;;  %v11896_v59 = vld [vmem:[#allocation26_spill] sm:$0xff] }
 0x3ee   : > { %p8631_p0 = pneg %p8630_p11 }
 0x3ef   : > { %8066 = vrot.lane.b32.xlu1 %v11885_v52, %s8731_s30 }
 0x3f0   : > { %8040 = vrot.lane.b32.xlu0 %v11886_v0, %s8730_s7  ;;  %v7975_v19 = vpop.permute.xlu1 %7974  ;;  %v7841_v32 = vpop.permute.xlu0 %7840  ;;  %v11895_v0 = vld [vmem:[#allocation27_spill] sm:$0xff]  ;;  %s8632_s7 = sshll.u32 %s8737_s3, 4  ;;  %s8633_s7 = int_to_ptr.vmem [resolvable:$false] %s8632_s7 }
 0x3f1   : > { %v8303_v2 = vsel %vm8297_vm7, %v8294_v45, %v7975_v19  ;;  %v11891_v45 = vcombine.high %v11063_v5, %v11066_v58  ;;  %v11893_v5 = vcombine.high %v11079_v50, %v11095_v15  ;;  %v11894_v58 = vcombine.high %v11069_v27, %v11076_v13  ;;  %p8635_p7 = scmp.lt.s32.totalorder %s11559_s18, %s8633_s7 }
 0x3f2   : > { %v11897_v50 = vcombine.high %v11098_v51, %v11110_v11 }
 0x3f3   : > { %8074 = vrot.lane.b32.xlu1 %v11887_v35, %s8731_s30  ;;  %v11899_v35 = vld [vmem:[#allocation32_spill] sm:$0xff] }
 0x3f4   : > { %8064 = vrot.lane.b32.xlu0 %v11888_v23, %s8731_s30  ;;  %v7777_v37 = vpop.permute.xlu1 %7776  ;;  %v7849_v14 = vpop.permute.xlu0 %7848 }
 0x3f5   : > { %v8247_v21 = vsel %vm8244_vm2, %v5988_v36, %v7777_v37  ;;  %v11339_v26 = vsel %vm8261_vm3, %v8259_v44, %v7849_v14  ;;  %v6124_v44 = vcombine.low %v11896_v59, %v11895_v0 }
 0x3f6   : > { %v8255_v33 = vsel %vm184_vm1, %v8247_v21, %v7809_v8 }
 0x3f7   : > { %8098 = vrot.lane.b32.xlu1 %v11891_v45, %s8732_s4  ;;  %v8264_v16 = vsel %vm8261_vm3, %v8255_v33, %v7841_v32 }
 0x3f8   : > { %8072 = vrot.lane.b32.xlu0 %v11892_v54, %s8731_s30  ;;  %v7779_v49 = vpop.permute.xlu1 %7778  ;;  %v7997_v52 = vpop.permute.xlu0 %7996  ;;  %s8634_s30 = scalar_lea.vmem %s8633_s7, 2048 }
 0x3f9   : > { %v8307_v8 = vsel %vm8306_vm8, %v8298_v12, %v7997_v52  ;;  %v8248_v13 = vsel %vm8244_vm2, %v6124_v44, %v7779_v49  ;;  %p8636_p13 = scmp.lt.s32.totalorder %s8634_s30, %s8628_s29 }
 0x3fb   : > { %8106 = vrot.lane.b32.xlu1 %v11893_v5, %s8732_s4  ;;  %p8637_p3 = por %p8636_p13, %p8635_p7 }
 0x3fc   : > { %8096 = vrot.lane.b32.xlu0 %v11894_v58, %s8732_s4  ;;  %v7787_v47 = vpop.permute.xlu1 %7786  ;;  %v8005_v15 = vpop.permute.xlu0 %8004 }
 0x3fd   : > { %v8311_v27 = vsel %vm8306_vm8, %v8302_v18, %v8005_v15  ;;  %p8638_p6 = pnand %p8637_p3, %p8631_p0 }
 0x3ff   : > { %8130 = vrot.lane.b32.xlu1 %v6672_v20, %s8733_s5  ;;  %v11898_v20 = vld [vmem:[#allocation33_spill] sm:$0xff] }
 0x400   : > { %8104 = vrot.lane.b32.xlu0 %v11897_v50, %s8732_s4  ;;  %v7811_v12 = vpop.permute.xlu1 %7810  ;;  %v7212_v23 = vcombine.low %v11899_v35, %v11898_v20  ;;  %v8029_v51 = vpop.permute.xlu0 %8028 }
 0x401   : > { %v8256_v19 = vsel %vm184_vm1, %v8248_v13, %v7811_v12  ;;  %v8316_v11 = vsel %vm8315_vm9, %v8307_v8, %v8029_v51 }
 0x402   : > { %v8252_v18 = vsel %vm8244_vm2, %v7212_v23, %v7787_v47 }
 0x403   : > { %8138 = vrot.lane.b32.xlu1 %v7760_v25, %s8733_s5  ;;  %v11900_v25 = vcombine.high %v11142_v60, %v11153_v63  ;;  %v11901_v63 = vcombine.high %v11156_v40, %v11159_v24 }
 0x404   : > { %8128 = vrot.lane.b32.xlu0 %v6536_v22, %s8733_s5  ;;  %v7819_v32 = vpop.permute.xlu1 %7818  ;;  %v8037_v42 = vpop.permute.xlu0 %8036 }
 0x405   : > { %v8260_v48 = vsel %vm184_vm1, %v8252_v18, %v7819_v32  ;;  %v8320_v22 = vsel %vm8315_vm9, %v8311_v27, %v8037_v42 }
 0x407   : > { %8162 = vrot.lane.b32.xlu1 %v11900_v25, %s8734_s21 }
 0x408   : > { %8136 = vrot.lane.b32.xlu0 %v7624_v29, %s8733_s5  ;;  %v7843_v36 = vpop.permute.xlu1 %7842  ;;  %v8061_v60 = vpop.permute.xlu0 %8060 }
 0x409   : > { %v8265_v37 = vsel %vm8261_vm3, %v8256_v19, %v7843_v36  ;;  %v11396_v29 = vsel %vm8324_vm10, %v8316_v11, %v8061_v60 }
 0x40b   : > { %8170 = vrot.lane.b32.xlu1 %v7761_v6, %s8734_s21 }
 0x40c   : > { %8160 = vrot.lane.b32.xlu0 %v11901_v63, %s8734_s21  ;;  %v7851_v21 = vpop.permute.xlu1 %7850  ;;  %v8069_v3 = vpop.permute.xlu0 %8068 }
 0x40d   : > { %v8269_v45 = vsel %vm8261_vm3, %v8260_v48, %v7851_v21  ;;  %v11408_v40 = vsel %vm8324_vm10, %v8320_v22, %v8069_v3 }
 0x40f   : > { %8194 = vrot.lane.b32.xlu1 %v6674_v28, %s8735_s6 }
 0x410   : > { %8168 = vrot.lane.b32.xlu0 %v7625_v62, %s8734_s21  ;;  %v7999_v24 = vpop.permute.xlu1 %7998  ;;  %v8093_v43 = vpop.permute.xlu0 %8092 }
 0x411   : > { %v8308_v57 = vsel %vm8306_vm8, %v11305_v7, %v7999_v24  ;;  %v8334_v22 = vsel %vm8333_vm11, %v11396_v29, %v8093_v43 }
 0x413   : > { %8202 = vrot.lane.b32.xlu1 %v7762_v31, %s8735_s6 }
 0x414   : > { %8192 = vrot.lane.b32.xlu0 %v6538_v41, %s8735_s6  ;;  %v8007_v17 = vpop.permute.xlu1 %8006  ;;  %v11429_v62 = vpop.permute.xlu0 %8100 }
 0x415   : > { %v8312_v6 = vsel %vm8306_vm8, %v8303_v2, %v8007_v17 }
 0x417   : > { %8226 = vrot.lane.b32.xlu1 %v6675_v10, %s8736_s8 }
 0x418   : > { %8200 = vrot.lane.b32.xlu0 %v7626_v9, %s8735_s6  ;;  %v8031_v28 = vpop.permute.xlu1 %8030  ;;  %v7873_v55 = vpop.permute.xlu0 %7872 }
 0x419   : > { %v8317_v31 = vsel %vm8315_vm9, %v8308_v57, %v8031_v28  ;;  %v8273_v56 = vsel %vm8270_vm4, %v8264_v16, %v7873_v55 }
 0x41b   : > { %8234 = vrot.lane.b32.xlu1 %v7763_v34, %s8736_s8 }
 0x41c   : > { %8224 = vrot.lane.b32.xlu0 %v6539_v53, %s8736_s8  ;;  %v8039_v41 = vpop.permute.xlu1 %8038  ;;  %v7881_v9 = vpop.permute.xlu0 %7880 }
 0x41d   : > { %v8321_v10 = vsel %vm8315_vm9, %v8312_v6, %v8039_v41  ;;  %v8277_v1 = vsel %vm8270_vm4, %v11339_v26, %v7881_v9 }
 0x420   : > { %8232 = vrot.lane.b32.xlu0 %v7627_v30, %s8736_s8  ;;  %v8063_v4 = vpop.permute.xlu1 %8062  ;;  %v7905_v39 = vpop.permute.xlu0 %7904 }
 0x421   : > { %v11449_v34 = vsel %vm8324_vm10, %v8317_v31, %v8063_v4  ;;  %v8282_v61 = vsel %vm8279_vm5, %v8273_v56, %v7905_v39 }
 0x424   : > { %v8071_v53 = vpop.permute.xlu1 %8070  ;;  %v7913_v2 = vpop.permute.xlu0 %7912 }
 0x425   : > { %v11453_v7 = vsel %vm8324_vm10, %v8321_v10, %v8071_v53  ;;  %v8286_v54 = vsel %vm8279_vm5, %v8277_v1, %v7913_v2 }
 0x428   : > { %v11456_v38 = vpop.permute.xlu1 %8094  ;;  %v7937_v46 = vpop.permute.xlu0 %7936 }
 0x429   : > { %v8291_v30 = vsel %vm8288_vm6, %v8282_v61, %v7937_v46  ;;  %v8335_v10 = vsel %vm8333_vm11, %v11449_v34, %v11456_v38 }
 0x42c   : > { %v11459_v33 = vpop.permute.xlu1 %8102  ;;  %v7945_v14 = vpop.permute.xlu0 %7944 }
 0x42d   : > { %v8295_v26 = vsel %vm8288_vm6, %v8286_v54, %v7945_v14  ;;  %v8339_v53 = vsel %vm8333_vm11, %v11453_v7, %v11459_v33 }
 0x430   : > { %v7875_v16 = vpop.permute.xlu1 %7874  ;;  %v7969_v5 = vpop.permute.xlu0 %7968 }
 0x431   : > { %v8274_v49 = vsel %vm8270_vm4, %v8265_v37, %v7875_v16  ;;  %v11464_v58 = vsel %vm8297_vm7, %v8291_v30, %v7969_v5 }
 0x434   : > { %v7883_v52 = vpop.permute.xlu1 %7882  ;;  %v7977_v47 = vpop.permute.xlu0 %7976 }
 0x435   : > { %v8278_v8 = vsel %vm8270_vm4, %v8269_v45, %v7883_v52  ;;  %v11468_v0 = vsel %vm8297_vm7, %v8295_v26, %v7977_v47  ;;  %v8338_v45 = vsel %vm8333_vm11, %v11408_v40, %v11429_v62 }
 0x438   : > { %v7907_v59 = vpop.permute.xlu1 %7906  ;;  %v8125_v50 = vpop.permute.xlu0 %8124 }
 0x439   : > { %v8283_v44 = vsel %vm8279_vm5, %v8274_v49, %v7907_v59  ;;  %v8343_v36 = vsel %vm8342_vm12, %v8334_v22, %v8125_v50 }
 0x43c   : > { %v7915_v15 = vpop.permute.xlu1 %7914  ;;  %v8133_v13 = vpop.permute.xlu0 %8132 }
 0x43d   : > { %v8287_v27 = vsel %vm8279_vm5, %v8278_v8, %v7915_v15  ;;  %v8347_v24 = vsel %vm8342_vm12, %v8338_v45, %v8133_v13 }
 0x440   : > { %v7939_v12 = vpop.permute.xlu1 %7938  ;;  %v8157_v20 = vpop.permute.xlu0 %8156 }
 0x441   : > { %v8292_v19 = vsel %vm8288_vm6, %v8283_v44, %v7939_v12  ;;  %v8352_v63 = vsel %vm8351_vm13, %v8343_v36, %v8157_v20 }
 0x444   : > { %v7947_v35 = vpop.permute.xlu1 %7946  ;;  %v8165_v51 = vpop.permute.xlu0 %8164 }
 0x445   : > { %v8296_v23 = vsel %vm8288_vm6, %v8287_v27, %v7947_v35  ;;  %v8356_v57 = vsel %vm8351_vm13, %v8347_v24, %v8165_v51 }
 0x448   : > { %v7971_v11 = vpop.permute.xlu1 %7970  ;;  %v8189_v32 = vpop.permute.xlu0 %8188 }
 0x449   : > { %v11475_v18 = vsel %vm8297_vm7, %v8292_v19, %v7971_v11  ;;  %v8361_v60 = vsel %vm8360_vm14, %v8352_v63, %v8189_v32 }
 0x44c   : > { %v7979_v48 = vpop.permute.xlu1 %7978  ;;  %v8197_v42 = vpop.permute.xlu0 %8196 }
 0x44d   : > { %v11478_v25 = vsel %vm8297_vm7, %v8296_v23, %v7979_v48  ;;  %v8365_v43 = vsel %vm8360_vm14, %v8356_v57, %v8197_v42 }
 0x450   : > { %v8127_v37 = vpop.permute.xlu1 %8126  ;;  %v8221_v21 = vpop.permute.xlu0 %8220 }
 0x451   : > { %v8370_v3 = vsel %vm8369_vm15, %v8361_v60, %v8221_v21  ;;  %v8344_v9 = vsel %vm8342_vm12, %v8335_v10, %v8127_v37 }
 0x452   : > { %8379 = vst.msk [vmem:[%s11491_s16] sm:$0xff] %vm8378_vm0, %v8370_v3 }
 0x454   : > { %v8135_v29 = vpop.permute.xlu1 %8134  ;;  %v8229_v17 = vpop.permute.xlu0 %8228 }
 0x455   : > { %v8374_v6 = vsel %vm8369_vm15, %v8365_v43, %v8229_v17  ;;  %v8348_v54 = vsel %vm8342_vm12, %v8339_v53, %v8135_v29 }
 0x456   : > { %8383 = vst.msk [vmem:[%s11491_s16 + $0x20] sm:$0xff] %vm8378_vm0, %v8374_v6 }
 0x458   : > { %v8159_v40 = vpop.permute.xlu1 %8158  ;;  %v8001_v62 = vpop.permute.xlu0 %8000 }
 0x459   : > { %v8353_v4 = vsel %vm8351_vm13, %v8344_v9, %v8159_v40  ;;  %v8309_v12 = vsel %vm8306_vm8, %v11464_v58, %v8001_v62 }
 0x45c   : > { %v8167_v28 = vpop.permute.xlu1 %8166  ;;  %v8009_v31 = vpop.permute.xlu0 %8008 }
 0x45d   : > { %v8357_v34 = vsel %vm8351_vm13, %v8348_v54, %v8167_v28  ;;  %v8313_v11 = vsel %vm8306_vm8, %v11468_v0, %v8009_v31 }
 0x460   : > { %v8191_v55 = vpop.permute.xlu1 %8190  ;;  %v8033_v56 = vpop.permute.xlu0 %8032 }
 0x461   : > { %v8362_v39 = vsel %vm8360_vm14, %v8353_v4, %v8191_v55  ;;  %v8318_v20 = vsel %vm8315_vm9, %v8309_v12, %v8033_v56 }
 0x464   : > { %v8199_v41 = vpop.permute.xlu1 %8198  ;;  %v8041_v1 = vpop.permute.xlu0 %8040 }
 0x465   : > { %v8366_v38 = vsel %vm8360_vm14, %v8357_v34, %v8199_v41  ;;  %v8322_v42 = vsel %vm8315_vm9, %v8313_v11, %v8041_v1 }
 0x468   : > { %v8223_v61 = vpop.permute.xlu1 %8222  ;;  %v8065_v46 = vpop.permute.xlu0 %8064 }
 0x469   : > { %v8371_v2 = vsel %vm8369_vm15, %v8362_v39, %v8223_v61  ;;  %v8327_v35 = vsel %vm8324_vm10, %v8318_v20, %v8065_v46 }
 0x46a   : > { %8380 = vst.msk [vmem:[%s11491_s16 + $0x8] sm:$0xff] %vm8378_vm0, %v8371_v2 }
 0x46c   : > { %v8231_v30 = vpop.permute.xlu1 %8230  ;;  %v8073_v26 = vpop.permute.xlu0 %8072 }
 0x46d   : > { %v8375_v14 = vsel %vm8369_vm15, %v8366_v38, %v8231_v30  ;;  %v8331_v22 = vsel %vm8324_vm10, %v8322_v42, %v8073_v26 }
 0x46e   : > { %8384 = vst.msk [vmem:[%s11491_s16 + $0x28] sm:$0xff] %vm8378_vm0, %v8375_v14 }
 0x470   : > { %v8003_v16 = vpop.permute.xlu1 %8002  ;;  %v8097_v49 = vpop.permute.xlu0 %8096 }
 0x471   : > { %v8336_v51 = vsel %vm8333_vm11, %v8327_v35, %v8097_v49  ;;  %v8310_v6 = vsel %vm8306_vm8, %v11475_v18, %v8003_v16 }
 0x474   : > { %v8011_v7 = vpop.permute.xlu1 %8010  ;;  %v8105_v33 = vpop.permute.xlu0 %8104 }
 0x475   : > { %v8340_v63 = vsel %vm8333_vm11, %v8331_v22, %v8105_v33  ;;  %v8314_v55 = vsel %vm8306_vm8, %v11478_v25, %v8011_v7 }
 0x478   : > { %v8035_v5 = vpop.permute.xlu1 %8034  ;;  %v8129_v52 = vpop.permute.xlu0 %8128 }
 0x479   : > { %v8345_v32 = vsel %vm8342_vm12, %v8336_v51, %v8129_v52  ;;  %v8319_v40 = vsel %vm8315_vm9, %v8310_v6, %v8035_v5 }
 0x47c   : > { %v8043_v8 = vpop.permute.xlu1 %8042  ;;  %v8137_v47 = vpop.permute.xlu0 %8136 }
 0x47d   : > { %v8349_v21 = vsel %vm8342_vm12, %v8340_v63, %v8137_v47  ;;  %v8323_v41 = vsel %vm8315_vm9, %v8314_v55, %v8043_v8 }
 0x480   : > { %v8067_v59 = vpop.permute.xlu1 %8066  ;;  %v8161_v44 = vpop.permute.xlu0 %8160 }
 0x481   : > { %v8354_v58 = vsel %vm8351_vm13, %v8345_v32, %v8161_v44  ;;  %v8328_v62 = vsel %vm8324_vm10, %v8319_v40, %v8067_v59 }
 0x484   : > { %v8075_v50 = vpop.permute.xlu1 %8074  ;;  %v8169_v15 = vpop.permute.xlu0 %8168 }
 0x485   : > { %v8358_v45 = vsel %vm8351_vm13, %v8349_v21, %v8169_v15  ;;  %v8332_v18 = vsel %vm8324_vm10, %v8323_v41, %v8075_v50 }
 0x488   : > { %v8099_v27 = vpop.permute.xlu1 %8098  ;;  %v8193_v13 = vpop.permute.xlu0 %8192 }
 0x489   : > { %v8363_v36 = vsel %vm8360_vm14, %v8354_v58, %v8193_v13  ;;  %v8337_v31 = vsel %vm8333_vm11, %v8328_v62, %v8099_v27 }
 0x48c   : > { %v8107_v19 = vpop.permute.xlu1 %8106  ;;  %v8201_v23 = vpop.permute.xlu0 %8200 }
 0x48d   : > { %v8367_v3 = vsel %vm8360_vm14, %v8358_v45, %v8201_v23  ;;  %v8341_v4 = vsel %vm8333_vm11, %v8332_v18, %v8107_v19 }
 0x490   : > { %v8131_v48 = vpop.permute.xlu1 %8130  ;;  %v8225_v37 = vpop.permute.xlu0 %8224 }
 0x491   : > { %v8372_v60 = vsel %vm8369_vm15, %v8363_v36, %v8225_v37  ;;  %v8346_v56 = vsel %vm8342_vm12, %v8337_v31, %v8131_v48 }
 0x492   : > { %8381 = vst.msk [vmem:[%s11491_s16 + $0x10] sm:$0xff] %vm8378_vm0, %v8372_v60 }
 0x494   : > { %v8139_v0 = vpop.permute.xlu1 %8138  ;;  %v8233_v24 = vpop.permute.xlu0 %8232 }
 0x495   : > { %v8376_v29 = vsel %vm8369_vm15, %v8367_v3, %v8233_v24  ;;  %v8350_v25 = vsel %vm8342_vm12, %v8341_v4, %v8139_v0 }
 0x496   : > { %8385 = vst.msk [vmem:[%s11491_s16 + $0x30] sm:$0xff] %vm8378_vm0, %v8376_v29 }
 0x498   : > { %v8163_v57 = vpop.permute.xlu1 %8162 }
 0x499   : > { %v8355_v10 = vsel %vm8351_vm13, %v8346_v56, %v8163_v57 }
 0x49c   : > { %v8171_v43 = vpop.permute.xlu1 %8170 }
 0x49d   : > { %v8359_v61 = vsel %vm8351_vm13, %v8350_v25, %v8171_v43 }
 0x4a0   : > { %v8195_v17 = vpop.permute.xlu1 %8194 }
 0x4a1   : > { %v8364_v9 = vsel %vm8360_vm14, %v8355_v10, %v8195_v17 }
 0x4a4   : > { %v8203_v28 = vpop.permute.xlu1 %8202 }
 0x4a5   : > { %v8368_v53 = vsel %vm8360_vm14, %v8359_v61, %v8203_v28 }
 0x4a8   : > { %v8227_v1 = vpop.permute.xlu1 %8226 }
 0x4a9   : > { %v8373_v39 = vsel %vm8369_vm15, %v8364_v9, %v8227_v1 }
 0x4aa   : > { %8382 = vst.msk [vmem:[%s11491_s16 + $0x18] sm:$0xff] %vm8378_vm0, %v8373_v39 }
 0x4ac   : > { %v8235_v2 = vpop.permute.xlu1 %8234 }
 0x4ad   : > { %v8377_v54 = vsel %vm8369_vm15, %v8368_v53, %v8235_v2 }
 0x4ae   : > { %8386 = vst.msk [vmem:[%s11491_s16 + $0x38] sm:$0xff] %vm8378_vm0, %v8377_v54 }
 0x4af   : > { %8641 = shalt.err (!%p8638_p6)
}
 0x4b0   : > { %s8642_s4 = scalar_lea.hbm %s11566_s27, 1024  ;;  %s8646_s6 = scalar_lea.hbm %s11621_s2, 2048 }
 0x4b1   : > { %p8643_p4 = scmp.ne.s32.totalorder %s11566_s27, %s8642_s4  ;;  %p8647_p1 = scmp.lt.u32.totalorder %s11566_s27, %s11621_s2 }
 0x4b2   : > { %p8648_p2 = scmp.lt.u32.totalorder %s8646_s6, %s8642_s4  ;;  %p8650_p8 = scmp.lt.u32.totalorder %s8642_s4, %s11566_s27 }
 0x4b3   : > { %p8644_p10 = pnand %p8643_p4, %p11902_p9 }
 0x4b4   : > { %p8649_p5 = por %p8648_p2, %p8647_p1 }
 0x4b5   : > { %p8645_p12 = pneg %p8644_p10 }
 0x4b6   : > { %p8651_p11 = por %p8650_p8, %p8649_p5 }
 0x4b8   : > { %p8652_p0 = pnand %p8651_p11, %p8645_p12 }
 0x4ba   : > { %8655 = shalt.err (!%p8652_p0)
}
 0x4bb   : > { %s8738_s16 = smov 128  }
 0x4bc   : > { %8512 = dma.vmem_to_hbm [thread:$0]  (%p11902_p9), %s11559_s18, 1024, %s11566_s27, %s8388_s12, %s8738_s16, %s8738_s16, %s8726_s26  }
 0x4bd PF: > { %s8418_s19 = sand.u32 1, %s8690_s9   ;;  %p11903_p7 = scmp.ne.s32.totalorder %s11699_s24, 0 }
 0x4be   : > { %p11904_p13 = scmp.ge.s32.totalorder %s8710_s14, 2  ;;  %s8419_s20 = scalar_lea.sflag [#allocation4], %s8418_s19 }
 0x4c0   : > { %p8519_p3 = pnand %p11904_p13, %p11903_p7 }
 0x4c2   : > { %8685 = dma.done.wait (!%p8519_p3), %s8419_s20, 1024  }
 0x4c3   : > { %8687 = vsyncadd (!%p8519_p3), %s8419_s20, 4294966272  ;;  %s18_s14 = sadd.s32 1, %s8710_s14   ;;  %s11905_s9 = smov %s8694_s10 }
 0x4c4   : > { %p15_p6 = scmp.ge.s32.totalorder %s18_s14, 4   ;;  %s11906_s10 = smov %s8698_s11 }
 0x4c5   : > { %s11907_s11 = smov %s8810_s23  ;;  %s11908_s12 = smov %s8706_s13 }
 0x4c6   : > { %s11909_s13 = smov %s11911_s17  ;;  %17 = sbr.rel (!%p15_p6) target bundleno = 6 (0x6), region = 73 }
 0x4cd   :  { %8424 = vsyncpa [#allocation3], 1 }
 0x4ce   :  { %8426 = vsyncpa [#allocation3 + $0x1], 1 }
 0x4cf   :  { %8427 = vsyncpa [#allocation4], 1 }
 0x4d0   :  { %8429 = vsyncpa [#allocation4 + $0x1], 1 }

// kernel: tpu_custom_call.1
= control target key start
LH: loop header
LB: loop body
LE: loop exit
PB: predicated region body
PF: predicated region fallthrough
CT: control target
= control target key end

     0   :  { %7 = vsyncpa [#allocation3], 0  ;;  %s759_s0 = inlined_call_operand.vmem [shape: f32[8,4], index: 0, kind: input, shape index: {}]   ;;  %s760_s1 = inlined_call_operand.hbm [shape: f32[2,4,256], index: 1, kind: input, shape index: {}]   ;;  %s761_s2 = inlined_call_operand.hbm [shape: f32[2,8,256], index: 2, kind: output, shape index: {}]  }
   0x1   :  { %9 = vsyncpa [#allocation3 + $0x1], 0 }
   0x2   :  { %10 = vsyncpa [#allocation4], 0 }
   0x3   :  { %12 = vsyncpa [#allocation4 + $0x1], 0  ;;  %s583_s9 = smov 0   ;;  %s585_s10 = smov 0  }
   0x4   :  { %s587_s11 = smov 0   ;;  %s589_s12 = smov 0  }
   0x5   :  { %s591_s13 = smov 0   ;;  %s593_s14 = smov 0  }
   0x6 LB: > { %s367_s15 = sadd.s32 4294967295, %s563_s14   ;;  %s368_s16 = sadd.s32 4294967294, %s563_s14   ;;  %s563_s14 = sphi %s593_s14, %s18_s14   ;;  %s559_s13 = sphi %s591_s13, %s777_s13   ;;  %s555_s12 = sphi %s589_s12, %s776_s12   ;;  %s551_s11 = sphi %s587_s11, %s775_s11   ;;  %s547_s10 = sphi %s585_s10, %s774_s10   ;;  %s543_s9 = sphi %s583_s9, %s773_s9  }
   0x7   : > { %s30_s17 = sadd.s32 1, %s559_s13  ;;  %s60_s18 = sadd.s32 1, %s551_s11 }
   0x8   : > { %p32_p0 = scmp.ge.s32.totalorder %s30_s17, 2  ;;  %p67_p1 = scmp.ne.s32.totalorder %s551_s11, %s547_s10 }
   0x9   : > { %p68_p2 = scmp.eq.s32.totalorder %s563_s14, 0  ;;  %p73_p3 = scmp.ne.s32.totalorder %s547_s10, %s543_s9 }
   0xa   : > { %s779_s17 = smov (%p32_p0, %s30_s17), 0  ;;  %p74_p5 = scmp.eq.s32.totalorder %s367_s15, 0 }
   0xb   : > { %p624_p4 = por %p68_p2, %p67_p1  ;;  %s55_s20 = ssub.s32 %s559_s13, %s779_s17 }
   0xc   : > { %p99_p6 = scmp.eq.s32.totalorder %s367_s15, 1  ;;  %p58_p7 = scmp.eq.s32.totalorder %s55_s20, 0 }
   0xd   : > { %p630_p8 = por %p74_p5, %p73_p3  ;;  %p105_p10 = scmp.eq.s32.totalorder %s368_s16, 1 }
   0xe   : > { %p634_p9 = por %p99_p6, %p67_p1  ;;  %p399_p13 = scmp.lt.s32.totalorder %s563_s14, 2 }
   0xf   : > { %s639_s23 = scalar_select %p58_p7, %s551_s11, %s60_s18  }
  0x10   : > { %s765_s22 = scalar_select %p634_p9, 1, 0 }
  0x11   : > { %p641_p11 = por %p105_p10, %p73_p3  ;;  %s128_s25 = sand.u32 1, %s551_s11  }
  0x12   : > { %s371_s26 = sshll.u32 %s128_s25, 3  ;;  %s385_s27 = sshll.u32 %s559_s13, 7 }
  0x13   : > { %s766_s24 = scalar_select %p641_p11, 1, 0 }
  0x14   : > { %s652_s30 = scalar_lea.hbm %s760_s1, %s385_s27  ;;  %s132_s3 = scalar_lea.vmem [#allocation2], %s371_s26 }
  0x15   : > { %s142_s4 = sshll.u32 %s132_s3, 4  ;;  %p658_p0 = pnand %p399_p13, %p624_p4  ;;  %s654_s4 = int_to_ptr.vmem [resolvable:$true] %s142_s4 }
  0x16   : > { %s129_s6 = scalar_lea.sflag [#allocation3], %s128_s25  ;;  %s451_s7 = scalar_lea.hbm %s652_s30, 128 }
  0x17   : > { %p452_p3 = scmp.ne.s32.totalorder %s652_s30, %s451_s7  ;;  %p453_p5 = pneg %p658_p0 }
  0x18   : > { %s456_s16 = scalar_lea.hbm %s760_s1, 256  ;;  %p457_p4 = scmp.lt.u32.totalorder %s652_s30, %s760_s1 }
  0x19   : > { %p454_p6 = pnand %p453_p5, %p452_p3  ;;  %p458_p10 = scmp.lt.u32.totalorder %s456_s16, %s451_s7 }
  0x1a   : > { %p460_p12 = scmp.lt.u32.totalorder %s451_s7, %s652_s30 }
  0x1b   : > { %p455_p7 = pneg %p454_p6  ;;  %p459_p13 = por %p458_p10, %p457_p4 }
  0x1d   : > { %p461_p1 = por %p460_p12, %p459_p13 }
  0x1f   : > { %p462_p2 = pnand %p461_p1, %p455_p7 }
  0x21   : > { %465 = shalt.err (!%p462_p2)
}
  0x22   : > { %s466_s20 = scalar_lea.vmem %s654_s4, 128  ;;  %s565_s25 = smov [#allocation2]  }
  0x23   : > { %p467_p3 = scmp.ne.s32.totalorder %s654_s4, %s466_s20  ;;  %s471_s26 = sshll.u32 %s565_s25, 4  ;;  %s472_s26 = int_to_ptr.vmem [resolvable:$false] %s471_s26 }
  0x24   : > { %s473_s27 = scalar_lea.vmem %s472_s26, 256  ;;  %p474_p9 = scmp.lt.s32.totalorder %s654_s4, %s472_s26 }
  0x25   : > { %p469_p6 = pnand %p467_p3, %p453_p5  ;;  %p475_p4 = scmp.lt.s32.totalorder %s473_s27, %s466_s20 }
  0x27   : > { %p470_p11 = pneg %p469_p6  ;;  %p476_p10 = por %p475_p4, %p474_p9 }
  0x29   : > { %p477_p12 = pnand %p476_p10, %p470_p11 }
  0x2b   : > { %480 = shalt.err (!%p477_p12)
}
  0x2c   : > { %394 = dma.hbm_to_vmem [thread:$0]  (!%p658_p0), %s652_s30, 128, %s654_s4, %s129_s6  }
  0x2d   : > { %p768_p1 = scmp.lt.s32.totalorder %s563_s14, 3  ;;  %p769_p2 = scmp.ge.s32.totalorder %s563_s14, 1 }
  0x2f   : > { %p148_p5 = pnand %p769_p2, %p768_p1 }
  0x30   : > { %s694_s28 = sand.u32 (!%p148_p5), 1, %s547_s10  }
  0x31   : > { %151 = sbr.rel (%p148_p5) target bundleno = 289 (0x121), region = 28  ;;  %s375_s29 = sshll.u32 (!%p148_p5), %s694_s28, 3 }
  0x32   : > { %s154_s3 = scalar_lea.sflag (!%p148_p5), [#allocation3], %s694_s28  ;;  %s157_s7 = scalar_lea.vmem (!%p148_p5), [#allocation2], %s375_s29 }
  0x38   : > { %534 = dma.done.wait (%p630_p8), %s154_s3, 128  }
  0x39   : > { %536 = vsyncadd (%p630_p8), %s154_s3, 4294967168  ;;  %v566_v0 = vmov 0.0   ;;  %v181_v1 = vld [vmem:[%s157_s7] sm:$0xff]  ;;  %vm188_vm0 = vcmask 1043456   ;;  %vm184_vm1 = vcmask 31744   ;;  %s376_s5 = sshll.u32 %s694_s28, 4 }
  0x3a   : > { %257 = vmatprep.mubr.f32.mxu0 %v566_v0  ;;  %v183_v2 = vcombine.high %v181_v1, %v181_v1  ;;  %v180_v3 = vld [vmem:[%s759_s0] sm:$0xff]  ;;  %s177_s21 = scalar_lea.vmem [#allocation5], %s376_s5  ;;  %s386_s8 = sshll.u32 %s555_s12, 8 }
  0x3b   : > { %s283_s6 = sshll.u32 %s177_s21, 4  ;;  %s712_s18 = scalar_lea.hbm %s761_s2, %s386_s8  ;;  %s707_s6 = int_to_ptr.vmem [resolvable:$true] %s283_s6 }
  0x3c   : > { %377 = vmatprep.subr.msk.mxu0 %vm188_vm0, %v183_v2  ;;  %s267_s19 = scalar_lea.sflag [#allocation4], %s694_s28  ;;  %s481_s20 = scalar_lea.vmem %s707_s6, 256 }
  0x3d   : > { %378 = vmatpush1.msk.msra.mxu0 %vm188_vm0, %v181_v1  ;;  %p482_p8 = scmp.ne.s32.totalorder %s707_s6, %s481_s20  ;;  %p770_p9 = scmp.ne.s32.totalorder %s765_s22, 0 }
  0x3e   : > { %379 = vmatmul.mubr.msk.f32.vlgmr.msra.gmra.mrb[0].mxu0 %vm184_vm1, %v180_v3  ;;  %s567_s12 = smov [#allocation5]  }
  0x3f   : > { %p483_p11 = pnand %p482_p8, %p770_p9  ;;  %s485_s25 = sshll.u32 %s567_s12, 4  ;;  %s486_s25 = int_to_ptr.vmem [resolvable:$false] %s485_s25 }
  0x40   : > { %s487_s26 = scalar_lea.vmem %s486_s25, 512  ;;  %p488_p7 = scmp.lt.s32.totalorder %s707_s6, %s486_s25 }
  0x41   : > { %p484_p0 = pneg %p483_p11  ;;  %p489_p13 = scmp.lt.s32.totalorder %s487_s26, %s481_s20 }
  0x43   : > { %p490_p3 = por %p489_p13, %p488_p7 }
  0x45   : > { %p491_p6 = pnand %p490_p3, %p484_p0 }
 0x111   : > { %v259_v4 = vpop.f32.mrb[0].mxu0 }
 0x112   : > { %264 = vst [vmem:[%s177_s21] sm:$0xff] %v259_v4  ;;  %v261_v5 = vpop.f32.mrb[1].mxu0 }
 0x113   : > { %265 = vst [vmem:[%s177_s21 + $0x8] sm:$0xff] %v261_v5 }
 0x114   : > { %494 = shalt.err (!%p491_p6)
}
 0x115   : > { %s495_s27 = scalar_lea.hbm %s712_s18, 256  ;;  %s499_s3 = scalar_lea.hbm %s761_s2, 512 }
 0x116   : > { %p496_p4 = scmp.ne.s32.totalorder %s712_s18, %s495_s27  ;;  %p500_p1 = scmp.lt.u32.totalorder %s712_s18, %s761_s2 }
 0x117   : > { %p501_p2 = scmp.lt.u32.totalorder %s499_s3, %s495_s27  ;;  %p503_p8 = scmp.lt.u32.totalorder %s495_s27, %s712_s18 }
 0x118   : > { %p497_p10 = pnand %p496_p4, %p770_p9 }
 0x119   : > { %p502_p5 = por %p501_p2, %p500_p1 }
 0x11a   : > { %p498_p12 = pneg %p497_p10 }
 0x11b   : > { %p504_p11 = por %p503_p8, %p502_p5 }
 0x11d   : > { %p505_p0 = pnand %p504_p11, %p498_p12 }
 0x11f   : > { %508 = shalt.err (!%p505_p0)
}
 0x120   : > { %389 = dma.vmem_to_hbm [thread:$0]  (%p770_p9), %s707_s6, 256, %s712_s18, %s267_s19  }
 0x121 PF: > { %s295_s4 = sand.u32 1, %s543_s9   ;;  %p771_p7 = scmp.ne.s32.totalorder %s766_s24, 0 }
 0x122   : > { %p772_p13 = scmp.ge.s32.totalorder %s563_s14, 2  ;;  %s296_s5 = scalar_lea.sflag [#allocation4], %s295_s4 }
 0x124   : > { %p396_p3 = pnand %p772_p13, %p771_p7 }
 0x126   : > { %538 = dma.done.wait (!%p396_p3), %s296_s5, 256  }
 0x127   : > { %540 = vsyncadd (!%p396_p3), %s296_s5, 4294967040  ;;  %s18_s14 = sadd.s32 1, %s563_s14   ;;  %s773_s9 = smov %s547_s10 }
 0x128   : > { %p15_p6 = scmp.ge.s32.totalorder %s18_s14, 4   ;;  %s774_s10 = smov %s551_s11 }
 0x129   : > { %s775_s11 = smov %s639_s23  ;;  %s776_s12 = smov %s559_s13 }
 0x12a   : > { %s777_s13 = smov %s779_s17  ;;  %17 = sbr.rel (!%p15_p6) target bundleno = 6 (0x6), region = 73 }
 0x131   :  { %301 = vsyncpa [#allocation3], 1 }
 0x132   :  { %303 = vsyncpa [#allocation3 + $0x1], 1 }
 0x133   :  { %304 = vsyncpa [#allocation4], 1 }
 0x134   :  { %306 = vsyncpa [#allocation4 + $0x1], 1 }

</bundles_post_ra>
